<compile_context>
chip_gen: v7x
topology: tpu7x:2x2x1
jax: 0.10.0
libtpu: 0.0.40
codegen_flags: <defaults>
</compile_context>

<pallas_src>
import math
import functools

import jax
import jax.numpy as jnp
from jax import lax
from jax.experimental import pallas as pl
from jax.experimental.pallas import tpu as pltpu


_VMEM = functools.partial(pl.BlockSpec, memory_space=pltpu.MemorySpace.VMEM)
_SMEM = functools.partial(pl.BlockSpec, memory_space=pltpu.MemorySpace.SMEM)


# ------------------------------ fused kernel -------------------------------

def _fused_rnn_encoder_kernel(*refs, S, B, H, L):
    """Fused RnnEncoder forward.

    refs layout:
      [0]              x_ref      (S*B, E)  embedded input, time-major flat
      [1 : 1+8L]       per layer: wif (Din,3H), wib (Din,3H), bif (1,3H),
                                  bib (1,3H), whf (H,3H), whb (H,3H),
                                  bhnf (1,H), bhnb (1,H)
      then (VMEM):     fcw_f (H,H), fcw_b (H,H), fcb (1,H), lng (1,H), lnb (1,H)
      then (SMEM):     fc2w (L,2L), fc2b (L,)
      outputs:         xout (S*B,H), hn (L,B,H)
      scratch (VMEM):  gxf (S*B,3H), gxb (S*B,3H), yf (S*B,H), yb (S*B,H)
    """
    x_ref = refs[0]
    lrefs = refs[1:1 + 8 * L]
    (fcwf_ref, fcwb_ref, fcb_ref, lng_ref, lnb_ref, fc2w_ref, fc2b_ref,
     xout_ref, hn_ref, gxf_scr, gxb_scr, yf_scr, yb_scr) = refs[1 + 8 * L:]

    hn_final = []                                        # [(hf, hb)] per layer

    for l in range(L):
        (wif_ref, wib_ref, bif_ref, bib_ref,
         whf_ref, whb_ref, bhnf_ref, bhnb_ref) = lrefs[8 * l: 8 * l + 8]
        bif, bib = bif_ref[...], bib_ref[...]
        whf, whb = whf_ref[...], whb_ref[...]
        bhnf, bhnb = bhnf_ref[...], bhnb_ref[...]

        # Hoisted input-gate projections: one GEMM pair per direction over the
        # whole sequence.  For l>0 the (2H,3H) weight is split by rows so the
        # fwd/bwd layer outputs never need to be concatenated along lanes.
        if l == 0:
            x0 = x_ref[...]
            gxf_scr[...] = jnp.dot(x0, wif_ref[...],
                                   preferred_element_type=jnp.float32) + bif
            gxb_scr[...] = jnp.dot(x0, wib_ref[...],
                                   preferred_element_type=jnp.float32) + bib
        else:
            yf_prev = yf_scr[...]
            yb_prev = yb_scr[...]
            wif, wib = wif_ref[...], wib_ref[...]
            gxf_scr[...] = (jnp.dot(yf_prev, wif[:H, :],
                                    preferred_element_type=jnp.float32)
                            + jnp.dot(yb_prev, wif[H:, :],
                                      preferred_element_type=jnp.float32) + bif)
            gxb_scr[...] = (jnp.dot(yf_prev, wib[:H, :],
                                    preferred_element_type=jnp.float32)
                            + jnp.dot(yb_prev, wib[H:, :],
                                      preferred_element_type=jnp.float32) + bib)

        # Recurrence: h carried in registers, loop fully unrolled (S static).
        hf = jnp.zeros((B, H), jnp.float32)
        hb = jnp.zeros((B, H), jnp.float32)
        for t in range(S):
            gxf = gxf_scr[pl.ds(t * B, B), :]              # (B,3H) fwd @ t
            gxb = gxb_scr[pl.ds((S - 1 - t) * B, B), :]    # (B,3H) bwd @ S-1-t

            ghf = jnp.dot(hf, whf, preferred_element_type=jnp.float32)
            ghb = jnp.dot(hb, whb, preferred_element_type=jnp.float32)

            # forward gates (PyTorch GRU semantics)
            rf = jax.nn.sigmoid(gxf[:, 0:H] + ghf[:, 0:H])
            zf = jax.nn.sigmoid(gxf[:, H:2 * H] + ghf[:, H:2 * H])
            nf = jnp.tanh(gxf[:, 2 * H:3 * H] + rf * (ghf[:, 2 * H:3 * H] + bhnf))
            hf = nf + zf * (hf - nf)
            # backward gates
            rb = jax.nn.sigmoid(gxb[:, 0:H] + ghb[:, 0:H])
            zb = jax.nn.sigmoid(gxb[:, H:2 * H] + ghb[:, H:2 * H])
            nb = jnp.tanh(gxb[:, 2 * H:3 * H] + rb * (ghb[:, 2 * H:3 * H] + bhnb))
            hb = nb + zb * (hb - nb)

            # Store layer outputs in original time order (separate fwd/bwd
            # scratches -> full-width stores, no masked lane-partial writes).
            yf_scr[pl.ds(t * B, B), :] = hf
            yb_scr[pl.ds((S - 1 - t) * B, B), :] = hb

        hn_final.append((hf, hb))

    # fc: Linear(2H -> H) over the whole last-layer output; weight pre-split by
    # input rows so no fwd/bwd concat is needed (two GEMMs, one output store).
    xout_ref[...] = (jnp.dot(yf_scr[...], fcwf_ref[...],
                             preferred_element_type=jnp.float32)
                     + jnp.dot(yb_scr[...], fcwb_ref[...],
                               preferred_element_type=jnp.float32)
                     + fcb_ref[...])

    # hn head: fc2 over the (layer*dir) axis, then LayerNorm(H) + ReLU.
    # TODO(synk): nn.Dropout treated as eval-mode identity (no random mask).
    gamma = lng_ref[...]
    beta = lnb_ref[...]
    for l in range(L):
        acc = jnp.zeros((B, H), jnp.float32) + fc2b_ref[l]
        for k in range(L):
            hf_k, hb_k = hn_final[k]                  # PyTorch order l0f,l0b,l1f,l1b
            acc = acc + fc2w_ref[l, 2 * k] * hf_k + fc2w_ref[l, 2 * k + 1] * hb_k
        mean = jnp.mean(acc, axis=-1, keepdims=True)
        var = jnp.mean((acc - mean) ** 2, axis=-1, keepdims=True)
        yln = (acc - mean) * lax.rsqrt(var + 1e-5) * gamma + beta
        hn_ref[l] = jnp.maximum(yln, 0.0)


# ------------------------------ param prep ---------------------------------

def make_gru_raw(key, din, h):
    """Synthetic GRU weights in raw PyTorch layout (rows ordered r, z, n)."""
    k1, k2, k3, k4 = jax.random.split(key, 4)
    w_ih = jax.random.normal(k1, (3 * h, din), jnp.float32) * 0.1
    w_hh = jax.random.normal(k2, (3 * h, h), jnp.float32) * 0.1
    b_ih = jax.random.normal(k3, (3 * h,), jnp.float32) * 0.1
    b_hh = jax.random.normal(k4, (3 * h,), jnp.float32) * 0.1
    return (w_ih, w_hh, b_ih, b_hh)


def prep_params(raw):
    """Raw PyTorch-layout params -> fused-kernel layout (biases/scale folded)."""
    E = raw["embedding"].shape[1]
    H = raw["fc_w"].shape[0]

    def folded_input_bias(b_ih, b_hh):
        return jnp.concatenate([b_ih[:H] + b_hh[:H],
                                b_ih[H:2 * H] + b_hh[H:2 * H],
                                b_ih[2 * H:]]).reshape(1, 3 * H)

    layers = []
    for (wihf, whhf, bihf, bhhf), (wihb, whhb, bihb, bhhb) in raw["gru"]:
        layers.append(dict(
            wif=wihf.T, wib=wihb.T,
            bif=folded_input_bias(bihf, bhhf),
            bib=folded_input_bias(bihb, bhhb),
            whf=whhf.T, whb=whhb.T,
            bhnf=bhhf[2 * H:].reshape(1, H),
            bhnb=bhhb[2 * H:].reshape(1, H)))

    fcw_t = raw["fc_w"].T                              # (2H, H)
    return dict(
        emb_scaled=raw["embedding"] * math.sqrt(E),    # sqrt(E) folded into table
        layers=layers,
        fcw_f=fcw_t[:H, :], fcw_b=fcw_t[H:, :],
        fcb=raw["fc_b"].reshape(1, H),
        lng=raw["ln_gamma"].reshape(1, H), lnb=raw["ln_beta"].reshape(1, H),
        fc2w=raw["fc2_w"], fc2b=raw["fc2_b"])


# -------------------------------- wrapper -----------------------------------

def rnn_encoder_forward(tokens, kp):
    B, S = tokens.shape
    E = kp["emb_scaled"].shape[1]
    H = kp["fcw_f"].shape[1]
    L = len(kp["layers"])

    # Embedding gather (scale already folded) -> time-major flat (S*B, E).
    x = jnp.take(kp["emb_scaled"], tokens, axis=0)          # (B, S, E)
    x_flat = jnp.transpose(x, (1, 0, 2)).reshape(S * B, E)

    args = [x_flat]
    for lyr in kp["layers"]:
        args += [lyr["wif"], lyr["wib"], lyr["bif"], lyr["bib"],
                 lyr["whf"], lyr["whb"], lyr["bhnf"], lyr["bhnb"]]
    args += [kp["fcw_f"], kp["fcw_b"], kp["fcb"], kp["lng"], kp["lnb"],
             kp["fc2w"], kp["fc2b"]]

    kernel = functools.partial(_fused_rnn_encoder_kernel, S=S, B=B, H=H, L=L)
    xfc, hn_out = pl.pallas_call(
        kernel,
        out_shape=(jax.ShapeDtypeStruct((S * B, H), jnp.float32),
                   jax.ShapeDtypeStruct((L, B, H), jnp.float32)),
        in_specs=[_VMEM()] * (len(args) - 2) + [_SMEM(), _SMEM()],
        out_specs=(_VMEM(), _VMEM()),
        scratch_shapes=[pltpu.VMEM((S * B, 3 * H), jnp.float32),
                        pltpu.VMEM((S * B, 3 * H), jnp.float32),
                        pltpu.VMEM((S * B, H), jnp.float32),
                        pltpu.VMEM((S * B, H), jnp.float32)],
    )(*args)

    x_out = jnp.transpose(xfc.reshape(S, B, H), (1, 0, 2))   # (B, S, H)
    return x_out, hn_out


# ---------------------------- pure-JAX reference ----------------------------

def _ref_gru_dir(x_sbd, w_ih, w_hh, b_ih, b_hh):
    Hh = w_hh.shape[1]

    def cell(h, x_t):
        gi = x_t @ w_ih.T + b_ih
        gh = h @ w_hh.T + b_hh
        r = jax.nn.sigmoid(gi[:, :Hh] + gh[:, :Hh])
        z = jax.nn.sigmoid(gi[:, Hh:2 * Hh] + gh[:, Hh:2 * Hh])
        n = jnp.tanh(gi[:, 2 * Hh:] + r * gh[:, 2 * Hh:])
        h_new = (1.0 - z) * n + z * h
        return h_new, h_new

    h0 = jnp.zeros((x_sbd.shape[1], Hh), jnp.float32)
    hT, ys = lax.scan(cell, h0, x_sbd)
    return ys, hT


def reference_forward(tokens, raw):
    E = raw["embedding"].shape[1]
    x = jnp.take(raw["embedding"], tokens, axis=0) * math.sqrt(E)
    x = jnp.transpose(x, (1, 0, 2))                           # (S, B, E)
    hn_list = []
    for fwd, bwd in raw["gru"]:
        yf, hf = _ref_gru_dir(x, *fwd)
        yb_r, hb = _ref_gru_dir(x[::-1], *bwd)
        x = jnp.concatenate([yf, yb_r[::-1]], axis=-1)
        hn_list += [hf, hb]
    y = jnp.transpose(x, (1, 0, 2))                           # (B, S, 2H)
    x_out = y @ raw["fc_w"].T + raw["fc_b"]
    hn = jnp.stack(hn_list, axis=0)                           # (2L, B, H)
    hn2 = jnp.transpose(hn, (1, 2, 0)) @ raw["fc2_w"].T + raw["fc2_b"]
    hn2 = jnp.transpose(hn2, (2, 0, 1))                       # (L, B, H)
    mean = jnp.mean(hn2, axis=-1, keepdims=True)
    var = jnp.mean((hn2 - mean) ** 2, axis=-1, keepdims=True)
    ln = (hn2 - mean) * lax.rsqrt(var + 1e-5) * raw["ln_gamma"] + raw["ln_beta"]
    return x_out, jnp.maximum(ln, 0.0)


# ---------------------------------- main -------------------------------------

if __name__ == "__main__":
    VOCAB, E, H, L = 50, 32, 32, 2
    B, S = 2, 8

    root = jax.random.PRNGKey(0)
    keys = jax.random.split(root, 8)

    gru_raw = []
    gkeys = jax.random.split(keys[0], L * 2)
    for l in range(L):
        din = E if l == 0 else 2 * H
        gru_raw.append((make_gru_raw(gkeys[2 * l], din, H),
                        make_gru_raw(gkeys[2 * l + 1], din, H)))

    raw = {
        "embedding": jax.random.normal(keys[1], (VOCAB, E), jnp.float32),
        "gru": gru_raw,
        "ln_gamma": jnp.ones((H,), jnp.float32),
        "ln_beta": jnp.zeros((H,), jnp.float32),
        "fc_w": jax.random.normal(keys[2], (H, 2 * H), jnp.float32) * 0.1,
        "fc_b": jax.random.normal(keys[3], (H,), jnp.float32) * 0.1,
        "fc2_w": jax.random.normal(keys[4], (L, 2 * L), jnp.float32) * 0.1,
        "fc2_b": jax.random.normal(keys[5], (L,), jnp.float32) * 0.1,
    }
    kp = prep_params(raw)

    tokens = jax.random.randint(keys[6], (B, S), 0, VOCAB, dtype=jnp.int32)

    fwd = jax.jit(rnn_encoder_forward)
    x_out, hn_out = fwd(tokens, kp)
    jax.block_until_ready((x_out, hn_out))

    assert x_out.shape == (B, S, H) and x_out.dtype == jnp.float32
    assert hn_out.shape == (L, B, H) and hn_out.dtype == jnp.float32

    # Numerical check against a pure-JAX/XLA reference of the PyTorch module.
    x_ref, hn_ref = reference_forward(tokens, raw)
    assert jnp.allclose(x_out, x_ref, atol=1e-3, rtol=1e-3)
    assert jnp.allclose(hn_out, hn_ref, atol=1e-3, rtol=1e-3)

    print("KERNEL_OK")
</pallas_src>

<mosaic_0001>
module attributes {stable_mosaic.version = 11 : i64} {
  func.func @_fused_rnn_encoder_kernel(%arg0: memref<16x32xf32, #tpu.memory_space<vmem>>, %arg1: memref<32x96xf32, #tpu.memory_space<vmem>>, %arg2: memref<32x96xf32, #tpu.memory_space<vmem>>, %arg3: memref<1x96xf32, #tpu.memory_space<vmem>>, %arg4: memref<1x96xf32, #tpu.memory_space<vmem>>, %arg5: memref<32x96xf32, #tpu.memory_space<vmem>>, %arg6: memref<32x96xf32, #tpu.memory_space<vmem>>, %arg7: memref<1x32xf32, #tpu.memory_space<vmem>>, %arg8: memref<1x32xf32, #tpu.memory_space<vmem>>, %arg9: memref<64x96xf32, #tpu.memory_space<vmem>>, %arg10: memref<64x96xf32, #tpu.memory_space<vmem>>, %arg11: memref<1x96xf32, #tpu.memory_space<vmem>>, %arg12: memref<1x96xf32, #tpu.memory_space<vmem>>, %arg13: memref<32x96xf32, #tpu.memory_space<vmem>>, %arg14: memref<32x96xf32, #tpu.memory_space<vmem>>, %arg15: memref<1x32xf32, #tpu.memory_space<vmem>>, %arg16: memref<1x32xf32, #tpu.memory_space<vmem>>, %arg17: memref<32x32xf32, #tpu.memory_space<vmem>>, %arg18: memref<32x32xf32, #tpu.memory_space<vmem>>, %arg19: memref<1x32xf32, #tpu.memory_space<vmem>>, %arg20: memref<1x32xf32, #tpu.memory_space<vmem>>, %arg21: memref<1x32xf32, #tpu.memory_space<vmem>>, %arg22: memref<2x4xf32, #tpu.memory_space<smem>>, %arg23: memref<2xf32, #tpu.memory_space<smem>>, %arg24: memref<16x32xf32, #tpu.memory_space<vmem>>, %arg25: memref<2x2x32xf32, #tpu.memory_space<vmem>>, %arg26: memref<16x96xf32, #tpu.memory_space<vmem>>, %arg27: memref<16x96xf32, #tpu.memory_space<vmem>>, %arg28: memref<16x32xf32, #tpu.memory_space<vmem>>, %arg29: memref<16x32xf32, #tpu.memory_space<vmem>>) attributes {dimension_semantics = [], scalar_prefetch = 0 : i64, scratch_operands = 4 : i64, tpu.core_type = #tpu.core_type<tc>} {
    %c0 = arith.constant 0 : index
    %c0_0 = arith.constant 0 : index
    %0 = vector.load %arg3[%c0, %c0_0] : memref<1x96xf32, #tpu.memory_space<vmem>>, vector<1x96xf32>
    %c0_1 = arith.constant 0 : index
    %c0_2 = arith.constant 0 : index
    %1 = vector.load %arg4[%c0_1, %c0_2] : memref<1x96xf32, #tpu.memory_space<vmem>>, vector<1x96xf32>
    %c0_3 = arith.constant 0 : index
    %c0_4 = arith.constant 0 : index
    %2 = vector.load %arg5[%c0_3, %c0_4] : memref<32x96xf32, #tpu.memory_space<vmem>>, vector<32x96xf32>
    %c0_5 = arith.constant 0 : index
    %c0_6 = arith.constant 0 : index
    %3 = vector.load %arg6[%c0_5, %c0_6] : memref<32x96xf32, #tpu.memory_space<vmem>>, vector<32x96xf32>
    %c0_7 = arith.constant 0 : index
    %c0_8 = arith.constant 0 : index
    %4 = vector.load %arg7[%c0_7, %c0_8] : memref<1x32xf32, #tpu.memory_space<vmem>>, vector<1x32xf32>
    %c0_9 = arith.constant 0 : index
    %c0_10 = arith.constant 0 : index
    %5 = vector.load %arg8[%c0_9, %c0_10] : memref<1x32xf32, #tpu.memory_space<vmem>>, vector<1x32xf32>
    %c0_11 = arith.constant 0 : index
    %c0_12 = arith.constant 0 : index
    %6 = vector.load %arg0[%c0_11, %c0_12] : memref<16x32xf32, #tpu.memory_space<vmem>>, vector<16x32xf32>
    %c0_13 = arith.constant 0 : index
    %c0_14 = arith.constant 0 : index
    %7 = vector.load %arg1[%c0_13, %c0_14] : memref<32x96xf32, #tpu.memory_space<vmem>>, vector<32x96xf32>
    %cst = arith.constant dense<0.000000e+00> : vector<16x96xf32>
    %8 = tpu.matmul %6, %7, %cst {dimension_numbers = #tpu.dot_dimension_numbers<[1], [0], [0], [1], [0, 0, 1, 1], [], []>} : vector<16x32xf32>, vector<32x96xf32>, vector<16x96xf32> -> vector<16x96xf32>
    %9 = vector.broadcast %0 : vector<1x96xf32> to vector<16x96xf32>
    %10 = arith.addf %8, %9 : vector<16x96xf32>
    %c0_15 = arith.constant 0 : index
    %c0_16 = arith.constant 0 : index
    %11 = vector.load %arg26[%c0_15, %c0_16] : memref<16x96xf32, #tpu.memory_space<vmem>>, vector<16x96xf32>
    tpu.vector_store %arg26[%c0_15, %c0_16], %10 {strides = array<i32>} : memref<16x96xf32, #tpu.memory_space<vmem>>, vector<16x96xf32>,
    %c0_17 = arith.constant 0 : index
    %c0_18 = arith.constant 0 : index
    %12 = vector.load %arg2[%c0_17, %c0_18] : memref<32x96xf32, #tpu.memory_space<vmem>>, vector<32x96xf32>
    %cst_19 = arith.constant dense<0.000000e+00> : vector<16x96xf32>
    %13 = tpu.matmul %6, %12, %cst_19 {dimension_numbers = #tpu.dot_dimension_numbers<[1], [0], [0], [1], [0, 0, 1, 1], [], []>} : vector<16x32xf32>, vector<32x96xf32>, vector<16x96xf32> -> vector<16x96xf32>
    %14 = vector.broadcast %1 : vector<1x96xf32> to vector<16x96xf32>
    %15 = arith.addf %13, %14 : vector<16x96xf32>
    %c0_20 = arith.constant 0 : index
    %c0_21 = arith.constant 0 : index
    %16 = vector.load %arg27[%c0_20, %c0_21] : memref<16x96xf32, #tpu.memory_space<vmem>>, vector<16x96xf32>
    tpu.vector_store %arg27[%c0_20, %c0_21], %15 {strides = array<i32>} : memref<16x96xf32, #tpu.memory_space<vmem>>, vector<16x96xf32>,
    %cst_22 = arith.constant 0.000000e+00 : f32
    %17 = vector.broadcast %cst_22 : f32 to vector<2x32xf32>
    %cst_23 = arith.constant 0.000000e+00 : f32
    %18 = vector.broadcast %cst_23 : f32 to vector<2x32xf32>
    %c0_24 = arith.constant 0 : index
    %c0_25 = arith.constant 0 : index
    %19 = vector.load %arg26[%c0_24, %c0_25] : memref<16x96xf32, #tpu.memory_space<vmem>>, vector<2x96xf32>
    %c14 = arith.constant 14 : index
    %c0_26 = arith.constant 0 : index
    %20 = vector.load %arg27[%c14, %c0_26] : memref<16x96xf32, #tpu.memory_space<vmem>>, vector<2x96xf32>
    %cst_27 = arith.constant dense<0.000000e+00> : vector<2x96xf32>
    %21 = tpu.matmul %17, %2, %cst_27 {dimension_numbers = #tpu.dot_dimension_numbers<[1], [0], [0], [1], [0, 0, 1, 1], [], []>} : vector<2x32xf32>, vector<32x96xf32>, vector<2x96xf32> -> vector<2x96xf32>
    %cst_28 = arith.constant dense<0.000000e+00> : vector<2x96xf32>
    %22 = tpu.matmul %18, %3, %cst_28 {dimension_numbers = #tpu.dot_dimension_numbers<[1], [0], [0], [1], [0, 0, 1, 1], [], []>} : vector<2x32xf32>, vector<32x96xf32>, vector<2x96xf32> -> vector<2x96xf32>
    %23 = vector.extract_strided_slice %19 {offsets = [0, 0], sizes = [2, 32], strides = [1, 1]} : vector<2x96xf32> to vector<2x32xf32>
    %24 = vector.extract_strided_slice %21 {offsets = [0, 0], sizes = [2, 32], strides = [1, 1]} : vector<2x96xf32> to vector<2x32xf32>
    %25 = arith.addf %23, %24 : vector<2x32xf32>
    %26 = arith.negf %25 : vector<2x32xf32>
    %27 = math.exp %26 : vector<2x32xf32>
    %cst_29 = arith.constant 1.000000e+00 : f32
    %28 = vector.broadcast %cst_29 : f32 to vector<2x32xf32>
    %29 = arith.addf %28, %27 : vector<2x32xf32>
    %30 = arith.divf %28, %29 : vector<2x32xf32>
    %31 = vector.extract_strided_slice %19 {offsets = [0, 32], sizes = [2, 32], strides = [1, 1]} : vector<2x96xf32> to vector<2x32xf32>
    %32 = vector.extract_strided_slice %21 {offsets = [0, 32], sizes = [2, 32], strides = [1, 1]} : vector<2x96xf32> to vector<2x32xf32>
    %33 = arith.addf %31, %32 : vector<2x32xf32>
    %34 = arith.negf %33 : vector<2x32xf32>
    %35 = math.exp %34 : vector<2x32xf32>
    %cst_30 = arith.constant 1.000000e+00 : f32
    %36 = vector.broadcast %cst_30 : f32 to vector<2x32xf32>
    %37 = arith.addf %36, %35 : vector<2x32xf32>
    %38 = arith.divf %36, %37 : vector<2x32xf32>
    %39 = vector.extract_strided_slice %19 {offsets = [0, 64], sizes = [2, 32], strides = [1, 1]} : vector<2x96xf32> to vector<2x32xf32>
    %40 = vector.extract_strided_slice %21 {offsets = [0, 64], sizes = [2, 32], strides = [1, 1]} : vector<2x96xf32> to vector<2x32xf32>
    %41 = vector.broadcast %4 : vector<1x32xf32> to vector<2x32xf32>
    %42 = arith.addf %40, %41 : vector<2x32xf32>
    %43 = arith.mulf %30, %42 : vector<2x32xf32>
    %44 = arith.addf %39, %43 : vector<2x32xf32>
    %45 = math.tanh %44 : vector<2x32xf32>
    %46 = arith.subf %17, %45 : vector<2x32xf32>
    %47 = arith.mulf %38, %46 : vector<2x32xf32>
    %48 = arith.addf %45, %47 : vector<2x32xf32>
    %49 = vector.extract_strided_slice %20 {offsets = [0, 0], sizes = [2, 32], strides = [1, 1]} : vector<2x96xf32> to vector<2x32xf32>
    %50 = vector.extract_strided_slice %22 {offsets = [0, 0], sizes = [2, 32], strides = [1, 1]} : vector<2x96xf32> to vector<2x32xf32>
    %51 = arith.addf %49, %50 : vector<2x32xf32>
    %52 = arith.negf %51 : vector<2x32xf32>
    %53 = math.exp %52 : vector<2x32xf32>
    %cst_31 = arith.constant 1.000000e+00 : f32
    %54 = vector.broadcast %cst_31 : f32 to vector<2x32xf32>
    %55 = arith.addf %54, %53 : vector<2x32xf32>
    %56 = arith.divf %54, %55 : vector<2x32xf32>
    %57 = vector.extract_strided_slice %20 {offsets = [0, 32], sizes = [2, 32], strides = [1, 1]} : vector<2x96xf32> to vector<2x32xf32>
    %58 = vector.extract_strided_slice %22 {offsets = [0, 32], sizes = [2, 32], strides = [1, 1]} : vector<2x96xf32> to vector<2x32xf32>
    %59 = arith.addf %57, %58 : vector<2x32xf32>
    %60 = arith.negf %59 : vector<2x32xf32>
    %61 = math.exp %60 : vector<2x32xf32>
    %cst_32 = arith.constant 1.000000e+00 : f32
    %62 = vector.broadcast %cst_32 : f32 to vector<2x32xf32>
    %63 = arith.addf %62, %61 : vector<2x32xf32>
    %64 = arith.divf %62, %63 : vector<2x32xf32>
    %65 = vector.extract_strided_slice %20 {offsets = [0, 64], sizes = [2, 32], strides = [1, 1]} : vector<2x96xf32> to vector<2x32xf32>
    %66 = vector.extract_strided_slice %22 {offsets = [0, 64], sizes = [2, 32], strides = [1, 1]} : vector<2x96xf32> to vector<2x32xf32>
    %67 = vector.broadcast %5 : vector<1x32xf32> to vector<2x32xf32>
    %68 = arith.addf %66, %67 : vector<2x32xf32>
    %69 = arith.mulf %56, %68 : vector<2x32xf32>
    %70 = arith.addf %65, %69 : vector<2x32xf32>
    %71 = math.tanh %70 : vector<2x32xf32>
    %72 = arith.subf %18, %71 : vector<2x32xf32>
    %73 = arith.mulf %64, %72 : vector<2x32xf32>
    %74 = arith.addf %71, %73 : vector<2x32xf32>
    %c0_33 = arith.constant 0 : index
    %c0_34 = arith.constant 0 : index
    %75 = vector.load %arg28[%c0_33, %c0_34] : memref<16x32xf32, #tpu.memory_space<vmem>>, vector<2x32xf32>
    tpu.vector_store %arg28[%c0_33, %c0_34], %48 {strides = array<i32>} : memref<16x32xf32, #tpu.memory_space<vmem>>, vector<2x32xf32>,
    %c14_35 = arith.constant 14 : index
    %c0_36 = arith.constant 0 : index
    %76 = vector.load %arg29[%c14_35, %c0_36] : memref<16x32xf32, #tpu.memory_space<vmem>>, vector<2x32xf32>
    tpu.vector_store %arg29[%c14_35, %c0_36], %74 {strides = array<i32>} : memref<16x32xf32, #tpu.memory_space<vmem>>, vector<2x32xf32>,
    %c2 = arith.constant 2 : index
    %c0_37 = arith.constant 0 : index
    %77 = vector.load %arg26[%c2, %c0_37] : memref<16x96xf32, #tpu.memory_space<vmem>>, vector<2x96xf32>
    %c12 = arith.constant 12 : index
    %c0_38 = arith.constant 0 : index
    %78 = vector.load %arg27[%c12, %c0_38] : memref<16x96xf32, #tpu.memory_space<vmem>>, vector<2x96xf32>
    %cst_39 = arith.constant dense<0.000000e+00> : vector<2x96xf32>
    %79 = tpu.matmul %48, %2, %cst_39 {dimension_numbers = #tpu.dot_dimension_numbers<[1], [0], [0], [1], [0, 0, 1, 1], [], []>} : vector<2x32xf32>, vector<32x96xf32>, vector<2x96xf32> -> vector<2x96xf32>
    %cst_40 = arith.constant dense<0.000000e+00> : vector<2x96xf32>
    %80 = tpu.matmul %74, %3, %cst_40 {dimension_numbers = #tpu.dot_dimension_numbers<[1], [0], [0], [1], [0, 0, 1, 1], [], []>} : vector<2x32xf32>, vector<32x96xf32>, vector<2x96xf32> -> vector<2x96xf32>
    %81 = vector.extract_strided_slice %77 {offsets = [0, 0], sizes = [2, 32], strides = [1, 1]} : vector<2x96xf32> to vector<2x32xf32>
    %82 = vector.extract_strided_slice %79 {offsets = [0, 0], sizes = [2, 32], strides = [1, 1]} : vector<2x96xf32> to vector<2x32xf32>
    %83 = arith.addf %81, %82 : vector<2x32xf32>
    %84 = arith.negf %83 : vector<2x32xf32>
    %85 = math.exp %84 : vector<2x32xf32>
    %cst_41 = arith.constant 1.000000e+00 : f32
    %86 = vector.broadcast %cst_41 : f32 to vector<2x32xf32>
    %87 = arith.addf %86, %85 : vector<2x32xf32>
    %88 = arith.divf %86, %87 : vector<2x32xf32>
    %89 = vector.extract_strided_slice %77 {offsets = [0, 32], sizes = [2, 32], strides = [1, 1]} : vector<2x96xf32> to vector<2x32xf32>
    %90 = vector.extract_strided_slice %79 {offsets = [0, 32], sizes = [2, 32], strides = [1, 1]} : vector<2x96xf32> to vector<2x32xf32>
    %91 = arith.addf %89, %90 : vector<2x32xf32>
    %92 = arith.negf %91 : vector<2x32xf32>
    %93 = math.exp %92 : vector<2x32xf32>
    %cst_42 = arith.constant 1.000000e+00 : f32
    %94 = vector.broadcast %cst_42 : f32 to vector<2x32xf32>
    %95 = arith.addf %94, %93 : vector<2x32xf32>
    %96 = arith.divf %94, %95 : vector<2x32xf32>
    %97 = vector.extract_strided_slice %77 {offsets = [0, 64], sizes = [2, 32], strides = [1, 1]} : vector<2x96xf32> to vector<2x32xf32>
    %98 = vector.extract_strided_slice %79 {offsets = [0, 64], sizes = [2, 32], strides = [1, 1]} : vector<2x96xf32> to vector<2x32xf32>
    %99 = vector.broadcast %4 : vector<1x32xf32> to vector<2x32xf32>
    %100 = arith.addf %98, %99 : vector<2x32xf32>
    %101 = arith.mulf %88, %100 : vector<2x32xf32>
    %102 = arith.addf %97, %101 : vector<2x32xf32>
    %103 = math.tanh %102 : vector<2x32xf32>
    %104 = arith.subf %48, %103 : vector<2x32xf32>
    %105 = arith.mulf %96, %104 : vector<2x32xf32>
    %106 = arith.addf %103, %105 : vector<2x32xf32>
    %107 = vector.extract_strided_slice %78 {offsets = [0, 0], sizes = [2, 32], strides = [1, 1]} : vector<2x96xf32> to vector<2x32xf32>
    %108 = vector.extract_strided_slice %80 {offsets = [0, 0], sizes = [2, 32], strides = [1, 1]} : vector<2x96xf32> to vector<2x32xf32>
    %109 = arith.addf %107, %108 : vector<2x32xf32>
    %110 = arith.negf %109 : vector<2x32xf32>
    %111 = math.exp %110 : vector<2x32xf32>
    %cst_43 = arith.constant 1.000000e+00 : f32
    %112 = vector.broadcast %cst_43 : f32 to vector<2x32xf32>
    %113 = arith.addf %112, %111 : vector<2x32xf32>
    %114 = arith.divf %112, %113 : vector<2x32xf32>
    %115 = vector.extract_strided_slice %78 {offsets = [0, 32], sizes = [2, 32], strides = [1, 1]} : vector<2x96xf32> to vector<2x32xf32>
    %116 = vector.extract_strided_slice %80 {offsets = [0, 32], sizes = [2, 32], strides = [1, 1]} : vector<2x96xf32> to vector<2x32xf32>
    %117 = arith.addf %115, %116 : vector<2x32xf32>
    %118 = arith.negf %117 : vector<2x32xf32>
    %119 = math.exp %118 : vector<2x32xf32>
    %cst_44 = arith.constant 1.000000e+00 : f32
    %120 = vector.broadcast %cst_44 : f32 to vector<2x32xf32>
    %121 = arith.addf %120, %119 : vector<2x32xf32>
    %122 = arith.divf %120, %121 : vector<2x32xf32>
    %123 = vector.extract_strided_slice %78 {offsets = [0, 64], sizes = [2, 32], strides = [1, 1]} : vector<2x96xf32> to vector<2x32xf32>
    %124 = vector.extract_strided_slice %80 {offsets = [0, 64], sizes = [2, 32], strides = [1, 1]} : vector<2x96xf32> to vector<2x32xf32>
    %125 = vector.broadcast %5 : vector<1x32xf32> to vector<2x32xf32>
    %126 = arith.addf %124, %125 : vector<2x32xf32>
    %127 = arith.mulf %114, %126 : vector<2x32xf32>
    %128 = arith.addf %123, %127 : vector<2x32xf32>
    %129 = math.tanh %128 : vector<2x32xf32>
    %130 = arith.subf %74, %129 : vector<2x32xf32>
    %131 = arith.mulf %122, %130 : vector<2x32xf32>
    %132 = arith.addf %129, %131 : vector<2x32xf32>
    %c2_45 = arith.constant 2 : index
    %c0_46 = arith.constant 0 : index
    %133 = vector.load %arg28[%c2_45, %c0_46] : memref<16x32xf32, #tpu.memory_space<vmem>>, vector<2x32xf32>
    tpu.vector_store %arg28[%c2_45, %c0_46], %106 {strides = array<i32>} : memref<16x32xf32, #tpu.memory_space<vmem>>, vector<2x32xf32>,
    %c12_47 = arith.constant 12 : index
    %c0_48 = arith.constant 0 : index
    %134 = vector.load %arg29[%c12_47, %c0_48] : memref<16x32xf32, #tpu.memory_space<vmem>>, vector<2x32xf32>
    tpu.vector_store %arg29[%c12_47, %c0_48], %132 {strides = array<i32>} : memref<16x32xf32, #tpu.memory_space<vmem>>, vector<2x32xf32>,
    %c4 = arith.constant 4 : index
    %c0_49 = arith.constant 0 : index
    %135 = vector.load %arg26[%c4, %c0_49] : memref<16x96xf32, #tpu.memory_space<vmem>>, vector<2x96xf32>
    %c10 = arith.constant 10 : index
    %c0_50 = arith.constant 0 : index
    %136 = vector.load %arg27[%c10, %c0_50] : memref<16x96xf32, #tpu.memory_space<vmem>>, vector<2x96xf32>
    %cst_51 = arith.constant dense<0.000000e+00> : vector<2x96xf32>
    %137 = tpu.matmul %106, %2, %cst_51 {dimension_numbers = #tpu.dot_dimension_numbers<[1], [0], [0], [1], [0, 0, 1, 1], [], []>} : vector<2x32xf32>, vector<32x96xf32>, vector<2x96xf32> -> vector<2x96xf32>
    %cst_52 = arith.constant dense<0.000000e+00> : vector<2x96xf32>
    %138 = tpu.matmul %132, %3, %cst_52 {dimension_numbers = #tpu.dot_dimension_numbers<[1], [0], [0], [1], [0, 0, 1, 1], [], []>} : vector<2x32xf32>, vector<32x96xf32>, vector<2x96xf32> -> vector<2x96xf32>
    %139 = vector.extract_strided_slice %135 {offsets = [0, 0], sizes = [2, 32], strides = [1, 1]} : vector<2x96xf32> to vector<2x32xf32>
    %140 = vector.extract_strided_slice %137 {offsets = [0, 0], sizes = [2, 32], strides = [1, 1]} : vector<2x96xf32> to vector<2x32xf32>
    %141 = arith.addf %139, %140 : vector<2x32xf32>
    %142 = arith.negf %141 : vector<2x32xf32>
    %143 = math.exp %142 : vector<2x32xf32>
    %cst_53 = arith.constant 1.000000e+00 : f32
    %144 = vector.broadcast %cst_53 : f32 to vector<2x32xf32>
    %145 = arith.addf %144, %143 : vector<2x32xf32>
    %146 = arith.divf %144, %145 : vector<2x32xf32>
    %147 = vector.extract_strided_slice %135 {offsets = [0, 32], sizes = [2, 32], strides = [1, 1]} : vector<2x96xf32> to vector<2x32xf32>
    %148 = vector.extract_strided_slice %137 {offsets = [0, 32], sizes = [2, 32], strides = [1, 1]} : vector<2x96xf32> to vector<2x32xf32>
    %149 = arith.addf %147, %148 : vector<2x32xf32>
    %150 = arith.negf %149 : vector<2x32xf32>
    %151 = math.exp %150 : vector<2x32xf32>
    %cst_54 = arith.constant 1.000000e+00 : f32
    %152 = vector.broadcast %cst_54 : f32 to vector<2x32xf32>
    %153 = arith.addf %152, %151 : vector<2x32xf32>
    %154 = arith.divf %152, %153 : vector<2x32xf32>
    %155 = vector.extract_strided_slice %135 {offsets = [0, 64], sizes = [2, 32], strides = [1, 1]} : vector<2x96xf32> to vector<2x32xf32>
    %156 = vector.extract_strided_slice %137 {offsets = [0, 64], sizes = [2, 32], strides = [1, 1]} : vector<2x96xf32> to vector<2x32xf32>
    %157 = vector.broadcast %4 : vector<1x32xf32> to vector<2x32xf32>
    %158 = arith.addf %156, %157 : vector<2x32xf32>
    %159 = arith.mulf %146, %158 : vector<2x32xf32>
    %160 = arith.addf %155, %159 : vector<2x32xf32>
    %161 = math.tanh %160 : vector<2x32xf32>
    %162 = arith.subf %106, %161 : vector<2x32xf32>
    %163 = arith.mulf %154, %162 : vector<2x32xf32>
    %164 = arith.addf %161, %163 : vector<2x32xf32>
    %165 = vector.extract_strided_slice %136 {offsets = [0, 0], sizes = [2, 32], strides = [1, 1]} : vector<2x96xf32> to vector<2x32xf32>
    %166 = vector.extract_strided_slice %138 {offsets = [0, 0], sizes = [2, 32], strides = [1, 1]} : vector<2x96xf32> to vector<2x32xf32>
    %167 = arith.addf %165, %166 : vector<2x32xf32>
    %168 = arith.negf %167 : vector<2x32xf32>
    %169 = math.exp %168 : vector<2x32xf32>
    %cst_55 = arith.constant 1.000000e+00 : f32
    %170 = vector.broadcast %cst_55 : f32 to vector<2x32xf32>
    %171 = arith.addf %170, %169 : vector<2x32xf32>
    %172 = arith.divf %170, %171 : vector<2x32xf32>
    %173 = vector.extract_strided_slice %136 {offsets = [0, 32], sizes = [2, 32], strides = [1, 1]} : vector<2x96xf32> to vector<2x32xf32>
    %174 = vector.extract_strided_slice %138 {offsets = [0, 32], sizes = [2, 32], strides = [1, 1]} : vector<2x96xf32> to vector<2x32xf32>
    %175 = arith.addf %173, %174 : vector<2x32xf32>
    %176 = arith.negf %175 : vector<2x32xf32>
    %177 = math.exp %176 : vector<2x32xf32>
    %cst_56 = arith.constant 1.000000e+00 : f32
    %178 = vector.broadcast %cst_56 : f32 to vector<2x32xf32>
    %179 = arith.addf %178, %177 : vector<2x32xf32>
    %180 = arith.divf %178, %179 : vector<2x32xf32>
    %181 = vector.extract_strided_slice %136 {offsets = [0, 64], sizes = [2, 32], strides = [1, 1]} : vector<2x96xf32> to vector<2x32xf32>
    %182 = vector.extract_strided_slice %138 {offsets = [0, 64], sizes = [2, 32], strides = [1, 1]} : vector<2x96xf32> to vector<2x32xf32>
    %183 = vector.broadcast %5 : vector<1x32xf32> to vector<2x32xf32>
    %184 = arith.addf %182, %183 : vector<2x32xf32>
    %185 = arith.mulf %172, %184 : vector<2x32xf32>
    %186 = arith.addf %181, %185 : vector<2x32xf32>
    %187 = math.tanh %186 : vector<2x32xf32>
    %188 = arith.subf %132, %187 : vector<2x32xf32>
    %189 = arith.mulf %180, %188 : vector<2x32xf32>
    %190 = arith.addf %187, %189 : vector<2x32xf32>
    %c4_57 = arith.constant 4 : index
    %c0_58 = arith.constant 0 : index
    %191 = vector.load %arg28[%c4_57, %c0_58] : memref<16x32xf32, #tpu.memory_space<vmem>>, vector<2x32xf32>
    tpu.vector_store %arg28[%c4_57, %c0_58], %164 {strides = array<i32>} : memref<16x32xf32, #tpu.memory_space<vmem>>, vector<2x32xf32>,
    %c10_59 = arith.constant 10 : index
    %c0_60 = arith.constant 0 : index
    %192 = vector.load %arg29[%c10_59, %c0_60] : memref<16x32xf32, #tpu.memory_space<vmem>>, vector<2x32xf32>
    tpu.vector_store %arg29[%c10_59, %c0_60], %190 {strides = array<i32>} : memref<16x32xf32, #tpu.memory_space<vmem>>, vector<2x32xf32>,
    %c6 = arith.constant 6 : index
    %c0_61 = arith.constant 0 : index
    %193 = vector.load %arg26[%c6, %c0_61] : memref<16x96xf32, #tpu.memory_space<vmem>>, vector<2x96xf32>
    %c8 = arith.constant 8 : index
    %c0_62 = arith.constant 0 : index
    %194 = vector.load %arg27[%c8, %c0_62] : memref<16x96xf32, #tpu.memory_space<vmem>>, vector<2x96xf32>
    %cst_63 = arith.constant dense<0.000000e+00> : vector<2x96xf32>
    %195 = tpu.matmul %164, %2, %cst_63 {dimension_numbers = #tpu.dot_dimension_numbers<[1], [0], [0], [1], [0, 0, 1, 1], [], []>} : vector<2x32xf32>, vector<32x96xf32>, vector<2x96xf32> -> vector<2x96xf32>
    %cst_64 = arith.constant dense<0.000000e+00> : vector<2x96xf32>
    %196 = tpu.matmul %190, %3, %cst_64 {dimension_numbers = #tpu.dot_dimension_numbers<[1], [0], [0], [1], [0, 0, 1, 1], [], []>} : vector<2x32xf32>, vector<32x96xf32>, vector<2x96xf32> -> vector<2x96xf32>
    %197 = vector.extract_strided_slice %193 {offsets = [0, 0], sizes = [2, 32], strides = [1, 1]} : vector<2x96xf32> to vector<2x32xf32>
    %198 = vector.extract_strided_slice %195 {offsets = [0, 0], sizes = [2, 32], strides = [1, 1]} : vector<2x96xf32> to vector<2x32xf32>
    %199 = arith.addf %197, %198 : vector<2x32xf32>
    %200 = arith.negf %199 : vector<2x32xf32>
    %201 = math.exp %200 : vector<2x32xf32>
    %cst_65 = arith.constant 1.000000e+00 : f32
    %202 = vector.broadcast %cst_65 : f32 to vector<2x32xf32>
    %203 = arith.addf %202, %201 : vector<2x32xf32>
    %204 = arith.divf %202, %203 : vector<2x32xf32>
    %205 = vector.extract_strided_slice %193 {offsets = [0, 32], sizes = [2, 32], strides = [1, 1]} : vector<2x96xf32> to vector<2x32xf32>
    %206 = vector.extract_strided_slice %195 {offsets = [0, 32], sizes = [2, 32], strides = [1, 1]} : vector<2x96xf32> to vector<2x32xf32>
    %207 = arith.addf %205, %206 : vector<2x32xf32>
    %208 = arith.negf %207 : vector<2x32xf32>
    %209 = math.exp %208 : vector<2x32xf32>
    %cst_66 = arith.constant 1.000000e+00 : f32
    %210 = vector.broadcast %cst_66 : f32 to vector<2x32xf32>
    %211 = arith.addf %210, %209 : vector<2x32xf32>
    %212 = arith.divf %210, %211 : vector<2x32xf32>
    %213 = vector.extract_strided_slice %193 {offsets = [0, 64], sizes = [2, 32], strides = [1, 1]} : vector<2x96xf32> to vector<2x32xf32>
    %214 = vector.extract_strided_slice %195 {offsets = [0, 64], sizes = [2, 32], strides = [1, 1]} : vector<2x96xf32> to vector<2x32xf32>
    %215 = vector.broadcast %4 : vector<1x32xf32> to vector<2x32xf32>
    %216 = arith.addf %214, %215 : vector<2x32xf32>
    %217 = arith.mulf %204, %216 : vector<2x32xf32>
    %218 = arith.addf %213, %217 : vector<2x32xf32>
    %219 = math.tanh %218 : vector<2x32xf32>
    %220 = arith.subf %164, %219 : vector<2x32xf32>
    %221 = arith.mulf %212, %220 : vector<2x32xf32>
    %222 = arith.addf %219, %221 : vector<2x32xf32>
    %223 = vector.extract_strided_slice %194 {offsets = [0, 0], sizes = [2, 32], strides = [1, 1]} : vector<2x96xf32> to vector<2x32xf32>
    %224 = vector.extract_strided_slice %196 {offsets = [0, 0], sizes = [2, 32], strides = [1, 1]} : vector<2x96xf32> to vector<2x32xf32>
    %225 = arith.addf %223, %224 : vector<2x32xf32>
    %226 = arith.negf %225 : vector<2x32xf32>
    %227 = math.exp %226 : vector<2x32xf32>
    %cst_67 = arith.constant 1.000000e+00 : f32
    %228 = vector.broadcast %cst_67 : f32 to vector<2x32xf32>
    %229 = arith.addf %228, %227 : vector<2x32xf32>
    %230 = arith.divf %228, %229 : vector<2x32xf32>
    %231 = vector.extract_strided_slice %194 {offsets = [0, 32], sizes = [2, 32], strides = [1, 1]} : vector<2x96xf32> to vector<2x32xf32>
    %232 = vector.extract_strided_slice %196 {offsets = [0, 32], sizes = [2, 32], strides = [1, 1]} : vector<2x96xf32> to vector<2x32xf32>
    %233 = arith.addf %231, %232 : vector<2x32xf32>
    %234 = arith.negf %233 : vector<2x32xf32>
    %235 = math.exp %234 : vector<2x32xf32>
    %cst_68 = arith.constant 1.000000e+00 : f32
    %236 = vector.broadcast %cst_68 : f32 to vector<2x32xf32>
    %237 = arith.addf %236, %235 : vector<2x32xf32>
    %238 = arith.divf %236, %237 : vector<2x32xf32>
    %239 = vector.extract_strided_slice %194 {offsets = [0, 64], sizes = [2, 32], strides = [1, 1]} : vector<2x96xf32> to vector<2x32xf32>
    %240 = vector.extract_strided_slice %196 {offsets = [0, 64], sizes = [2, 32], strides = [1, 1]} : vector<2x96xf32> to vector<2x32xf32>
    %241 = vector.broadcast %5 : vector<1x32xf32> to vector<2x32xf32>
    %242 = arith.addf %240, %241 : vector<2x32xf32>
    %243 = arith.mulf %230, %242 : vector<2x32xf32>
    %244 = arith.addf %239, %243 : vector<2x32xf32>
    %245 = math.tanh %244 : vector<2x32xf32>
    %246 = arith.subf %190, %245 : vector<2x32xf32>
    %247 = arith.mulf %238, %246 : vector<2x32xf32>
    %248 = arith.addf %245, %247 : vector<2x32xf32>
    %c6_69 = arith.constant 6 : index
    %c0_70 = arith.constant 0 : index
    %249 = vector.load %arg28[%c6_69, %c0_70] : memref<16x32xf32, #tpu.memory_space<vmem>>, vector<2x32xf32>
    tpu.vector_store %arg28[%c6_69, %c0_70], %222 {strides = array<i32>} : memref<16x32xf32, #tpu.memory_space<vmem>>, vector<2x32xf32>,
    %c8_71 = arith.constant 8 : index
    %c0_72 = arith.constant 0 : index
    %250 = vector.load %arg29[%c8_71, %c0_72] : memref<16x32xf32, #tpu.memory_space<vmem>>, vector<2x32xf32>
    tpu.vector_store %arg29[%c8_71, %c0_72], %248 {strides = array<i32>} : memref<16x32xf32, #tpu.memory_space<vmem>>, vector<2x32xf32>,
    %c8_73 = arith.constant 8 : index
    %c0_74 = arith.constant 0 : index
    %251 = vector.load %arg26[%c8_73, %c0_74] : memref<16x96xf32, #tpu.memory_space<vmem>>, vector<2x96xf32>
    %c6_75 = arith.constant 6 : index
    %c0_76 = arith.constant 0 : index
    %252 = vector.load %arg27[%c6_75, %c0_76] : memref<16x96xf32, #tpu.memory_space<vmem>>, vector<2x96xf32>
    %cst_77 = arith.constant dense<0.000000e+00> : vector<2x96xf32>
    %253 = tpu.matmul %222, %2, %cst_77 {dimension_numbers = #tpu.dot_dimension_numbers<[1], [0], [0], [1], [0, 0, 1, 1], [], []>} : vector<2x32xf32>, vector<32x96xf32>, vector<2x96xf32> -> vector<2x96xf32>
    %cst_78 = arith.constant dense<0.000000e+00> : vector<2x96xf32>
    %254 = tpu.matmul %248, %3, %cst_78 {dimension_numbers = #tpu.dot_dimension_numbers<[1], [0], [0], [1], [0, 0, 1, 1], [], []>} : vector<2x32xf32>, vector<32x96xf32>, vector<2x96xf32> -> vector<2x96xf32>
    %255 = vector.extract_strided_slice %251 {offsets = [0, 0], sizes = [2, 32], strides = [1, 1]} : vector<2x96xf32> to vector<2x32xf32>
    %256 = vector.extract_strided_slice %253 {offsets = [0, 0], sizes = [2, 32], strides = [1, 1]} : vector<2x96xf32> to vector<2x32xf32>
    %257 = arith.addf %255, %256 : vector<2x32xf32>
    %258 = arith.negf %257 : vector<2x32xf32>
    %259 = math.exp %258 : vector<2x32xf32>
    %cst_79 = arith.constant 1.000000e+00 : f32
    %260 = vector.broadcast %cst_79 : f32 to vector<2x32xf32>
    %261 = arith.addf %260, %259 : vector<2x32xf32>
    %262 = arith.divf %260, %261 : vector<2x32xf32>
    %263 = vector.extract_strided_slice %251 {offsets = [0, 32], sizes = [2, 32], strides = [1, 1]} : vector<2x96xf32> to vector<2x32xf32>
    %264 = vector.extract_strided_slice %253 {offsets = [0, 32], sizes = [2, 32], strides = [1, 1]} : vector<2x96xf32> to vector<2x32xf32>
    %265 = arith.addf %263, %264 : vector<2x32xf32>
    %266 = arith.negf %265 : vector<2x32xf32>
    %267 = math.exp %266 : vector<2x32xf32>
    %cst_80 = arith.constant 1.000000e+00 : f32
    %268 = vector.broadcast %cst_80 : f32 to vector<2x32xf32>
    %269 = arith.addf %268, %267 : vector<2x32xf32>
    %270 = arith.divf %268, %269 : vector<2x32xf32>
    %271 = vector.extract_strided_slice %251 {offsets = [0, 64], sizes = [2, 32], strides = [1, 1]} : vector<2x96xf32> to vector<2x32xf32>
    %272 = vector.extract_strided_slice %253 {offsets = [0, 64], sizes = [2, 32], strides = [1, 1]} : vector<2x96xf32> to vector<2x32xf32>
    %273 = vector.broadcast %4 : vector<1x32xf32> to vector<2x32xf32>
    %274 = arith.addf %272, %273 : vector<2x32xf32>
    %275 = arith.mulf %262, %274 : vector<2x32xf32>
    %276 = arith.addf %271, %275 : vector<2x32xf32>
    %277 = math.tanh %276 : vector<2x32xf32>
    %278 = arith.subf %222, %277 : vector<2x32xf32>
    %279 = arith.mulf %270, %278 : vector<2x32xf32>
    %280 = arith.addf %277, %279 : vector<2x32xf32>
    %281 = vector.extract_strided_slice %252 {offsets = [0, 0], sizes = [2, 32], strides = [1, 1]} : vector<2x96xf32> to vector<2x32xf32>
    %282 = vector.extract_strided_slice %254 {offsets = [0, 0], sizes = [2, 32], strides = [1, 1]} : vector<2x96xf32> to vector<2x32xf32>
    %283 = arith.addf %281, %282 : vector<2x32xf32>
    %284 = arith.negf %283 : vector<2x32xf32>
    %285 = math.exp %284 : vector<2x32xf32>
    %cst_81 = arith.constant 1.000000e+00 : f32
    %286 = vector.broadcast %cst_81 : f32 to vector<2x32xf32>
    %287 = arith.addf %286, %285 : vector<2x32xf32>
    %288 = arith.divf %286, %287 : vector<2x32xf32>
    %289 = vector.extract_strided_slice %252 {offsets = [0, 32], sizes = [2, 32], strides = [1, 1]} : vector<2x96xf32> to vector<2x32xf32>
    %290 = vector.extract_strided_slice %254 {offsets = [0, 32], sizes = [2, 32], strides = [1, 1]} : vector<2x96xf32> to vector<2x32xf32>
    %291 = arith.addf %289, %290 : vector<2x32xf32>
    %292 = arith.negf %291 : vector<2x32xf32>
    %293 = math.exp %292 : vector<2x32xf32>
    %cst_82 = arith.constant 1.000000e+00 : f32
    %294 = vector.broadcast %cst_82 : f32 to vector<2x32xf32>
    %295 = arith.addf %294, %293 : vector<2x32xf32>
    %296 = arith.divf %294, %295 : vector<2x32xf32>
    %297 = vector.extract_strided_slice %252 {offsets = [0, 64], sizes = [2, 32], strides = [1, 1]} : vector<2x96xf32> to vector<2x32xf32>
    %298 = vector.extract_strided_slice %254 {offsets = [0, 64], sizes = [2, 32], strides = [1, 1]} : vector<2x96xf32> to vector<2x32xf32>
    %299 = vector.broadcast %5 : vector<1x32xf32> to vector<2x32xf32>
    %300 = arith.addf %298, %299 : vector<2x32xf32>
    %301 = arith.mulf %288, %300 : vector<2x32xf32>
    %302 = arith.addf %297, %301 : vector<2x32xf32>
    %303 = math.tanh %302 : vector<2x32xf32>
    %304 = arith.subf %248, %303 : vector<2x32xf32>
    %305 = arith.mulf %296, %304 : vector<2x32xf32>
    %306 = arith.addf %303, %305 : vector<2x32xf32>
    %c8_83 = arith.constant 8 : index
    %c0_84 = arith.constant 0 : index
    %307 = vector.load %arg28[%c8_83, %c0_84] : memref<16x32xf32, #tpu.memory_space<vmem>>, vector<2x32xf32>
    tpu.vector_store %arg28[%c8_83, %c0_84], %280 {strides = array<i32>} : memref<16x32xf32, #tpu.memory_space<vmem>>, vector<2x32xf32>,
    %c6_85 = arith.constant 6 : index
    %c0_86 = arith.constant 0 : index
    %308 = vector.load %arg29[%c6_85, %c0_86] : memref<16x32xf32, #tpu.memory_space<vmem>>, vector<2x32xf32>
    tpu.vector_store %arg29[%c6_85, %c0_86], %306 {strides = array<i32>} : memref<16x32xf32, #tpu.memory_space<vmem>>, vector<2x32xf32>,
    %c10_87 = arith.constant 10 : index
    %c0_88 = arith.constant 0 : index
    %309 = vector.load %arg26[%c10_87, %c0_88] : memref<16x96xf32, #tpu.memory_space<vmem>>, vector<2x96xf32>
    %c4_89 = arith.constant 4 : index
    %c0_90 = arith.constant 0 : index
    %310 = vector.load %arg27[%c4_89, %c0_90] : memref<16x96xf32, #tpu.memory_space<vmem>>, vector<2x96xf32>
    %cst_91 = arith.constant dense<0.000000e+00> : vector<2x96xf32>
    %311 = tpu.matmul %280, %2, %cst_91 {dimension_numbers = #tpu.dot_dimension_numbers<[1], [0], [0], [1], [0, 0, 1, 1], [], []>} : vector<2x32xf32>, vector<32x96xf32>, vector<2x96xf32> -> vector<2x96xf32>
    %cst_92 = arith.constant dense<0.000000e+00> : vector<2x96xf32>
    %312 = tpu.matmul %306, %3, %cst_92 {dimension_numbers = #tpu.dot_dimension_numbers<[1], [0], [0], [1], [0, 0, 1, 1], [], []>} : vector<2x32xf32>, vector<32x96xf32>, vector<2x96xf32> -> vector<2x96xf32>
    %313 = vector.extract_strided_slice %309 {offsets = [0, 0], sizes = [2, 32], strides = [1, 1]} : vector<2x96xf32> to vector<2x32xf32>
    %314 = vector.extract_strided_slice %311 {offsets = [0, 0], sizes = [2, 32], strides = [1, 1]} : vector<2x96xf32> to vector<2x32xf32>
    %315 = arith.addf %313, %314 : vector<2x32xf32>
    %316 = arith.negf %315 : vector<2x32xf32>
    %317 = math.exp %316 : vector<2x32xf32>
    %cst_93 = arith.constant 1.000000e+00 : f32
    %318 = vector.broadcast %cst_93 : f32 to vector<2x32xf32>
    %319 = arith.addf %318, %317 : vector<2x32xf32>
    %320 = arith.divf %318, %319 : vector<2x32xf32>
    %321 = vector.extract_strided_slice %309 {offsets = [0, 32], sizes = [2, 32], strides = [1, 1]} : vector<2x96xf32> to vector<2x32xf32>
    %322 = vector.extract_strided_slice %311 {offsets = [0, 32], sizes = [2, 32], strides = [1, 1]} : vector<2x96xf32> to vector<2x32xf32>
    %323 = arith.addf %321, %322 : vector<2x32xf32>
    %324 = arith.negf %323 : vector<2x32xf32>
    %325 = math.exp %324 : vector<2x32xf32>
    %cst_94 = arith.constant 1.000000e+00 : f32
    %326 = vector.broadcast %cst_94 : f32 to vector<2x32xf32>
    %327 = arith.addf %326, %325 : vector<2x32xf32>
    %328 = arith.divf %326, %327 : vector<2x32xf32>
    %329 = vector.extract_strided_slice %309 {offsets = [0, 64], sizes = [2, 32], strides = [1, 1]} : vector<2x96xf32> to vector<2x32xf32>
    %330 = vector.extract_strided_slice %311 {offsets = [0, 64], sizes = [2, 32], strides = [1, 1]} : vector<2x96xf32> to vector<2x32xf32>
    %331 = vector.broadcast %4 : vector<1x32xf32> to vector<2x32xf32>
    %332 = arith.addf %330, %331 : vector<2x32xf32>
    %333 = arith.mulf %320, %332 : vector<2x32xf32>
    %334 = arith.addf %329, %333 : vector<2x32xf32>
    %335 = math.tanh %334 : vector<2x32xf32>
    %336 = arith.subf %280, %335 : vector<2x32xf32>
    %337 = arith.mulf %328, %336 : vector<2x32xf32>
    %338 = arith.addf %335, %337 : vector<2x32xf32>
    %339 = vector.extract_strided_slice %310 {offsets = [0, 0], sizes = [2, 32], strides = [1, 1]} : vector<2x96xf32> to vector<2x32xf32>
    %340 = vector.extract_strided_slice %312 {offsets = [0, 0], sizes = [2, 32], strides = [1, 1]} : vector<2x96xf32> to vector<2x32xf32>
    %341 = arith.addf %339, %340 : vector<2x32xf32>
    %342 = arith.negf %341 : vector<2x32xf32>
    %343 = math.exp %342 : vector<2x32xf32>
    %cst_95 = arith.constant 1.000000e+00 : f32
    %344 = vector.broadcast %cst_95 : f32 to vector<2x32xf32>
    %345 = arith.addf %344, %343 : vector<2x32xf32>
    %346 = arith.divf %344, %345 : vector<2x32xf32>
    %347 = vector.extract_strided_slice %310 {offsets = [0, 32], sizes = [2, 32], strides = [1, 1]} : vector<2x96xf32> to vector<2x32xf32>
    %348 = vector.extract_strided_slice %312 {offsets = [0, 32], sizes = [2, 32], strides = [1, 1]} : vector<2x96xf32> to vector<2x32xf32>
    %349 = arith.addf %347, %348 : vector<2x32xf32>
    %350 = arith.negf %349 : vector<2x32xf32>
    %351 = math.exp %350 : vector<2x32xf32>
    %cst_96 = arith.constant 1.000000e+00 : f32
    %352 = vector.broadcast %cst_96 : f32 to vector<2x32xf32>
    %353 = arith.addf %352, %351 : vector<2x32xf32>
    %354 = arith.divf %352, %353 : vector<2x32xf32>
    %355 = vector.extract_strided_slice %310 {offsets = [0, 64], sizes = [2, 32], strides = [1, 1]} : vector<2x96xf32> to vector<2x32xf32>
    %356 = vector.extract_strided_slice %312 {offsets = [0, 64], sizes = [2, 32], strides = [1, 1]} : vector<2x96xf32> to vector<2x32xf32>
    %357 = vector.broadcast %5 : vector<1x32xf32> to vector<2x32xf32>
    %358 = arith.addf %356, %357 : vector<2x32xf32>
    %359 = arith.mulf %346, %358 : vector<2x32xf32>
    %360 = arith.addf %355, %359 : vector<2x32xf32>
    %361 = math.tanh %360 : vector<2x32xf32>
    %362 = arith.subf %306, %361 : vector<2x32xf32>
    %363 = arith.mulf %354, %362 : vector<2x32xf32>
    %364 = arith.addf %361, %363 : vector<2x32xf32>
    %c10_97 = arith.constant 10 : index
    %c0_98 = arith.constant 0 : index
    %365 = vector.load %arg28[%c10_97, %c0_98] : memref<16x32xf32, #tpu.memory_space<vmem>>, vector<2x32xf32>
    tpu.vector_store %arg28[%c10_97, %c0_98], %338 {strides = array<i32>} : memref<16x32xf32, #tpu.memory_space<vmem>>, vector<2x32xf32>,
    %c4_99 = arith.constant 4 : index
    %c0_100 = arith.constant 0 : index
    %366 = vector.load %arg29[%c4_99, %c0_100] : memref<16x32xf32, #tpu.memory_space<vmem>>, vector<2x32xf32>
    tpu.vector_store %arg29[%c4_99, %c0_100], %364 {strides = array<i32>} : memref<16x32xf32, #tpu.memory_space<vmem>>, vector<2x32xf32>,
    %c12_101 = arith.constant 12 : index
    %c0_102 = arith.constant 0 : index
    %367 = vector.load %arg26[%c12_101, %c0_102] : memref<16x96xf32, #tpu.memory_space<vmem>>, vector<2x96xf32>
    %c2_103 = arith.constant 2 : index
    %c0_104 = arith.constant 0 : index
    %368 = vector.load %arg27[%c2_103, %c0_104] : memref<16x96xf32, #tpu.memory_space<vmem>>, vector<2x96xf32>
    %cst_105 = arith.constant dense<0.000000e+00> : vector<2x96xf32>
    %369 = tpu.matmul %338, %2, %cst_105 {dimension_numbers = #tpu.dot_dimension_numbers<[1], [0], [0], [1], [0, 0, 1, 1], [], []>} : vector<2x32xf32>, vector<32x96xf32>, vector<2x96xf32> -> vector<2x96xf32>
    %cst_106 = arith.constant dense<0.000000e+00> : vector<2x96xf32>
    %370 = tpu.matmul %364, %3, %cst_106 {dimension_numbers = #tpu.dot_dimension_numbers<[1], [0], [0], [1], [0, 0, 1, 1], [], []>} : vector<2x32xf32>, vector<32x96xf32>, vector<2x96xf32> -> vector<2x96xf32>
    %371 = vector.extract_strided_slice %367 {offsets = [0, 0], sizes = [2, 32], strides = [1, 1]} : vector<2x96xf32> to vector<2x32xf32>
    %372 = vector.extract_strided_slice %369 {offsets = [0, 0], sizes = [2, 32], strides = [1, 1]} : vector<2x96xf32> to vector<2x32xf32>
    %373 = arith.addf %371, %372 : vector<2x32xf32>
    %374 = arith.negf %373 : vector<2x32xf32>
    %375 = math.exp %374 : vector<2x32xf32>
    %cst_107 = arith.constant 1.000000e+00 : f32
    %376 = vector.broadcast %cst_107 : f32 to vector<2x32xf32>
    %377 = arith.addf %376, %375 : vector<2x32xf32>
    %378 = arith.divf %376, %377 : vector<2x32xf32>
    %379 = vector.extract_strided_slice %367 {offsets = [0, 32], sizes = [2, 32], strides = [1, 1]} : vector<2x96xf32> to vector<2x32xf32>
    %380 = vector.extract_strided_slice %369 {offsets = [0, 32], sizes = [2, 32], strides = [1, 1]} : vector<2x96xf32> to vector<2x32xf32>
    %381 = arith.addf %379, %380 : vector<2x32xf32>
    %382 = arith.negf %381 : vector<2x32xf32>
    %383 = math.exp %382 : vector<2x32xf32>
    %cst_108 = arith.constant 1.000000e+00 : f32
    %384 = vector.broadcast %cst_108 : f32 to vector<2x32xf32>
    %385 = arith.addf %384, %383 : vector<2x32xf32>
    %386 = arith.divf %384, %385 : vector<2x32xf32>
    %387 = vector.extract_strided_slice %367 {offsets = [0, 64], sizes = [2, 32], strides = [1, 1]} : vector<2x96xf32> to vector<2x32xf32>
    %388 = vector.extract_strided_slice %369 {offsets = [0, 64], sizes = [2, 32], strides = [1, 1]} : vector<2x96xf32> to vector<2x32xf32>
    %389 = vector.broadcast %4 : vector<1x32xf32> to vector<2x32xf32>
    %390 = arith.addf %388, %389 : vector<2x32xf32>
    %391 = arith.mulf %378, %390 : vector<2x32xf32>
    %392 = arith.addf %387, %391 : vector<2x32xf32>
    %393 = math.tanh %392 : vector<2x32xf32>
    %394 = arith.subf %338, %393 : vector<2x32xf32>
    %395 = arith.mulf %386, %394 : vector<2x32xf32>
    %396 = arith.addf %393, %395 : vector<2x32xf32>
    %397 = vector.extract_strided_slice %368 {offsets = [0, 0], sizes = [2, 32], strides = [1, 1]} : vector<2x96xf32> to vector<2x32xf32>
    %398 = vector.extract_strided_slice %370 {offsets = [0, 0], sizes = [2, 32], strides = [1, 1]} : vector<2x96xf32> to vector<2x32xf32>
    %399 = arith.addf %397, %398 : vector<2x32xf32>
    %400 = arith.negf %399 : vector<2x32xf32>
    %401 = math.exp %400 : vector<2x32xf32>
    %cst_109 = arith.constant 1.000000e+00 : f32
    %402 = vector.broadcast %cst_109 : f32 to vector<2x32xf32>
    %403 = arith.addf %402, %401 : vector<2x32xf32>
    %404 = arith.divf %402, %403 : vector<2x32xf32>
    %405 = vector.extract_strided_slice %368 {offsets = [0, 32], sizes = [2, 32], strides = [1, 1]} : vector<2x96xf32> to vector<2x32xf32>
    %406 = vector.extract_strided_slice %370 {offsets = [0, 32], sizes = [2, 32], strides = [1, 1]} : vector<2x96xf32> to vector<2x32xf32>
    %407 = arith.addf %405, %406 : vector<2x32xf32>
    %408 = arith.negf %407 : vector<2x32xf32>
    %409 = math.exp %408 : vector<2x32xf32>
    %cst_110 = arith.constant 1.000000e+00 : f32
    %410 = vector.broadcast %cst_110 : f32 to vector<2x32xf32>
    %411 = arith.addf %410, %409 : vector<2x32xf32>
    %412 = arith.divf %410, %411 : vector<2x32xf32>
    %413 = vector.extract_strided_slice %368 {offsets = [0, 64], sizes = [2, 32], strides = [1, 1]} : vector<2x96xf32> to vector<2x32xf32>
    %414 = vector.extract_strided_slice %370 {offsets = [0, 64], sizes = [2, 32], strides = [1, 1]} : vector<2x96xf32> to vector<2x32xf32>
    %415 = vector.broadcast %5 : vector<1x32xf32> to vector<2x32xf32>
    %416 = arith.addf %414, %415 : vector<2x32xf32>
    %417 = arith.mulf %404, %416 : vector<2x32xf32>
    %418 = arith.addf %413, %417 : vector<2x32xf32>
    %419 = math.tanh %418 : vector<2x32xf32>
    %420 = arith.subf %364, %419 : vector<2x32xf32>
    %421 = arith.mulf %412, %420 : vector<2x32xf32>
    %422 = arith.addf %419, %421 : vector<2x32xf32>
    %c12_111 = arith.constant 12 : index
    %c0_112 = arith.constant 0 : index
    %423 = vector.load %arg28[%c12_111, %c0_112] : memref<16x32xf32, #tpu.memory_space<vmem>>, vector<2x32xf32>
    tpu.vector_store %arg28[%c12_111, %c0_112], %396 {strides = array<i32>} : memref<16x32xf32, #tpu.memory_space<vmem>>, vector<2x32xf32>,
    %c2_113 = arith.constant 2 : index
    %c0_114 = arith.constant 0 : index
    %424 = vector.load %arg29[%c2_113, %c0_114] : memref<16x32xf32, #tpu.memory_space<vmem>>, vector<2x32xf32>
    tpu.vector_store %arg29[%c2_113, %c0_114], %422 {strides = array<i32>} : memref<16x32xf32, #tpu.memory_space<vmem>>, vector<2x32xf32>,
    %c14_115 = arith.constant 14 : index
    %c0_116 = arith.constant 0 : index
    %425 = vector.load %arg26[%c14_115, %c0_116] : memref<16x96xf32, #tpu.memory_space<vmem>>, vector<2x96xf32>
    %c0_117 = arith.constant 0 : index
    %c0_118 = arith.constant 0 : index
    %426 = vector.load %arg27[%c0_117, %c0_118] : memref<16x96xf32, #tpu.memory_space<vmem>>, vector<2x96xf32>
    %cst_119 = arith.constant dense<0.000000e+00> : vector<2x96xf32>
    %427 = tpu.matmul %396, %2, %cst_119 {dimension_numbers = #tpu.dot_dimension_numbers<[1], [0], [0], [1], [0, 0, 1, 1], [], []>} : vector<2x32xf32>, vector<32x96xf32>, vector<2x96xf32> -> vector<2x96xf32>
    %cst_120 = arith.constant dense<0.000000e+00> : vector<2x96xf32>
    %428 = tpu.matmul %422, %3, %cst_120 {dimension_numbers = #tpu.dot_dimension_numbers<[1], [0], [0], [1], [0, 0, 1, 1], [], []>} : vector<2x32xf32>, vector<32x96xf32>, vector<2x96xf32> -> vector<2x96xf32>
    %429 = vector.extract_strided_slice %425 {offsets = [0, 0], sizes = [2, 32], strides = [1, 1]} : vector<2x96xf32> to vector<2x32xf32>
    %430 = vector.extract_strided_slice %427 {offsets = [0, 0], sizes = [2, 32], strides = [1, 1]} : vector<2x96xf32> to vector<2x32xf32>
    %431 = arith.addf %429, %430 : vector<2x32xf32>
    %432 = arith.negf %431 : vector<2x32xf32>
    %433 = math.exp %432 : vector<2x32xf32>
    %cst_121 = arith.constant 1.000000e+00 : f32
    %434 = vector.broadcast %cst_121 : f32 to vector<2x32xf32>
    %435 = arith.addf %434, %433 : vector<2x32xf32>
    %436 = arith.divf %434, %435 : vector<2x32xf32>
    %437 = vector.extract_strided_slice %425 {offsets = [0, 32], sizes = [2, 32], strides = [1, 1]} : vector<2x96xf32> to vector<2x32xf32>
    %438 = vector.extract_strided_slice %427 {offsets = [0, 32], sizes = [2, 32], strides = [1, 1]} : vector<2x96xf32> to vector<2x32xf32>
    %439 = arith.addf %437, %438 : vector<2x32xf32>
    %440 = arith.negf %439 : vector<2x32xf32>
    %441 = math.exp %440 : vector<2x32xf32>
    %cst_122 = arith.constant 1.000000e+00 : f32
    %442 = vector.broadcast %cst_122 : f32 to vector<2x32xf32>
    %443 = arith.addf %442, %441 : vector<2x32xf32>
    %444 = arith.divf %442, %443 : vector<2x32xf32>
    %445 = vector.extract_strided_slice %425 {offsets = [0, 64], sizes = [2, 32], strides = [1, 1]} : vector<2x96xf32> to vector<2x32xf32>
    %446 = vector.extract_strided_slice %427 {offsets = [0, 64], sizes = [2, 32], strides = [1, 1]} : vector<2x96xf32> to vector<2x32xf32>
    %447 = vector.broadcast %4 : vector<1x32xf32> to vector<2x32xf32>
    %448 = arith.addf %446, %447 : vector<2x32xf32>
    %449 = arith.mulf %436, %448 : vector<2x32xf32>
    %450 = arith.addf %445, %449 : vector<2x32xf32>
    %451 = math.tanh %450 : vector<2x32xf32>
    %452 = arith.subf %396, %451 : vector<2x32xf32>
    %453 = arith.mulf %444, %452 : vector<2x32xf32>
    %454 = arith.addf %451, %453 : vector<2x32xf32>
    %455 = vector.extract_strided_slice %426 {offsets = [0, 0], sizes = [2, 32], strides = [1, 1]} : vector<2x96xf32> to vector<2x32xf32>
    %456 = vector.extract_strided_slice %428 {offsets = [0, 0], sizes = [2, 32], strides = [1, 1]} : vector<2x96xf32> to vector<2x32xf32>
    %457 = arith.addf %455, %456 : vector<2x32xf32>
    %458 = arith.negf %457 : vector<2x32xf32>
    %459 = math.exp %458 : vector<2x32xf32>
    %cst_123 = arith.constant 1.000000e+00 : f32
    %460 = vector.broadcast %cst_123 : f32 to vector<2x32xf32>
    %461 = arith.addf %460, %459 : vector<2x32xf32>
    %462 = arith.divf %460, %461 : vector<2x32xf32>
    %463 = vector.extract_strided_slice %426 {offsets = [0, 32], sizes = [2, 32], strides = [1, 1]} : vector<2x96xf32> to vector<2x32xf32>
    %464 = vector.extract_strided_slice %428 {offsets = [0, 32], sizes = [2, 32], strides = [1, 1]} : vector<2x96xf32> to vector<2x32xf32>
    %465 = arith.addf %463, %464 : vector<2x32xf32>
    %466 = arith.negf %465 : vector<2x32xf32>
    %467 = math.exp %466 : vector<2x32xf32>
    %cst_124 = arith.constant 1.000000e+00 : f32
    %468 = vector.broadcast %cst_124 : f32 to vector<2x32xf32>
    %469 = arith.addf %468, %467 : vector<2x32xf32>
    %470 = arith.divf %468, %469 : vector<2x32xf32>
    %471 = vector.extract_strided_slice %426 {offsets = [0, 64], sizes = [2, 32], strides = [1, 1]} : vector<2x96xf32> to vector<2x32xf32>
    %472 = vector.extract_strided_slice %428 {offsets = [0, 64], sizes = [2, 32], strides = [1, 1]} : vector<2x96xf32> to vector<2x32xf32>
    %473 = vector.broadcast %5 : vector<1x32xf32> to vector<2x32xf32>
    %474 = arith.addf %472, %473 : vector<2x32xf32>
    %475 = arith.mulf %462, %474 : vector<2x32xf32>
    %476 = arith.addf %471, %475 : vector<2x32xf32>
    %477 = math.tanh %476 : vector<2x32xf32>
    %478 = arith.subf %422, %477 : vector<2x32xf32>
    %479 = arith.mulf %470, %478 : vector<2x32xf32>
    %480 = arith.addf %477, %479 : vector<2x32xf32>
    %c14_125 = arith.constant 14 : index
    %c0_126 = arith.constant 0 : index
    %481 = vector.load %arg28[%c14_125, %c0_126] : memref<16x32xf32, #tpu.memory_space<vmem>>, vector<2x32xf32>
    tpu.vector_store %arg28[%c14_125, %c0_126], %454 {strides = array<i32>} : memref<16x32xf32, #tpu.memory_space<vmem>>, vector<2x32xf32>,
    %c0_127 = arith.constant 0 : index
    %c0_128 = arith.constant 0 : index
    %482 = vector.load %arg29[%c0_127, %c0_128] : memref<16x32xf32, #tpu.memory_space<vmem>>, vector<2x32xf32>
    tpu.vector_store %arg29[%c0_127, %c0_128], %480 {strides = array<i32>} : memref<16x32xf32, #tpu.memory_space<vmem>>, vector<2x32xf32>,
    %c0_129 = arith.constant 0 : index
    %c0_130 = arith.constant 0 : index
    %483 = vector.load %arg11[%c0_129, %c0_130] : memref<1x96xf32, #tpu.memory_space<vmem>>, vector<1x96xf32>
    %c0_131 = arith.constant 0 : index
    %c0_132 = arith.constant 0 : index
    %484 = vector.load %arg12[%c0_131, %c0_132] : memref<1x96xf32, #tpu.memory_space<vmem>>, vector<1x96xf32>
    %c0_133 = arith.constant 0 : index
    %c0_134 = arith.constant 0 : index
    %485 = vector.load %arg13[%c0_133, %c0_134] : memref<32x96xf32, #tpu.memory_space<vmem>>, vector<32x96xf32>
    %c0_135 = arith.constant 0 : index
    %c0_136 = arith.constant 0 : index
    %486 = vector.load %arg14[%c0_135, %c0_136] : memref<32x96xf32, #tpu.memory_space<vmem>>, vector<32x96xf32>
    %c0_137 = arith.constant 0 : index
    %c0_138 = arith.constant 0 : index
    %487 = vector.load %arg15[%c0_137, %c0_138] : memref<1x32xf32, #tpu.memory_space<vmem>>, vector<1x32xf32>
    %c0_139 = arith.constant 0 : index
    %c0_140 = arith.constant 0 : index
    %488 = vector.load %arg16[%c0_139, %c0_140] : memref<1x32xf32, #tpu.memory_space<vmem>>, vector<1x32xf32>
    %c0_141 = arith.constant 0 : index
    %c0_142 = arith.constant 0 : index
    %489 = vector.load %arg28[%c0_141, %c0_142] : memref<16x32xf32, #tpu.memory_space<vmem>>, vector<16x32xf32>
    %c0_143 = arith.constant 0 : index
    %c0_144 = arith.constant 0 : index
    %490 = vector.load %arg29[%c0_143, %c0_144] : memref<16x32xf32, #tpu.memory_space<vmem>>, vector<16x32xf32>
    %c0_145 = arith.constant 0 : index
    %c0_146 = arith.constant 0 : index
    %491 = vector.load %arg9[%c0_145, %c0_146] : memref<64x96xf32, #tpu.memory_space<vmem>>, vector<64x96xf32>
    %c0_147 = arith.constant 0 : index
    %c0_148 = arith.constant 0 : index
    %492 = vector.load %arg10[%c0_147, %c0_148] : memref<64x96xf32, #tpu.memory_space<vmem>>, vector<64x96xf32>
    %493 = vector.extract_strided_slice %491 {offsets = [0, 0], sizes = [32, 96], strides = [1, 1]} : vector<64x96xf32> to vector<32x96xf32>
    %cst_149 = arith.constant dense<0.000000e+00> : vector<16x96xf32>
    %494 = tpu.matmul %489, %493, %cst_149 {dimension_numbers = #tpu.dot_dimension_numbers<[1], [0], [0], [1], [0, 0, 1, 1], [], []>} : vector<16x32xf32>, vector<32x96xf32>, vector<16x96xf32> -> vector<16x96xf32>
    %495 = vector.extract_strided_slice %491 {offsets = [32, 0], sizes = [32, 96], strides = [1, 1]} : vector<64x96xf32> to vector<32x96xf32>
    %cst_150 = arith.constant dense<0.000000e+00> : vector<16x96xf32>
    %496 = tpu.matmul %490, %495, %cst_150 {dimension_numbers = #tpu.dot_dimension_numbers<[1], [0], [0], [1], [0, 0, 1, 1], [], []>} : vector<16x32xf32>, vector<32x96xf32>, vector<16x96xf32> -> vector<16x96xf32>
    %497 = arith.addf %494, %496 : vector<16x96xf32>
    %498 = vector.broadcast %483 : vector<1x96xf32> to vector<16x96xf32>
    %499 = arith.addf %497, %498 : vector<16x96xf32>
    %c0_151 = arith.constant 0 : index
    %c0_152 = arith.constant 0 : index
    %500 = vector.load %arg26[%c0_151, %c0_152] : memref<16x96xf32, #tpu.memory_space<vmem>>, vector<16x96xf32>
    tpu.vector_store %arg26[%c0_151, %c0_152], %499 {strides = array<i32>} : memref<16x96xf32, #tpu.memory_space<vmem>>, vector<16x96xf32>,
    %501 = vector.extract_strided_slice %492 {offsets = [0, 0], sizes = [32, 96], strides = [1, 1]} : vector<64x96xf32> to vector<32x96xf32>
    %cst_153 = arith.constant dense<0.000000e+00> : vector<16x96xf32>
    %502 = tpu.matmul %489, %501, %cst_153 {dimension_numbers = #tpu.dot_dimension_numbers<[1], [0], [0], [1], [0, 0, 1, 1], [], []>} : vector<16x32xf32>, vector<32x96xf32>, vector<16x96xf32> -> vector<16x96xf32>
    %503 = vector.extract_strided_slice %492 {offsets = [32, 0], sizes = [32, 96], strides = [1, 1]} : vector<64x96xf32> to vector<32x96xf32>
    %cst_154 = arith.constant dense<0.000000e+00> : vector<16x96xf32>
    %504 = tpu.matmul %490, %503, %cst_154 {dimension_numbers = #tpu.dot_dimension_numbers<[1], [0], [0], [1], [0, 0, 1, 1], [], []>} : vector<16x32xf32>, vector<32x96xf32>, vector<16x96xf32> -> vector<16x96xf32>
    %505 = arith.addf %502, %504 : vector<16x96xf32>
    %506 = vector.broadcast %484 : vector<1x96xf32> to vector<16x96xf32>
    %507 = arith.addf %505, %506 : vector<16x96xf32>
    %c0_155 = arith.constant 0 : index
    %c0_156 = arith.constant 0 : index
    %508 = vector.load %arg27[%c0_155, %c0_156] : memref<16x96xf32, #tpu.memory_space<vmem>>, vector<16x96xf32>
    tpu.vector_store %arg27[%c0_155, %c0_156], %507 {strides = array<i32>} : memref<16x96xf32, #tpu.memory_space<vmem>>, vector<16x96xf32>,
    %cst_157 = arith.constant 0.000000e+00 : f32
    %509 = vector.broadcast %cst_157 : f32 to vector<2x32xf32>
    %cst_158 = arith.constant 0.000000e+00 : f32
    %510 = vector.broadcast %cst_158 : f32 to vector<2x32xf32>
    %c0_159 = arith.constant 0 : index
    %c0_160 = arith.constant 0 : index
    %511 = vector.load %arg26[%c0_159, %c0_160] : memref<16x96xf32, #tpu.memory_space<vmem>>, vector<2x96xf32>
    %c14_161 = arith.constant 14 : index
    %c0_162 = arith.constant 0 : index
    %512 = vector.load %arg27[%c14_161, %c0_162] : memref<16x96xf32, #tpu.memory_space<vmem>>, vector<2x96xf32>
    %cst_163 = arith.constant dense<0.000000e+00> : vector<2x96xf32>
    %513 = tpu.matmul %509, %485, %cst_163 {dimension_numbers = #tpu.dot_dimension_numbers<[1], [0], [0], [1], [0, 0, 1, 1], [], []>} : vector<2x32xf32>, vector<32x96xf32>, vector<2x96xf32> -> vector<2x96xf32>
    %cst_164 = arith.constant dense<0.000000e+00> : vector<2x96xf32>
    %514 = tpu.matmul %510, %486, %cst_164 {dimension_numbers = #tpu.dot_dimension_numbers<[1], [0], [0], [1], [0, 0, 1, 1], [], []>} : vector<2x32xf32>, vector<32x96xf32>, vector<2x96xf32> -> vector<2x96xf32>
    %515 = vector.extract_strided_slice %511 {offsets = [0, 0], sizes = [2, 32], strides = [1, 1]} : vector<2x96xf32> to vector<2x32xf32>
    %516 = vector.extract_strided_slice %513 {offsets = [0, 0], sizes = [2, 32], strides = [1, 1]} : vector<2x96xf32> to vector<2x32xf32>
    %517 = arith.addf %515, %516 : vector<2x32xf32>
    %518 = arith.negf %517 : vector<2x32xf32>
    %519 = math.exp %518 : vector<2x32xf32>
    %cst_165 = arith.constant 1.000000e+00 : f32
    %520 = vector.broadcast %cst_165 : f32 to vector<2x32xf32>
    %521 = arith.addf %520, %519 : vector<2x32xf32>
    %522 = arith.divf %520, %521 : vector<2x32xf32>
    %523 = vector.extract_strided_slice %511 {offsets = [0, 32], sizes = [2, 32], strides = [1, 1]} : vector<2x96xf32> to vector<2x32xf32>
    %524 = vector.extract_strided_slice %513 {offsets = [0, 32], sizes = [2, 32], strides = [1, 1]} : vector<2x96xf32> to vector<2x32xf32>
    %525 = arith.addf %523, %524 : vector<2x32xf32>
    %526 = arith.negf %525 : vector<2x32xf32>
    %527 = math.exp %526 : vector<2x32xf32>
    %cst_166 = arith.constant 1.000000e+00 : f32
    %528 = vector.broadcast %cst_166 : f32 to vector<2x32xf32>
    %529 = arith.addf %528, %527 : vector<2x32xf32>
    %530 = arith.divf %528, %529 : vector<2x32xf32>
    %531 = vector.extract_strided_slice %511 {offsets = [0, 64], sizes = [2, 32], strides = [1, 1]} : vector<2x96xf32> to vector<2x32xf32>
    %532 = vector.extract_strided_slice %513 {offsets = [0, 64], sizes = [2, 32], strides = [1, 1]} : vector<2x96xf32> to vector<2x32xf32>
    %533 = vector.broadcast %487 : vector<1x32xf32> to vector<2x32xf32>
    %534 = arith.addf %532, %533 : vector<2x32xf32>
    %535 = arith.mulf %522, %534 : vector<2x32xf32>
    %536 = arith.addf %531, %535 : vector<2x32xf32>
    %537 = math.tanh %536 : vector<2x32xf32>
    %538 = arith.subf %509, %537 : vector<2x32xf32>
    %539 = arith.mulf %530, %538 : vector<2x32xf32>
    %540 = arith.addf %537, %539 : vector<2x32xf32>
    %541 = vector.extract_strided_slice %512 {offsets = [0, 0], sizes = [2, 32], strides = [1, 1]} : vector<2x96xf32> to vector<2x32xf32>
    %542 = vector.extract_strided_slice %514 {offsets = [0, 0], sizes = [2, 32], strides = [1, 1]} : vector<2x96xf32> to vector<2x32xf32>
    %543 = arith.addf %541, %542 : vector<2x32xf32>
    %544 = arith.negf %543 : vector<2x32xf32>
    %545 = math.exp %544 : vector<2x32xf32>
    %cst_167 = arith.constant 1.000000e+00 : f32
    %546 = vector.broadcast %cst_167 : f32 to vector<2x32xf32>
    %547 = arith.addf %546, %545 : vector<2x32xf32>
    %548 = arith.divf %546, %547 : vector<2x32xf32>
    %549 = vector.extract_strided_slice %512 {offsets = [0, 32], sizes = [2, 32], strides = [1, 1]} : vector<2x96xf32> to vector<2x32xf32>
    %550 = vector.extract_strided_slice %514 {offsets = [0, 32], sizes = [2, 32], strides = [1, 1]} : vector<2x96xf32> to vector<2x32xf32>
    %551 = arith.addf %549, %550 : vector<2x32xf32>
    %552 = arith.negf %551 : vector<2x32xf32>
    %553 = math.exp %552 : vector<2x32xf32>
    %cst_168 = arith.constant 1.000000e+00 : f32
    %554 = vector.broadcast %cst_168 : f32 to vector<2x32xf32>
    %555 = arith.addf %554, %553 : vector<2x32xf32>
    %556 = arith.divf %554, %555 : vector<2x32xf32>
    %557 = vector.extract_strided_slice %512 {offsets = [0, 64], sizes = [2, 32], strides = [1, 1]} : vector<2x96xf32> to vector<2x32xf32>
    %558 = vector.extract_strided_slice %514 {offsets = [0, 64], sizes = [2, 32], strides = [1, 1]} : vector<2x96xf32> to vector<2x32xf32>
    %559 = vector.broadcast %488 : vector<1x32xf32> to vector<2x32xf32>
    %560 = arith.addf %558, %559 : vector<2x32xf32>
    %561 = arith.mulf %548, %560 : vector<2x32xf32>
    %562 = arith.addf %557, %561 : vector<2x32xf32>
    %563 = math.tanh %562 : vector<2x32xf32>
    %564 = arith.subf %510, %563 : vector<2x32xf32>
    %565 = arith.mulf %556, %564 : vector<2x32xf32>
    %566 = arith.addf %563, %565 : vector<2x32xf32>
    %c0_169 = arith.constant 0 : index
    %c0_170 = arith.constant 0 : index
    %567 = vector.load %arg28[%c0_169, %c0_170] : memref<16x32xf32, #tpu.memory_space<vmem>>, vector<2x32xf32>
    tpu.vector_store %arg28[%c0_169, %c0_170], %540 {strides = array<i32>} : memref<16x32xf32, #tpu.memory_space<vmem>>, vector<2x32xf32>,
    %c14_171 = arith.constant 14 : index
    %c0_172 = arith.constant 0 : index
    %568 = vector.load %arg29[%c14_171, %c0_172] : memref<16x32xf32, #tpu.memory_space<vmem>>, vector<2x32xf32>
    tpu.vector_store %arg29[%c14_171, %c0_172], %566 {strides = array<i32>} : memref<16x32xf32, #tpu.memory_space<vmem>>, vector<2x32xf32>,
    %c2_173 = arith.constant 2 : index
    %c0_174 = arith.constant 0 : index
    %569 = vector.load %arg26[%c2_173, %c0_174] : memref<16x96xf32, #tpu.memory_space<vmem>>, vector<2x96xf32>
    %c12_175 = arith.constant 12 : index
    %c0_176 = arith.constant 0 : index
    %570 = vector.load %arg27[%c12_175, %c0_176] : memref<16x96xf32, #tpu.memory_space<vmem>>, vector<2x96xf32>
    %cst_177 = arith.constant dense<0.000000e+00> : vector<2x96xf32>
    %571 = tpu.matmul %540, %485, %cst_177 {dimension_numbers = #tpu.dot_dimension_numbers<[1], [0], [0], [1], [0, 0, 1, 1], [], []>} : vector<2x32xf32>, vector<32x96xf32>, vector<2x96xf32> -> vector<2x96xf32>
    %cst_178 = arith.constant dense<0.000000e+00> : vector<2x96xf32>
    %572 = tpu.matmul %566, %486, %cst_178 {dimension_numbers = #tpu.dot_dimension_numbers<[1], [0], [0], [1], [0, 0, 1, 1], [], []>} : vector<2x32xf32>, vector<32x96xf32>, vector<2x96xf32> -> vector<2x96xf32>
    %573 = vector.extract_strided_slice %569 {offsets = [0, 0], sizes = [2, 32], strides = [1, 1]} : vector<2x96xf32> to vector<2x32xf32>
    %574 = vector.extract_strided_slice %571 {offsets = [0, 0], sizes = [2, 32], strides = [1, 1]} : vector<2x96xf32> to vector<2x32xf32>
    %575 = arith.addf %573, %574 : vector<2x32xf32>
    %576 = arith.negf %575 : vector<2x32xf32>
    %577 = math.exp %576 : vector<2x32xf32>
    %cst_179 = arith.constant 1.000000e+00 : f32
    %578 = vector.broadcast %cst_179 : f32 to vector<2x32xf32>
    %579 = arith.addf %578, %577 : vector<2x32xf32>
    %580 = arith.divf %578, %579 : vector<2x32xf32>
    %581 = vector.extract_strided_slice %569 {offsets = [0, 32], sizes = [2, 32], strides = [1, 1]} : vector<2x96xf32> to vector<2x32xf32>
    %582 = vector.extract_strided_slice %571 {offsets = [0, 32], sizes = [2, 32], strides = [1, 1]} : vector<2x96xf32> to vector<2x32xf32>
    %583 = arith.addf %581, %582 : vector<2x32xf32>
    %584 = arith.negf %583 : vector<2x32xf32>
    %585 = math.exp %584 : vector<2x32xf32>
    %cst_180 = arith.constant 1.000000e+00 : f32
    %586 = vector.broadcast %cst_180 : f32 to vector<2x32xf32>
    %587 = arith.addf %586, %585 : vector<2x32xf32>
    %588 = arith.divf %586, %587 : vector<2x32xf32>
    %589 = vector.extract_strided_slice %569 {offsets = [0, 64], sizes = [2, 32], strides = [1, 1]} : vector<2x96xf32> to vector<2x32xf32>
    %590 = vector.extract_strided_slice %571 {offsets = [0, 64], sizes = [2, 32], strides = [1, 1]} : vector<2x96xf32> to vector<2x32xf32>
    %591 = vector.broadcast %487 : vector<1x32xf32> to vector<2x32xf32>
    %592 = arith.addf %590, %591 : vector<2x32xf32>
    %593 = arith.mulf %580, %592 : vector<2x32xf32>
    %594 = arith.addf %589, %593 : vector<2x32xf32>
    %595 = math.tanh %594 : vector<2x32xf32>
    %596 = arith.subf %540, %595 : vector<2x32xf32>
    %597 = arith.mulf %588, %596 : vector<2x32xf32>
    %598 = arith.addf %595, %597 : vector<2x32xf32>
    %599 = vector.extract_strided_slice %570 {offsets = [0, 0], sizes = [2, 32], strides = [1, 1]} : vector<2x96xf32> to vector<2x32xf32>
    %600 = vector.extract_strided_slice %572 {offsets = [0, 0], sizes = [2, 32], strides = [1, 1]} : vector<2x96xf32> to vector<2x32xf32>
    %601 = arith.addf %599, %600 : vector<2x32xf32>
    %602 = arith.negf %601 : vector<2x32xf32>
    %603 = math.exp %602 : vector<2x32xf32>
    %cst_181 = arith.constant 1.000000e+00 : f32
    %604 = vector.broadcast %cst_181 : f32 to vector<2x32xf32>
    %605 = arith.addf %604, %603 : vector<2x32xf32>
    %606 = arith.divf %604, %605 : vector<2x32xf32>
    %607 = vector.extract_strided_slice %570 {offsets = [0, 32], sizes = [2, 32], strides = [1, 1]} : vector<2x96xf32> to vector<2x32xf32>
    %608 = vector.extract_strided_slice %572 {offsets = [0, 32], sizes = [2, 32], strides = [1, 1]} : vector<2x96xf32> to vector<2x32xf32>
    %609 = arith.addf %607, %608 : vector<2x32xf32>
    %610 = arith.negf %609 : vector<2x32xf32>
    %611 = math.exp %610 : vector<2x32xf32>
    %cst_182 = arith.constant 1.000000e+00 : f32
    %612 = vector.broadcast %cst_182 : f32 to vector<2x32xf32>
    %613 = arith.addf %612, %611 : vector<2x32xf32>
    %614 = arith.divf %612, %613 : vector<2x32xf32>
    %615 = vector.extract_strided_slice %570 {offsets = [0, 64], sizes = [2, 32], strides = [1, 1]} : vector<2x96xf32> to vector<2x32xf32>
    %616 = vector.extract_strided_slice %572 {offsets = [0, 64], sizes = [2, 32], strides = [1, 1]} : vector<2x96xf32> to vector<2x32xf32>
    %617 = vector.broadcast %488 : vector<1x32xf32> to vector<2x32xf32>
    %618 = arith.addf %616, %617 : vector<2x32xf32>
    %619 = arith.mulf %606, %618 : vector<2x32xf32>
    %620 = arith.addf %615, %619 : vector<2x32xf32>
    %621 = math.tanh %620 : vector<2x32xf32>
    %622 = arith.subf %566, %621 : vector<2x32xf32>
    %623 = arith.mulf %614, %622 : vector<2x32xf32>
    %624 = arith.addf %621, %623 : vector<2x32xf32>
    %c2_183 = arith.constant 2 : index
    %c0_184 = arith.constant 0 : index
    %625 = vector.load %arg28[%c2_183, %c0_184] : memref<16x32xf32, #tpu.memory_space<vmem>>, vector<2x32xf32>
    tpu.vector_store %arg28[%c2_183, %c0_184], %598 {strides = array<i32>} : memref<16x32xf32, #tpu.memory_space<vmem>>, vector<2x32xf32>,
    %c12_185 = arith.constant 12 : index
    %c0_186 = arith.constant 0 : index
    %626 = vector.load %arg29[%c12_185, %c0_186] : memref<16x32xf32, #tpu.memory_space<vmem>>, vector<2x32xf32>
    tpu.vector_store %arg29[%c12_185, %c0_186], %624 {strides = array<i32>} : memref<16x32xf32, #tpu.memory_space<vmem>>, vector<2x32xf32>,
    %c4_187 = arith.constant 4 : index
    %c0_188 = arith.constant 0 : index
    %627 = vector.load %arg26[%c4_187, %c0_188] : memref<16x96xf32, #tpu.memory_space<vmem>>, vector<2x96xf32>
    %c10_189 = arith.constant 10 : index
    %c0_190 = arith.constant 0 : index
    %628 = vector.load %arg27[%c10_189, %c0_190] : memref<16x96xf32, #tpu.memory_space<vmem>>, vector<2x96xf32>
    %cst_191 = arith.constant dense<0.000000e+00> : vector<2x96xf32>
    %629 = tpu.matmul %598, %485, %cst_191 {dimension_numbers = #tpu.dot_dimension_numbers<[1], [0], [0], [1], [0, 0, 1, 1], [], []>} : vector<2x32xf32>, vector<32x96xf32>, vector<2x96xf32> -> vector<2x96xf32>
    %cst_192 = arith.constant dense<0.000000e+00> : vector<2x96xf32>
    %630 = tpu.matmul %624, %486, %cst_192 {dimension_numbers = #tpu.dot_dimension_numbers<[1], [0], [0], [1], [0, 0, 1, 1], [], []>} : vector<2x32xf32>, vector<32x96xf32>, vector<2x96xf32> -> vector<2x96xf32>
    %631 = vector.extract_strided_slice %627 {offsets = [0, 0], sizes = [2, 32], strides = [1, 1]} : vector<2x96xf32> to vector<2x32xf32>
    %632 = vector.extract_strided_slice %629 {offsets = [0, 0], sizes = [2, 32], strides = [1, 1]} : vector<2x96xf32> to vector<2x32xf32>
    %633 = arith.addf %631, %632 : vector<2x32xf32>
    %634 = arith.negf %633 : vector<2x32xf32>
    %635 = math.exp %634 : vector<2x32xf32>
    %cst_193 = arith.constant 1.000000e+00 : f32
    %636 = vector.broadcast %cst_193 : f32 to vector<2x32xf32>
    %637 = arith.addf %636, %635 : vector<2x32xf32>
    %638 = arith.divf %636, %637 : vector<2x32xf32>
    %639 = vector.extract_strided_slice %627 {offsets = [0, 32], sizes = [2, 32], strides = [1, 1]} : vector<2x96xf32> to vector<2x32xf32>
    %640 = vector.extract_strided_slice %629 {offsets = [0, 32], sizes = [2, 32], strides = [1, 1]} : vector<2x96xf32> to vector<2x32xf32>
    %641 = arith.addf %639, %640 : vector<2x32xf32>
    %642 = arith.negf %641 : vector<2x32xf32>
    %643 = math.exp %642 : vector<2x32xf32>
    %cst_194 = arith.constant 1.000000e+00 : f32
    %644 = vector.broadcast %cst_194 : f32 to vector<2x32xf32>
    %645 = arith.addf %644, %643 : vector<2x32xf32>
    %646 = arith.divf %644, %645 : vector<2x32xf32>
    %647 = vector.extract_strided_slice %627 {offsets = [0, 64], sizes = [2, 32], strides = [1, 1]} : vector<2x96xf32> to vector<2x32xf32>
    %648 = vector.extract_strided_slice %629 {offsets = [0, 64], sizes = [2, 32], strides = [1, 1]} : vector<2x96xf32> to vector<2x32xf32>
    %649 = vector.broadcast %487 : vector<1x32xf32> to vector<2x32xf32>
    %650 = arith.addf %648, %649 : vector<2x32xf32>
    %651 = arith.mulf %638, %650 : vector<2x32xf32>
    %652 = arith.addf %647, %651 : vector<2x32xf32>
    %653 = math.tanh %652 : vector<2x32xf32>
    %654 = arith.subf %598, %653 : vector<2x32xf32>
    %655 = arith.mulf %646, %654 : vector<2x32xf32>
    %656 = arith.addf %653, %655 : vector<2x32xf32>
    %657 = vector.extract_strided_slice %628 {offsets = [0, 0], sizes = [2, 32], strides = [1, 1]} : vector<2x96xf32> to vector<2x32xf32>
    %658 = vector.extract_strided_slice %630 {offsets = [0, 0], sizes = [2, 32], strides = [1, 1]} : vector<2x96xf32> to vector<2x32xf32>
    %659 = arith.addf %657, %658 : vector<2x32xf32>
    %660 = arith.negf %659 : vector<2x32xf32>
    %661 = math.exp %660 : vector<2x32xf32>
    %cst_195 = arith.constant 1.000000e+00 : f32
    %662 = vector.broadcast %cst_195 : f32 to vector<2x32xf32>
    %663 = arith.addf %662, %661 : vector<2x32xf32>
    %664 = arith.divf %662, %663 : vector<2x32xf32>
    %665 = vector.extract_strided_slice %628 {offsets = [0, 32], sizes = [2, 32], strides = [1, 1]} : vector<2x96xf32> to vector<2x32xf32>
    %666 = vector.extract_strided_slice %630 {offsets = [0, 32], sizes = [2, 32], strides = [1, 1]} : vector<2x96xf32> to vector<2x32xf32>
    %667 = arith.addf %665, %666 : vector<2x32xf32>
    %668 = arith.negf %667 : vector<2x32xf32>
    %669 = math.exp %668 : vector<2x32xf32>
    %cst_196 = arith.constant 1.000000e+00 : f32
    %670 = vector.broadcast %cst_196 : f32 to vector<2x32xf32>
    %671 = arith.addf %670, %669 : vector<2x32xf32>
    %672 = arith.divf %670, %671 : vector<2x32xf32>
    %673 = vector.extract_strided_slice %628 {offsets = [0, 64], sizes = [2, 32], strides = [1, 1]} : vector<2x96xf32> to vector<2x32xf32>
    %674 = vector.extract_strided_slice %630 {offsets = [0, 64], sizes = [2, 32], strides = [1, 1]} : vector<2x96xf32> to vector<2x32xf32>
    %675 = vector.broadcast %488 : vector<1x32xf32> to vector<2x32xf32>
    %676 = arith.addf %674, %675 : vector<2x32xf32>
    %677 = arith.mulf %664, %676 : vector<2x32xf32>
    %678 = arith.addf %673, %677 : vector<2x32xf32>
    %679 = math.tanh %678 : vector<2x32xf32>
    %680 = arith.subf %624, %679 : vector<2x32xf32>
    %681 = arith.mulf %672, %680 : vector<2x32xf32>
    %682 = arith.addf %679, %681 : vector<2x32xf32>
    %c4_197 = arith.constant 4 : index
    %c0_198 = arith.constant 0 : index
    %683 = vector.load %arg28[%c4_197, %c0_198] : memref<16x32xf32, #tpu.memory_space<vmem>>, vector<2x32xf32>
    tpu.vector_store %arg28[%c4_197, %c0_198], %656 {strides = array<i32>} : memref<16x32xf32, #tpu.memory_space<vmem>>, vector<2x32xf32>,
    %c10_199 = arith.constant 10 : index
    %c0_200 = arith.constant 0 : index
    %684 = vector.load %arg29[%c10_199, %c0_200] : memref<16x32xf32, #tpu.memory_space<vmem>>, vector<2x32xf32>
    tpu.vector_store %arg29[%c10_199, %c0_200], %682 {strides = array<i32>} : memref<16x32xf32, #tpu.memory_space<vmem>>, vector<2x32xf32>,
    %c6_201 = arith.constant 6 : index
    %c0_202 = arith.constant 0 : index
    %685 = vector.load %arg26[%c6_201, %c0_202] : memref<16x96xf32, #tpu.memory_space<vmem>>, vector<2x96xf32>
    %c8_203 = arith.constant 8 : index
    %c0_204 = arith.constant 0 : index
    %686 = vector.load %arg27[%c8_203, %c0_204] : memref<16x96xf32, #tpu.memory_space<vmem>>, vector<2x96xf32>
    %cst_205 = arith.constant dense<0.000000e+00> : vector<2x96xf32>
    %687 = tpu.matmul %656, %485, %cst_205 {dimension_numbers = #tpu.dot_dimension_numbers<[1], [0], [0], [1], [0, 0, 1, 1], [], []>} : vector<2x32xf32>, vector<32x96xf32>, vector<2x96xf32> -> vector<2x96xf32>
    %cst_206 = arith.constant dense<0.000000e+00> : vector<2x96xf32>
    %688 = tpu.matmul %682, %486, %cst_206 {dimension_numbers = #tpu.dot_dimension_numbers<[1], [0], [0], [1], [0, 0, 1, 1], [], []>} : vector<2x32xf32>, vector<32x96xf32>, vector<2x96xf32> -> vector<2x96xf32>
    %689 = vector.extract_strided_slice %685 {offsets = [0, 0], sizes = [2, 32], strides = [1, 1]} : vector<2x96xf32> to vector<2x32xf32>
    %690 = vector.extract_strided_slice %687 {offsets = [0, 0], sizes = [2, 32], strides = [1, 1]} : vector<2x96xf32> to vector<2x32xf32>
    %691 = arith.addf %689, %690 : vector<2x32xf32>
    %692 = arith.negf %691 : vector<2x32xf32>
    %693 = math.exp %692 : vector<2x32xf32>
    %cst_207 = arith.constant 1.000000e+00 : f32
    %694 = vector.broadcast %cst_207 : f32 to vector<2x32xf32>
    %695 = arith.addf %694, %693 : vector<2x32xf32>
    %696 = arith.divf %694, %695 : vector<2x32xf32>
    %697 = vector.extract_strided_slice %685 {offsets = [0, 32], sizes = [2, 32], strides = [1, 1]} : vector<2x96xf32> to vector<2x32xf32>
    %698 = vector.extract_strided_slice %687 {offsets = [0, 32], sizes = [2, 32], strides = [1, 1]} : vector<2x96xf32> to vector<2x32xf32>
    %699 = arith.addf %697, %698 : vector<2x32xf32>
    %700 = arith.negf %699 : vector<2x32xf32>
    %701 = math.exp %700 : vector<2x32xf32>
    %cst_208 = arith.constant 1.000000e+00 : f32
    %702 = vector.broadcast %cst_208 : f32 to vector<2x32xf32>
    %703 = arith.addf %702, %701 : vector<2x32xf32>
    %704 = arith.divf %702, %703 : vector<2x32xf32>
    %705 = vector.extract_strided_slice %685 {offsets = [0, 64], sizes = [2, 32], strides = [1, 1]} : vector<2x96xf32> to vector<2x32xf32>
    %706 = vector.extract_strided_slice %687 {offsets = [0, 64], sizes = [2, 32], strides = [1, 1]} : vector<2x96xf32> to vector<2x32xf32>
    %707 = vector.broadcast %487 : vector<1x32xf32> to vector<2x32xf32>
    %708 = arith.addf %706, %707 : vector<2x32xf32>
    %709 = arith.mulf %696, %708 : vector<2x32xf32>
    %710 = arith.addf %705, %709 : vector<2x32xf32>
    %711 = math.tanh %710 : vector<2x32xf32>
    %712 = arith.subf %656, %711 : vector<2x32xf32>
    %713 = arith.mulf %704, %712 : vector<2x32xf32>
    %714 = arith.addf %711, %713 : vector<2x32xf32>
    %715 = vector.extract_strided_slice %686 {offsets = [0, 0], sizes = [2, 32], strides = [1, 1]} : vector<2x96xf32> to vector<2x32xf32>
    %716 = vector.extract_strided_slice %688 {offsets = [0, 0], sizes = [2, 32], strides = [1, 1]} : vector<2x96xf32> to vector<2x32xf32>
    %717 = arith.addf %715, %716 : vector<2x32xf32>
    %718 = arith.negf %717 : vector<2x32xf32>
    %719 = math.exp %718 : vector<2x32xf32>
    %cst_209 = arith.constant 1.000000e+00 : f32
    %720 = vector.broadcast %cst_209 : f32 to vector<2x32xf32>
    %721 = arith.addf %720, %719 : vector<2x32xf32>
    %722 = arith.divf %720, %721 : vector<2x32xf32>
    %723 = vector.extract_strided_slice %686 {offsets = [0, 32], sizes = [2, 32], strides = [1, 1]} : vector<2x96xf32> to vector<2x32xf32>
    %724 = vector.extract_strided_slice %688 {offsets = [0, 32], sizes = [2, 32], strides = [1, 1]} : vector<2x96xf32> to vector<2x32xf32>
    %725 = arith.addf %723, %724 : vector<2x32xf32>
    %726 = arith.negf %725 : vector<2x32xf32>
    %727 = math.exp %726 : vector<2x32xf32>
    %cst_210 = arith.constant 1.000000e+00 : f32
    %728 = vector.broadcast %cst_210 : f32 to vector<2x32xf32>
    %729 = arith.addf %728, %727 : vector<2x32xf32>
    %730 = arith.divf %728, %729 : vector<2x32xf32>
    %731 = vector.extract_strided_slice %686 {offsets = [0, 64], sizes = [2, 32], strides = [1, 1]} : vector<2x96xf32> to vector<2x32xf32>
    %732 = vector.extract_strided_slice %688 {offsets = [0, 64], sizes = [2, 32], strides = [1, 1]} : vector<2x96xf32> to vector<2x32xf32>
    %733 = vector.broadcast %488 : vector<1x32xf32> to vector<2x32xf32>
    %734 = arith.addf %732, %733 : vector<2x32xf32>
    %735 = arith.mulf %722, %734 : vector<2x32xf32>
    %736 = arith.addf %731, %735 : vector<2x32xf32>
    %737 = math.tanh %736 : vector<2x32xf32>
    %738 = arith.subf %682, %737 : vector<2x32xf32>
    %739 = arith.mulf %730, %738 : vector<2x32xf32>
    %740 = arith.addf %737, %739 : vector<2x32xf32>
    %c6_211 = arith.constant 6 : index
    %c0_212 = arith.constant 0 : index
    %741 = vector.load %arg28[%c6_211, %c0_212] : memref<16x32xf32, #tpu.memory_space<vmem>>, vector<2x32xf32>
    tpu.vector_store %arg28[%c6_211, %c0_212], %714 {strides = array<i32>} : memref<16x32xf32, #tpu.memory_space<vmem>>, vector<2x32xf32>,
    %c8_213 = arith.constant 8 : index
    %c0_214 = arith.constant 0 : index
    %742 = vector.load %arg29[%c8_213, %c0_214] : memref<16x32xf32, #tpu.memory_space<vmem>>, vector<2x32xf32>
    tpu.vector_store %arg29[%c8_213, %c0_214], %740 {strides = array<i32>} : memref<16x32xf32, #tpu.memory_space<vmem>>, vector<2x32xf32>,
    %c8_215 = arith.constant 8 : index
    %c0_216 = arith.constant 0 : index
    %743 = vector.load %arg26[%c8_215, %c0_216] : memref<16x96xf32, #tpu.memory_space<vmem>>, vector<2x96xf32>
    %c6_217 = arith.constant 6 : index
    %c0_218 = arith.constant 0 : index
    %744 = vector.load %arg27[%c6_217, %c0_218] : memref<16x96xf32, #tpu.memory_space<vmem>>, vector<2x96xf32>
    %cst_219 = arith.constant dense<0.000000e+00> : vector<2x96xf32>
    %745 = tpu.matmul %714, %485, %cst_219 {dimension_numbers = #tpu.dot_dimension_numbers<[1], [0], [0], [1], [0, 0, 1, 1], [], []>} : vector<2x32xf32>, vector<32x96xf32>, vector<2x96xf32> -> vector<2x96xf32>
    %cst_220 = arith.constant dense<0.000000e+00> : vector<2x96xf32>
    %746 = tpu.matmul %740, %486, %cst_220 {dimension_numbers = #tpu.dot_dimension_numbers<[1], [0], [0], [1], [0, 0, 1, 1], [], []>} : vector<2x32xf32>, vector<32x96xf32>, vector<2x96xf32> -> vector<2x96xf32>
    %747 = vector.extract_strided_slice %743 {offsets = [0, 0], sizes = [2, 32], strides = [1, 1]} : vector<2x96xf32> to vector<2x32xf32>
    %748 = vector.extract_strided_slice %745 {offsets = [0, 0], sizes = [2, 32], strides = [1, 1]} : vector<2x96xf32> to vector<2x32xf32>
    %749 = arith.addf %747, %748 : vector<2x32xf32>
    %750 = arith.negf %749 : vector<2x32xf32>
    %751 = math.exp %750 : vector<2x32xf32>
    %cst_221 = arith.constant 1.000000e+00 : f32
    %752 = vector.broadcast %cst_221 : f32 to vector<2x32xf32>
    %753 = arith.addf %752, %751 : vector<2x32xf32>
    %754 = arith.divf %752, %753 : vector<2x32xf32>
    %755 = vector.extract_strided_slice %743 {offsets = [0, 32], sizes = [2, 32], strides = [1, 1]} : vector<2x96xf32> to vector<2x32xf32>
    %756 = vector.extract_strided_slice %745 {offsets = [0, 32], sizes = [2, 32], strides = [1, 1]} : vector<2x96xf32> to vector<2x32xf32>
    %757 = arith.addf %755, %756 : vector<2x32xf32>
    %758 = arith.negf %757 : vector<2x32xf32>
    %759 = math.exp %758 : vector<2x32xf32>
    %cst_222 = arith.constant 1.000000e+00 : f32
    %760 = vector.broadcast %cst_222 : f32 to vector<2x32xf32>
    %761 = arith.addf %760, %759 : vector<2x32xf32>
    %762 = arith.divf %760, %761 : vector<2x32xf32>
    %763 = vector.extract_strided_slice %743 {offsets = [0, 64], sizes = [2, 32], strides = [1, 1]} : vector<2x96xf32> to vector<2x32xf32>
    %764 = vector.extract_strided_slice %745 {offsets = [0, 64], sizes = [2, 32], strides = [1, 1]} : vector<2x96xf32> to vector<2x32xf32>
    %765 = vector.broadcast %487 : vector<1x32xf32> to vector<2x32xf32>
    %766 = arith.addf %764, %765 : vector<2x32xf32>
    %767 = arith.mulf %754, %766 : vector<2x32xf32>
    %768 = arith.addf %763, %767 : vector<2x32xf32>
    %769 = math.tanh %768 : vector<2x32xf32>
    %770 = arith.subf %714, %769 : vector<2x32xf32>
    %771 = arith.mulf %762, %770 : vector<2x32xf32>
    %772 = arith.addf %769, %771 : vector<2x32xf32>
    %773 = vector.extract_strided_slice %744 {offsets = [0, 0], sizes = [2, 32], strides = [1, 1]} : vector<2x96xf32> to vector<2x32xf32>
    %774 = vector.extract_strided_slice %746 {offsets = [0, 0], sizes = [2, 32], strides = [1, 1]} : vector<2x96xf32> to vector<2x32xf32>
    %775 = arith.addf %773, %774 : vector<2x32xf32>
    %776 = arith.negf %775 : vector<2x32xf32>
    %777 = math.exp %776 : vector<2x32xf32>
    %cst_223 = arith.constant 1.000000e+00 : f32
    %778 = vector.broadcast %cst_223 : f32 to vector<2x32xf32>
    %779 = arith.addf %778, %777 : vector<2x32xf32>
    %780 = arith.divf %778, %779 : vector<2x32xf32>
    %781 = vector.extract_strided_slice %744 {offsets = [0, 32], sizes = [2, 32], strides = [1, 1]} : vector<2x96xf32> to vector<2x32xf32>
    %782 = vector.extract_strided_slice %746 {offsets = [0, 32], sizes = [2, 32], strides = [1, 1]} : vector<2x96xf32> to vector<2x32xf32>
    %783 = arith.addf %781, %782 : vector<2x32xf32>
    %784 = arith.negf %783 : vector<2x32xf32>
    %785 = math.exp %784 : vector<2x32xf32>
    %cst_224 = arith.constant 1.000000e+00 : f32
    %786 = vector.broadcast %cst_224 : f32 to vector<2x32xf32>
    %787 = arith.addf %786, %785 : vector<2x32xf32>
    %788 = arith.divf %786, %787 : vector<2x32xf32>
    %789 = vector.extract_strided_slice %744 {offsets = [0, 64], sizes = [2, 32], strides = [1, 1]} : vector<2x96xf32> to vector<2x32xf32>
    %790 = vector.extract_strided_slice %746 {offsets = [0, 64], sizes = [2, 32], strides = [1, 1]} : vector<2x96xf32> to vector<2x32xf32>
    %791 = vector.broadcast %488 : vector<1x32xf32> to vector<2x32xf32>
    %792 = arith.addf %790, %791 : vector<2x32xf32>
    %793 = arith.mulf %780, %792 : vector<2x32xf32>
    %794 = arith.addf %789, %793 : vector<2x32xf32>
    %795 = math.tanh %794 : vector<2x32xf32>
    %796 = arith.subf %740, %795 : vector<2x32xf32>
    %797 = arith.mulf %788, %796 : vector<2x32xf32>
    %798 = arith.addf %795, %797 : vector<2x32xf32>
    %c8_225 = arith.constant 8 : index
    %c0_226 = arith.constant 0 : index
    %799 = vector.load %arg28[%c8_225, %c0_226] : memref<16x32xf32, #tpu.memory_space<vmem>>, vector<2x32xf32>
    tpu.vector_store %arg28[%c8_225, %c0_226], %772 {strides = array<i32>} : memref<16x32xf32, #tpu.memory_space<vmem>>, vector<2x32xf32>,
    %c6_227 = arith.constant 6 : index
    %c0_228 = arith.constant 0 : index
    %800 = vector.load %arg29[%c6_227, %c0_228] : memref<16x32xf32, #tpu.memory_space<vmem>>, vector<2x32xf32>
    tpu.vector_store %arg29[%c6_227, %c0_228], %798 {strides = array<i32>} : memref<16x32xf32, #tpu.memory_space<vmem>>, vector<2x32xf32>,
    %c10_229 = arith.constant 10 : index
    %c0_230 = arith.constant 0 : index
    %801 = vector.load %arg26[%c10_229, %c0_230] : memref<16x96xf32, #tpu.memory_space<vmem>>, vector<2x96xf32>
    %c4_231 = arith.constant 4 : index
    %c0_232 = arith.constant 0 : index
    %802 = vector.load %arg27[%c4_231, %c0_232] : memref<16x96xf32, #tpu.memory_space<vmem>>, vector<2x96xf32>
    %cst_233 = arith.constant dense<0.000000e+00> : vector<2x96xf32>
    %803 = tpu.matmul %772, %485, %cst_233 {dimension_numbers = #tpu.dot_dimension_numbers<[1], [0], [0], [1], [0, 0, 1, 1], [], []>} : vector<2x32xf32>, vector<32x96xf32>, vector<2x96xf32> -> vector<2x96xf32>
    %cst_234 = arith.constant dense<0.000000e+00> : vector<2x96xf32>
    %804 = tpu.matmul %798, %486, %cst_234 {dimension_numbers = #tpu.dot_dimension_numbers<[1], [0], [0], [1], [0, 0, 1, 1], [], []>} : vector<2x32xf32>, vector<32x96xf32>, vector<2x96xf32> -> vector<2x96xf32>
    %805 = vector.extract_strided_slice %801 {offsets = [0, 0], sizes = [2, 32], strides = [1, 1]} : vector<2x96xf32> to vector<2x32xf32>
    %806 = vector.extract_strided_slice %803 {offsets = [0, 0], sizes = [2, 32], strides = [1, 1]} : vector<2x96xf32> to vector<2x32xf32>
    %807 = arith.addf %805, %806 : vector<2x32xf32>
    %808 = arith.negf %807 : vector<2x32xf32>
    %809 = math.exp %808 : vector<2x32xf32>
    %cst_235 = arith.constant 1.000000e+00 : f32
    %810 = vector.broadcast %cst_235 : f32 to vector<2x32xf32>
    %811 = arith.addf %810, %809 : vector<2x32xf32>
    %812 = arith.divf %810, %811 : vector<2x32xf32>
    %813 = vector.extract_strided_slice %801 {offsets = [0, 32], sizes = [2, 32], strides = [1, 1]} : vector<2x96xf32> to vector<2x32xf32>
    %814 = vector.extract_strided_slice %803 {offsets = [0, 32], sizes = [2, 32], strides = [1, 1]} : vector<2x96xf32> to vector<2x32xf32>
    %815 = arith.addf %813, %814 : vector<2x32xf32>
    %816 = arith.negf %815 : vector<2x32xf32>
    %817 = math.exp %816 : vector<2x32xf32>
    %cst_236 = arith.constant 1.000000e+00 : f32
    %818 = vector.broadcast %cst_236 : f32 to vector<2x32xf32>
    %819 = arith.addf %818, %817 : vector<2x32xf32>
    %820 = arith.divf %818, %819 : vector<2x32xf32>
    %821 = vector.extract_strided_slice %801 {offsets = [0, 64], sizes = [2, 32], strides = [1, 1]} : vector<2x96xf32> to vector<2x32xf32>
    %822 = vector.extract_strided_slice %803 {offsets = [0, 64], sizes = [2, 32], strides = [1, 1]} : vector<2x96xf32> to vector<2x32xf32>
    %823 = vector.broadcast %487 : vector<1x32xf32> to vector<2x32xf32>
    %824 = arith.addf %822, %823 : vector<2x32xf32>
    %825 = arith.mulf %812, %824 : vector<2x32xf32>
    %826 = arith.addf %821, %825 : vector<2x32xf32>
    %827 = math.tanh %826 : vector<2x32xf32>
    %828 = arith.subf %772, %827 : vector<2x32xf32>
    %829 = arith.mulf %820, %828 : vector<2x32xf32>
    %830 = arith.addf %827, %829 : vector<2x32xf32>
    %831 = vector.extract_strided_slice %802 {offsets = [0, 0], sizes = [2, 32], strides = [1, 1]} : vector<2x96xf32> to vector<2x32xf32>
    %832 = vector.extract_strided_slice %804 {offsets = [0, 0], sizes = [2, 32], strides = [1, 1]} : vector<2x96xf32> to vector<2x32xf32>
    %833 = arith.addf %831, %832 : vector<2x32xf32>
    %834 = arith.negf %833 : vector<2x32xf32>
    %835 = math.exp %834 : vector<2x32xf32>
    %cst_237 = arith.constant 1.000000e+00 : f32
    %836 = vector.broadcast %cst_237 : f32 to vector<2x32xf32>
    %837 = arith.addf %836, %835 : vector<2x32xf32>
    %838 = arith.divf %836, %837 : vector<2x32xf32>
    %839 = vector.extract_strided_slice %802 {offsets = [0, 32], sizes = [2, 32], strides = [1, 1]} : vector<2x96xf32> to vector<2x32xf32>
    %840 = vector.extract_strided_slice %804 {offsets = [0, 32], sizes = [2, 32], strides = [1, 1]} : vector<2x96xf32> to vector<2x32xf32>
    %841 = arith.addf %839, %840 : vector<2x32xf32>
    %842 = arith.negf %841 : vector<2x32xf32>
    %843 = math.exp %842 : vector<2x32xf32>
    %cst_238 = arith.constant 1.000000e+00 : f32
    %844 = vector.broadcast %cst_238 : f32 to vector<2x32xf32>
    %845 = arith.addf %844, %843 : vector<2x32xf32>
    %846 = arith.divf %844, %845 : vector<2x32xf32>
    %847 = vector.extract_strided_slice %802 {offsets = [0, 64], sizes = [2, 32], strides = [1, 1]} : vector<2x96xf32> to vector<2x32xf32>
    %848 = vector.extract_strided_slice %804 {offsets = [0, 64], sizes = [2, 32], strides = [1, 1]} : vector<2x96xf32> to vector<2x32xf32>
    %849 = vector.broadcast %488 : vector<1x32xf32> to vector<2x32xf32>
    %850 = arith.addf %848, %849 : vector<2x32xf32>
    %851 = arith.mulf %838, %850 : vector<2x32xf32>
    %852 = arith.addf %847, %851 : vector<2x32xf32>
    %853 = math.tanh %852 : vector<2x32xf32>
    %854 = arith.subf %798, %853 : vector<2x32xf32>
    %855 = arith.mulf %846, %854 : vector<2x32xf32>
    %856 = arith.addf %853, %855 : vector<2x32xf32>
    %c10_239 = arith.constant 10 : index
    %c0_240 = arith.constant 0 : index
    %857 = vector.load %arg28[%c10_239, %c0_240] : memref<16x32xf32, #tpu.memory_space<vmem>>, vector<2x32xf32>
    tpu.vector_store %arg28[%c10_239, %c0_240], %830 {strides = array<i32>} : memref<16x32xf32, #tpu.memory_space<vmem>>, vector<2x32xf32>,
    %c4_241 = arith.constant 4 : index
    %c0_242 = arith.constant 0 : index
    %858 = vector.load %arg29[%c4_241, %c0_242] : memref<16x32xf32, #tpu.memory_space<vmem>>, vector<2x32xf32>
    tpu.vector_store %arg29[%c4_241, %c0_242], %856 {strides = array<i32>} : memref<16x32xf32, #tpu.memory_space<vmem>>, vector<2x32xf32>,
    %c12_243 = arith.constant 12 : index
    %c0_244 = arith.constant 0 : index
    %859 = vector.load %arg26[%c12_243, %c0_244] : memref<16x96xf32, #tpu.memory_space<vmem>>, vector<2x96xf32>
    %c2_245 = arith.constant 2 : index
    %c0_246 = arith.constant 0 : index
    %860 = vector.load %arg27[%c2_245, %c0_246] : memref<16x96xf32, #tpu.memory_space<vmem>>, vector<2x96xf32>
    %cst_247 = arith.constant dense<0.000000e+00> : vector<2x96xf32>
    %861 = tpu.matmul %830, %485, %cst_247 {dimension_numbers = #tpu.dot_dimension_numbers<[1], [0], [0], [1], [0, 0, 1, 1], [], []>} : vector<2x32xf32>, vector<32x96xf32>, vector<2x96xf32> -> vector<2x96xf32>
    %cst_248 = arith.constant dense<0.000000e+00> : vector<2x96xf32>
    %862 = tpu.matmul %856, %486, %cst_248 {dimension_numbers = #tpu.dot_dimension_numbers<[1], [0], [0], [1], [0, 0, 1, 1], [], []>} : vector<2x32xf32>, vector<32x96xf32>, vector<2x96xf32> -> vector<2x96xf32>
    %863 = vector.extract_strided_slice %859 {offsets = [0, 0], sizes = [2, 32], strides = [1, 1]} : vector<2x96xf32> to vector<2x32xf32>
    %864 = vector.extract_strided_slice %861 {offsets = [0, 0], sizes = [2, 32], strides = [1, 1]} : vector<2x96xf32> to vector<2x32xf32>
    %865 = arith.addf %863, %864 : vector<2x32xf32>
    %866 = arith.negf %865 : vector<2x32xf32>
    %867 = math.exp %866 : vector<2x32xf32>
    %cst_249 = arith.constant 1.000000e+00 : f32
    %868 = vector.broadcast %cst_249 : f32 to vector<2x32xf32>
    %869 = arith.addf %868, %867 : vector<2x32xf32>
    %870 = arith.divf %868, %869 : vector<2x32xf32>
    %871 = vector.extract_strided_slice %859 {offsets = [0, 32], sizes = [2, 32], strides = [1, 1]} : vector<2x96xf32> to vector<2x32xf32>
    %872 = vector.extract_strided_slice %861 {offsets = [0, 32], sizes = [2, 32], strides = [1, 1]} : vector<2x96xf32> to vector<2x32xf32>
    %873 = arith.addf %871, %872 : vector<2x32xf32>
    %874 = arith.negf %873 : vector<2x32xf32>
    %875 = math.exp %874 : vector<2x32xf32>
    %cst_250 = arith.constant 1.000000e+00 : f32
    %876 = vector.broadcast %cst_250 : f32 to vector<2x32xf32>
    %877 = arith.addf %876, %875 : vector<2x32xf32>
    %878 = arith.divf %876, %877 : vector<2x32xf32>
    %879 = vector.extract_strided_slice %859 {offsets = [0, 64], sizes = [2, 32], strides = [1, 1]} : vector<2x96xf32> to vector<2x32xf32>
    %880 = vector.extract_strided_slice %861 {offsets = [0, 64], sizes = [2, 32], strides = [1, 1]} : vector<2x96xf32> to vector<2x32xf32>
    %881 = vector.broadcast %487 : vector<1x32xf32> to vector<2x32xf32>
    %882 = arith.addf %880, %881 : vector<2x32xf32>
    %883 = arith.mulf %870, %882 : vector<2x32xf32>
    %884 = arith.addf %879, %883 : vector<2x32xf32>
    %885 = math.tanh %884 : vector<2x32xf32>
    %886 = arith.subf %830, %885 : vector<2x32xf32>
    %887 = arith.mulf %878, %886 : vector<2x32xf32>
    %888 = arith.addf %885, %887 : vector<2x32xf32>
    %889 = vector.extract_strided_slice %860 {offsets = [0, 0], sizes = [2, 32], strides = [1, 1]} : vector<2x96xf32> to vector<2x32xf32>
    %890 = vector.extract_strided_slice %862 {offsets = [0, 0], sizes = [2, 32], strides = [1, 1]} : vector<2x96xf32> to vector<2x32xf32>
    %891 = arith.addf %889, %890 : vector<2x32xf32>
    %892 = arith.negf %891 : vector<2x32xf32>
    %893 = math.exp %892 : vector<2x32xf32>
    %cst_251 = arith.constant 1.000000e+00 : f32
    %894 = vector.broadcast %cst_251 : f32 to vector<2x32xf32>
    %895 = arith.addf %894, %893 : vector<2x32xf32>
    %896 = arith.divf %894, %895 : vector<2x32xf32>
    %897 = vector.extract_strided_slice %860 {offsets = [0, 32], sizes = [2, 32], strides = [1, 1]} : vector<2x96xf32> to vector<2x32xf32>
    %898 = vector.extract_strided_slice %862 {offsets = [0, 32], sizes = [2, 32], strides = [1, 1]} : vector<2x96xf32> to vector<2x32xf32>
    %899 = arith.addf %897, %898 : vector<2x32xf32>
    %900 = arith.negf %899 : vector<2x32xf32>
    %901 = math.exp %900 : vector<2x32xf32>
    %cst_252 = arith.constant 1.000000e+00 : f32
    %902 = vector.broadcast %cst_252 : f32 to vector<2x32xf32>
    %903 = arith.addf %902, %901 : vector<2x32xf32>
    %904 = arith.divf %902, %903 : vector<2x32xf32>
    %905 = vector.extract_strided_slice %860 {offsets = [0, 64], sizes = [2, 32], strides = [1, 1]} : vector<2x96xf32> to vector<2x32xf32>
    %906 = vector.extract_strided_slice %862 {offsets = [0, 64], sizes = [2, 32], strides = [1, 1]} : vector<2x96xf32> to vector<2x32xf32>
    %907 = vector.broadcast %488 : vector<1x32xf32> to vector<2x32xf32>
    %908 = arith.addf %906, %907 : vector<2x32xf32>
    %909 = arith.mulf %896, %908 : vector<2x32xf32>
    %910 = arith.addf %905, %909 : vector<2x32xf32>
    %911 = math.tanh %910 : vector<2x32xf32>
    %912 = arith.subf %856, %911 : vector<2x32xf32>
    %913 = arith.mulf %904, %912 : vector<2x32xf32>
    %914 = arith.addf %911, %913 : vector<2x32xf32>
    %c12_253 = arith.constant 12 : index
    %c0_254 = arith.constant 0 : index
    %915 = vector.load %arg28[%c12_253, %c0_254] : memref<16x32xf32, #tpu.memory_space<vmem>>, vector<2x32xf32>
    tpu.vector_store %arg28[%c12_253, %c0_254], %888 {strides = array<i32>} : memref<16x32xf32, #tpu.memory_space<vmem>>, vector<2x32xf32>,
    %c2_255 = arith.constant 2 : index
    %c0_256 = arith.constant 0 : index
    %916 = vector.load %arg29[%c2_255, %c0_256] : memref<16x32xf32, #tpu.memory_space<vmem>>, vector<2x32xf32>
    tpu.vector_store %arg29[%c2_255, %c0_256], %914 {strides = array<i32>} : memref<16x32xf32, #tpu.memory_space<vmem>>, vector<2x32xf32>,
    %c14_257 = arith.constant 14 : index
    %c0_258 = arith.constant 0 : index
    %917 = vector.load %arg26[%c14_257, %c0_258] : memref<16x96xf32, #tpu.memory_space<vmem>>, vector<2x96xf32>
    %c0_259 = arith.constant 0 : index
    %c0_260 = arith.constant 0 : index
    %918 = vector.load %arg27[%c0_259, %c0_260] : memref<16x96xf32, #tpu.memory_space<vmem>>, vector<2x96xf32>
    %cst_261 = arith.constant dense<0.000000e+00> : vector<2x96xf32>
    %919 = tpu.matmul %888, %485, %cst_261 {dimension_numbers = #tpu.dot_dimension_numbers<[1], [0], [0], [1], [0, 0, 1, 1], [], []>} : vector<2x32xf32>, vector<32x96xf32>, vector<2x96xf32> -> vector<2x96xf32>
    %cst_262 = arith.constant dense<0.000000e+00> : vector<2x96xf32>
    %920 = tpu.matmul %914, %486, %cst_262 {dimension_numbers = #tpu.dot_dimension_numbers<[1], [0], [0], [1], [0, 0, 1, 1], [], []>} : vector<2x32xf32>, vector<32x96xf32>, vector<2x96xf32> -> vector<2x96xf32>
    %921 = vector.extract_strided_slice %917 {offsets = [0, 0], sizes = [2, 32], strides = [1, 1]} : vector<2x96xf32> to vector<2x32xf32>
    %922 = vector.extract_strided_slice %919 {offsets = [0, 0], sizes = [2, 32], strides = [1, 1]} : vector<2x96xf32> to vector<2x32xf32>
    %923 = arith.addf %921, %922 : vector<2x32xf32>
    %924 = arith.negf %923 : vector<2x32xf32>
    %925 = math.exp %924 : vector<2x32xf32>
    %cst_263 = arith.constant 1.000000e+00 : f32
    %926 = vector.broadcast %cst_263 : f32 to vector<2x32xf32>
    %927 = arith.addf %926, %925 : vector<2x32xf32>
    %928 = arith.divf %926, %927 : vector<2x32xf32>
    %929 = vector.extract_strided_slice %917 {offsets = [0, 32], sizes = [2, 32], strides = [1, 1]} : vector<2x96xf32> to vector<2x32xf32>
    %930 = vector.extract_strided_slice %919 {offsets = [0, 32], sizes = [2, 32], strides = [1, 1]} : vector<2x96xf32> to vector<2x32xf32>
    %931 = arith.addf %929, %930 : vector<2x32xf32>
    %932 = arith.negf %931 : vector<2x32xf32>
    %933 = math.exp %932 : vector<2x32xf32>
    %cst_264 = arith.constant 1.000000e+00 : f32
    %934 = vector.broadcast %cst_264 : f32 to vector<2x32xf32>
    %935 = arith.addf %934, %933 : vector<2x32xf32>
    %936 = arith.divf %934, %935 : vector<2x32xf32>
    %937 = vector.extract_strided_slice %917 {offsets = [0, 64], sizes = [2, 32], strides = [1, 1]} : vector<2x96xf32> to vector<2x32xf32>
    %938 = vector.extract_strided_slice %919 {offsets = [0, 64], sizes = [2, 32], strides = [1, 1]} : vector<2x96xf32> to vector<2x32xf32>
    %939 = vector.broadcast %487 : vector<1x32xf32> to vector<2x32xf32>
    %940 = arith.addf %938, %939 : vector<2x32xf32>
    %941 = arith.mulf %928, %940 : vector<2x32xf32>
    %942 = arith.addf %937, %941 : vector<2x32xf32>
    %943 = math.tanh %942 : vector<2x32xf32>
    %944 = arith.subf %888, %943 : vector<2x32xf32>
    %945 = arith.mulf %936, %944 : vector<2x32xf32>
    %946 = arith.addf %943, %945 : vector<2x32xf32>
    %947 = vector.extract_strided_slice %918 {offsets = [0, 0], sizes = [2, 32], strides = [1, 1]} : vector<2x96xf32> to vector<2x32xf32>
    %948 = vector.extract_strided_slice %920 {offsets = [0, 0], sizes = [2, 32], strides = [1, 1]} : vector<2x96xf32> to vector<2x32xf32>
    %949 = arith.addf %947, %948 : vector<2x32xf32>
    %950 = arith.negf %949 : vector<2x32xf32>
    %951 = math.exp %950 : vector<2x32xf32>
    %cst_265 = arith.constant 1.000000e+00 : f32
    %952 = vector.broadcast %cst_265 : f32 to vector<2x32xf32>
    %953 = arith.addf %952, %951 : vector<2x32xf32>
    %954 = arith.divf %952, %953 : vector<2x32xf32>
    %955 = vector.extract_strided_slice %918 {offsets = [0, 32], sizes = [2, 32], strides = [1, 1]} : vector<2x96xf32> to vector<2x32xf32>
    %956 = vector.extract_strided_slice %920 {offsets = [0, 32], sizes = [2, 32], strides = [1, 1]} : vector<2x96xf32> to vector<2x32xf32>
    %957 = arith.addf %955, %956 : vector<2x32xf32>
    %958 = arith.negf %957 : vector<2x32xf32>
    %959 = math.exp %958 : vector<2x32xf32>
    %cst_266 = arith.constant 1.000000e+00 : f32
    %960 = vector.broadcast %cst_266 : f32 to vector<2x32xf32>
    %961 = arith.addf %960, %959 : vector<2x32xf32>
    %962 = arith.divf %960, %961 : vector<2x32xf32>
    %963 = vector.extract_strided_slice %918 {offsets = [0, 64], sizes = [2, 32], strides = [1, 1]} : vector<2x96xf32> to vector<2x32xf32>
    %964 = vector.extract_strided_slice %920 {offsets = [0, 64], sizes = [2, 32], strides = [1, 1]} : vector<2x96xf32> to vector<2x32xf32>
    %965 = vector.broadcast %488 : vector<1x32xf32> to vector<2x32xf32>
    %966 = arith.addf %964, %965 : vector<2x32xf32>
    %967 = arith.mulf %954, %966 : vector<2x32xf32>
    %968 = arith.addf %963, %967 : vector<2x32xf32>
    %969 = math.tanh %968 : vector<2x32xf32>
    %970 = arith.subf %914, %969 : vector<2x32xf32>
    %971 = arith.mulf %962, %970 : vector<2x32xf32>
    %972 = arith.addf %969, %971 : vector<2x32xf32>
    %c14_267 = arith.constant 14 : index
    %c0_268 = arith.constant 0 : index
    %973 = vector.load %arg28[%c14_267, %c0_268] : memref<16x32xf32, #tpu.memory_space<vmem>>, vector<2x32xf32>
    tpu.vector_store %arg28[%c14_267, %c0_268], %946 {strides = array<i32>} : memref<16x32xf32, #tpu.memory_space<vmem>>, vector<2x32xf32>,
    %c0_269 = arith.constant 0 : index
    %c0_270 = arith.constant 0 : index
    %974 = vector.load %arg29[%c0_269, %c0_270] : memref<16x32xf32, #tpu.memory_space<vmem>>, vector<2x32xf32>
    tpu.vector_store %arg29[%c0_269, %c0_270], %972 {strides = array<i32>} : memref<16x32xf32, #tpu.memory_space<vmem>>, vector<2x32xf32>,
    %c0_271 = arith.constant 0 : index
    %c0_272 = arith.constant 0 : index
    %975 = vector.load %arg28[%c0_271, %c0_272] : memref<16x32xf32, #tpu.memory_space<vmem>>, vector<16x32xf32>
    %c0_273 = arith.constant 0 : index
    %c0_274 = arith.constant 0 : index
    %976 = vector.load %arg17[%c0_273, %c0_274] : memref<32x32xf32, #tpu.memory_space<vmem>>, vector<32x32xf32>
    %cst_275 = arith.constant dense<0.000000e+00> : vector<16x32xf32>
    %977 = tpu.matmul %975, %976, %cst_275 {dimension_numbers = #tpu.dot_dimension_numbers<[1], [0], [0], [1], [0, 0, 1, 1], [], []>} : vector<16x32xf32>, vector<32x32xf32>, vector<16x32xf32> -> vector<16x32xf32>
    %c0_276 = arith.constant 0 : index
    %c0_277 = arith.constant 0 : index
    %978 = vector.load %arg29[%c0_276, %c0_277] : memref<16x32xf32, #tpu.memory_space<vmem>>, vector<16x32xf32>
    %c0_278 = arith.constant 0 : index
    %c0_279 = arith.constant 0 : index
    %979 = vector.load %arg18[%c0_278, %c0_279] : memref<32x32xf32, #tpu.memory_space<vmem>>, vector<32x32xf32>
    %cst_280 = arith.constant dense<0.000000e+00> : vector<16x32xf32>
    %980 = tpu.matmul %978, %979, %cst_280 {dimension_numbers = #tpu.dot_dimension_numbers<[1], [0], [0], [1], [0, 0, 1, 1], [], []>} : vector<16x32xf32>, vector<32x32xf32>, vector<16x32xf32> -> vector<16x32xf32>
    %981 = arith.addf %977, %980 : vector<16x32xf32>
    %c0_281 = arith.constant 0 : index
    %c0_282 = arith.constant 0 : index
    %982 = vector.load %arg19[%c0_281, %c0_282] : memref<1x32xf32, #tpu.memory_space<vmem>>, vector<1x32xf32>
    %983 = vector.broadcast %982 : vector<1x32xf32> to vector<16x32xf32>
    %984 = arith.addf %981, %983 : vector<16x32xf32>
    %c0_283 = arith.constant 0 : index
    %c0_284 = arith.constant 0 : index
    %985 = vector.load %arg24[%c0_283, %c0_284] : memref<16x32xf32, #tpu.memory_space<vmem>>, vector<16x32xf32>
    tpu.vector_store %arg24[%c0_283, %c0_284], %984 {strides = array<i32>} : memref<16x32xf32, #tpu.memory_space<vmem>>, vector<16x32xf32>,
    %c0_285 = arith.constant 0 : index
    %c0_286 = arith.constant 0 : index
    %986 = vector.load %arg20[%c0_285, %c0_286] : memref<1x32xf32, #tpu.memory_space<vmem>>, vector<1x32xf32>
    %c0_287 = arith.constant 0 : index
    %c0_288 = arith.constant 0 : index
    %987 = vector.load %arg21[%c0_287, %c0_288] : memref<1x32xf32, #tpu.memory_space<vmem>>, vector<1x32xf32>
    %cst_289 = arith.constant 0.000000e+00 : f32
    %988 = vector.broadcast %cst_289 : f32 to vector<2x32xf32>
    %c0_290 = arith.constant 0 : index
    %989 = memref.load %arg23[%c0_290] : memref<2xf32, #tpu.memory_space<smem>>
    %990 = vector.broadcast %989 : f32 to vector<2x32xf32>
    %991 = arith.addf %988, %990 : vector<2x32xf32>
    %c0_291 = arith.constant 0 : index
    %c0_292 = arith.constant 0 : index
    %992 = memref.load %arg22[%c0_291, %c0_292] : memref<2x4xf32, #tpu.memory_space<smem>>
    %993 = vector.broadcast %992 : f32 to vector<2x32xf32>
    %994 = arith.mulf %993, %454 : vector<2x32xf32>
    %995 = arith.addf %991, %994 : vector<2x32xf32>
    %c0_293 = arith.constant 0 : index
    %c1 = arith.constant 1 : index
    %996 = memref.load %arg22[%c0_293, %c1] : memref<2x4xf32, #tpu.memory_space<smem>>
    %997 = vector.broadcast %996 : f32 to vector<2x32xf32>
    %998 = arith.mulf %997, %480 : vector<2x32xf32>
    %999 = arith.addf %995, %998 : vector<2x32xf32>
    %c0_294 = arith.constant 0 : index
    %c2_295 = arith.constant 2 : index
    %1000 = memref.load %arg22[%c0_294, %c2_295] : memref<2x4xf32, #tpu.memory_space<smem>>
    %1001 = vector.broadcast %1000 : f32 to vector<2x32xf32>
    %1002 = arith.mulf %1001, %946 : vector<2x32xf32>
    %1003 = arith.addf %999, %1002 : vector<2x32xf32>
    %c0_296 = arith.constant 0 : index
    %c3 = arith.constant 3 : index
    %1004 = memref.load %arg22[%c0_296, %c3] : memref<2x4xf32, #tpu.memory_space<smem>>
    %1005 = vector.broadcast %1004 : f32 to vector<2x32xf32>
    %1006 = arith.mulf %1005, %972 : vector<2x32xf32>
    %1007 = arith.addf %1003, %1006 : vector<2x32xf32>
    %cst_297 = arith.constant dense<0.000000e+00> : vector<2xf32>
    %1008 = vector.multi_reduction <add>, %1007, %cst_297 [1] : vector<2x32xf32> to vector<2xf32>
    %1009 = vector.shape_cast %1008 : vector<2xf32> to vector<2x1xf32>
    %cst_298 = arith.constant 3.200000e+01 : f32
    %1010 = vector.broadcast %cst_298 : f32 to vector<2x1xf32>
    %1011 = arith.divf %1009, %1010 : vector<2x1xf32>
    %1012 = vector.broadcast %1011 : vector<2x1xf32> to vector<2x32xf32>
    %1013 = arith.subf %1007, %1012 : vector<2x32xf32>
    %1014 = arith.mulf %1013, %1013 : vector<2x32xf32>
    %cst_299 = arith.constant dense<0.000000e+00> : vector<2xf32>
    %1015 = vector.multi_reduction <add>, %1014, %cst_299 [1] : vector<2x32xf32> to vector<2xf32>
    %1016 = vector.shape_cast %1015 : vector<2xf32> to vector<2x1xf32>
    %cst_300 = arith.constant 3.200000e+01 : f32
    %1017 = vector.broadcast %cst_300 : f32 to vector<2x1xf32>
    %1018 = arith.divf %1016, %1017 : vector<2x1xf32>
    %1019 = vector.broadcast %1011 : vector<2x1xf32> to vector<2x32xf32>
    %1020 = arith.subf %1007, %1019 : vector<2x32xf32>
    %cst_301 = arith.constant 9.99999974E-6 : f32
    %1021 = vector.broadcast %cst_301 : f32 to vector<2x1xf32>
    %1022 = arith.addf %1018, %1021 : vector<2x1xf32>
    %1023 = math.rsqrt %1022 : vector<2x1xf32>
    %1024 = vector.broadcast %1023 : vector<2x1xf32> to vector<2x32xf32>
    %1025 = arith.mulf %1020, %1024 : vector<2x32xf32>
    %1026 = vector.broadcast %986 : vector<1x32xf32> to vector<2x32xf32>
    %1027 = arith.mulf %1025, %1026 : vector<2x32xf32>
    %1028 = vector.broadcast %987 : vector<1x32xf32> to vector<2x32xf32>
    %1029 = arith.addf %1027, %1028 : vector<2x32xf32>
    %cst_302 = arith.constant 0.000000e+00 : f32
    %1030 = vector.broadcast %cst_302 : f32 to vector<2x32xf32>
    %1031 = arith.maximumf %1029, %1030 : vector<2x32xf32>
    %c0_303 = arith.constant 0 : index
    %c0_304 = arith.constant 0 : index
    %c0_305 = arith.constant 0 : index
    %1032 = vector.load %arg25[%c0_303, %c0_304, %c0_305] : memref<2x2x32xf32, #tpu.memory_space<vmem>>, vector<1x2x32xf32>
    %1033 = vector.shape_cast %1032 : vector<1x2x32xf32> to vector<2x32xf32>
    %1034 = vector.shape_cast %1031 : vector<2x32xf32> to vector<1x2x32xf32>
    tpu.vector_store %arg25[%c0_303, %c0_304, %c0_305], %1034 {strides = array<i32>} : memref<2x2x32xf32, #tpu.memory_space<vmem>>, vector<1x2x32xf32>,
    %cst_306 = arith.constant 0.000000e+00 : f32
    %1035 = vector.broadcast %cst_306 : f32 to vector<2x32xf32>
    %c1_307 = arith.constant 1 : index
    %1036 = memref.load %arg23[%c1_307] : memref<2xf32, #tpu.memory_space<smem>>
    %1037 = vector.broadcast %1036 : f32 to vector<2x32xf32>
    %1038 = arith.addf %1035, %1037 : vector<2x32xf32>
    %c1_308 = arith.constant 1 : index
    %c0_309 = arith.constant 0 : index
    %1039 = memref.load %arg22[%c1_308, %c0_309] : memref<2x4xf32, #tpu.memory_space<smem>>
    %1040 = vector.broadcast %1039 : f32 to vector<2x32xf32>
    %1041 = arith.mulf %1040, %454 : vector<2x32xf32>
    %1042 = arith.addf %1038, %1041 : vector<2x32xf32>
    %c1_310 = arith.constant 1 : index
    %c1_311 = arith.constant 1 : index
    %1043 = memref.load %arg22[%c1_310, %c1_311] : memref<2x4xf32, #tpu.memory_space<smem>>
    %1044 = vector.broadcast %1043 : f32 to vector<2x32xf32>
    %1045 = arith.mulf %1044, %480 : vector<2x32xf32>
    %1046 = arith.addf %1042, %1045 : vector<2x32xf32>
    %c1_312 = arith.constant 1 : index
    %c2_313 = arith.constant 2 : index
    %1047 = memref.load %arg22[%c1_312, %c2_313] : memref<2x4xf32, #tpu.memory_space<smem>>
    %1048 = vector.broadcast %1047 : f32 to vector<2x32xf32>
    %1049 = arith.mulf %1048, %946 : vector<2x32xf32>
    %1050 = arith.addf %1046, %1049 : vector<2x32xf32>
    %c1_314 = arith.constant 1 : index
    %c3_315 = arith.constant 3 : index
    %1051 = memref.load %arg22[%c1_314, %c3_315] : memref<2x4xf32, #tpu.memory_space<smem>>
    %1052 = vector.broadcast %1051 : f32 to vector<2x32xf32>
    %1053 = arith.mulf %1052, %972 : vector<2x32xf32>
    %1054 = arith.addf %1050, %1053 : vector<2x32xf32>
    %cst_316 = arith.constant dense<0.000000e+00> : vector<2xf32>
    %1055 = vector.multi_reduction <add>, %1054, %cst_316 [1] : vector<2x32xf32> to vector<2xf32>
    %1056 = vector.shape_cast %1055 : vector<2xf32> to vector<2x1xf32>
    %cst_317 = arith.constant 3.200000e+01 : f32
    %1057 = vector.broadcast %cst_317 : f32 to vector<2x1xf32>
    %1058 = arith.divf %1056, %1057 : vector<2x1xf32>
    %1059 = vector.broadcast %1058 : vector<2x1xf32> to vector<2x32xf32>
    %1060 = arith.subf %1054, %1059 : vector<2x32xf32>
    %1061 = arith.mulf %1060, %1060 : vector<2x32xf32>
    %cst_318 = arith.constant dense<0.000000e+00> : vector<2xf32>
    %1062 = vector.multi_reduction <add>, %1061, %cst_318 [1] : vector<2x32xf32> to vector<2xf32>
    %1063 = vector.shape_cast %1062 : vector<2xf32> to vector<2x1xf32>
    %cst_319 = arith.constant 3.200000e+01 : f32
    %1064 = vector.broadcast %cst_319 : f32 to vector<2x1xf32>
    %1065 = arith.divf %1063, %1064 : vector<2x1xf32>
    %1066 = vector.broadcast %1058 : vector<2x1xf32> to vector<2x32xf32>
    %1067 = arith.subf %1054, %1066 : vector<2x32xf32>
    %cst_320 = arith.constant 9.99999974E-6 : f32
    %1068 = vector.broadcast %cst_320 : f32 to vector<2x1xf32>
    %1069 = arith.addf %1065, %1068 : vector<2x1xf32>
    %1070 = math.rsqrt %1069 : vector<2x1xf32>
    %1071 = vector.broadcast %1070 : vector<2x1xf32> to vector<2x32xf32>
    %1072 = arith.mulf %1067, %1071 : vector<2x32xf32>
    %1073 = vector.broadcast %986 : vector<1x32xf32> to vector<2x32xf32>
    %1074 = arith.mulf %1072, %1073 : vector<2x32xf32>
    %1075 = vector.broadcast %987 : vector<1x32xf32> to vector<2x32xf32>
    %1076 = arith.addf %1074, %1075 : vector<2x32xf32>
    %cst_321 = arith.constant 0.000000e+00 : f32
    %1077 = vector.broadcast %cst_321 : f32 to vector<2x32xf32>
    %1078 = arith.maximumf %1076, %1077 : vector<2x32xf32>
    %c1_322 = arith.constant 1 : index
    %c0_323 = arith.constant 0 : index
    %c0_324 = arith.constant 0 : index
    %1079 = vector.load %arg25[%c1_322, %c0_323, %c0_324] : memref<2x2x32xf32, #tpu.memory_space<vmem>>, vector<1x2x32xf32>
    %1080 = vector.shape_cast %1079 : vector<1x2x32xf32> to vector<2x32xf32>
    %1081 = vector.shape_cast %1078 : vector<2x32xf32> to vector<1x2x32xf32>
    tpu.vector_store %arg25[%c1_322, %c0_323, %c0_324], %1081 {strides = array<i32>} : memref<2x2x32xf32, #tpu.memory_space<vmem>>, vector<1x2x32xf32>,
    return
  }
}

</mosaic_0001>

<bundles_post_ra>
// kernel: rnn_encoder_forward.1
= control target key start
LH: loop header
LB: loop body
LE: loop exit
PB: predicated region body
PF: predicated region fallthrough
CT: control target
= control target key end

     0   :  { %s7164_s0 = inlined_call_operand.vmem [shape: f32[16,32], index: 0, kind: input, shape index: {}]   ;;  %s7165_s1 = inlined_call_operand.vmem [shape: f32[32,96], index: 1, kind: input, shape index: {}]   ;;  %s7166_s2 = inlined_call_operand.vmem [shape: f32[32,96], index: 2, kind: input, shape index: {}]   ;;  %s7167_s3 = inlined_call_operand.hbm [shape: f32[1,96], index: 3, kind: input, shape index: {}]   ;;  %s7168_s4 = inlined_call_operand.hbm [shape: f32[1,96], index: 4, kind: input, shape index: {}]   ;;  %s7169_s5 = inlined_call_operand.vmem [shape: f32[32,96], index: 5, kind: input, shape index: {}]   ;;  %s7170_s6 = inlined_call_operand.vmem [shape: f32[32,96], index: 6, kind: input, shape index: {}]   ;;  %s7171_s7 = inlined_call_operand.hbm [shape: f32[1,32], index: 7, kind: input, shape index: {}]   ;;  %s7172_s8 = inlined_call_operand.hbm [shape: f32[1,32], index: 8, kind: input, shape index: {}]   ;;  %s7173_s9 = inlined_call_operand.vmem [shape: f32[64,96], index: 9, kind: input, shape index: {}]   ;;  %s7174_s10 = inlined_call_operand.vmem [shape: f32[64,96], index: 10, kind: input, shape index: {}]   ;;  %s7175_s11 = inlined_call_operand.hbm [shape: f32[1,96], index: 11, kind: input, shape index: {}]   ;;  %s7176_s12 = inlined_call_operand.hbm [shape: f32[1,96], index: 12, kind: input, shape index: {}]   ;;  %s7177_s13 = inlined_call_operand.vmem [shape: f32[32,96], index: 13, kind: input, shape index: {}]   ;;  %s7178_s14 = inlined_call_operand.hbm [shape: f32[32,96], index: 14, kind: input, shape index: {}]   ;;  %s7179_s15 = inlined_call_operand.hbm [shape: f32[1,32], index: 15, kind: input, shape index: {}]   ;;  %s7180_s16 = inlined_call_operand.hbm [shape: f32[1,32], index: 16, kind: input, shape index: {}]   ;;  %s7181_s17 = inlined_call_operand.vmem [shape: f32[32,32], index: 17, kind: input, shape index: {}]   ;;  %s7182_s18 = inlined_call_operand.vmem [shape: f32[32,32], index: 18, kind: input, shape index: {}]   ;;  %s7183_s19 = inlined_call_operand.hbm [shape: f32[1,32], index: 19, kind: input, shape index: {}]   ;;  %s7184_s20 = inlined_call_operand.hbm [shape: f32[1,32], index: 20, kind: input, shape index: {}]   ;;  %s7185_s21 = inlined_call_operand.hbm [shape: f32[1,32], index: 21, kind: input, shape index: {}]   ;;  %s7186_s22 = inlined_call_operand.vmem [shape: f32[2,4], index: 22, kind: input, shape index: {}]   ;;  %s7187_s23 = inlined_call_operand.hbm [shape: f32[2], index: 23, kind: input, shape index: {}]   ;;  %s7188_s24 = inlined_call_operand.vmem [shape: f32[16,32], index: 24, kind: output, shape index: {0}]   ;;  %s7189_s25 = inlined_call_operand.hbm [shape: f32[2,2,32], index: 25, kind: output, shape index: {1}]  }
   0x1   :  { %7200 = sst [smem:[#allocation41_spill]] %s7164_s0 }
   0x2   :  { %7201 = sst [smem:[#allocation42_spill]] %s7165_s1 }
   0x3   :  { %7202 = sst [smem:[#allocation43_spill]] %s7166_s2 }
   0x4   :  { %7203 = sst [smem:[#allocation44_spill]] %s7167_s3 }
   0x5   :  { %7204 = sst [smem:[#allocation45_spill]] %s7168_s4 }
   0x6   :  { %7205 = sst [smem:[#allocation46_spill]] %s7169_s5 }
   0x7   :  { %7206 = sst [smem:[#allocation47_spill]] %s7170_s6 }
   0x8   :  { %7207 = sst [smem:[#allocation48_spill]] %s7171_s7 }
   0x9   :  { %7208 = sst [smem:[#allocation49_spill]] %s7172_s8 }
   0xa   :  { %7209 = sst [smem:[#allocation50_spill]] %s7173_s9 }
   0xb   :  { %31 = vsyncpa [#allocation7], 0 }
   0xc   :  { %32 = vsyncpa [#allocation12], 0 }
   0xd   :  { %33 = vsyncpa [#allocation15], 0 }
   0xe   :  { %34 = vsyncpa [#allocation18], 0 }
   0xf   :  { %35 = vsyncpa [#allocation21], 0 }
  0x10   :  { %36 = vsyncpa [#allocation24], 0 }
  0x11   :  { %37 = vsyncpa [#allocation27], 0 }
  0x12   :  { %38 = vsyncpa [#allocation10], 0 }
  0x13   :  { %39 = vsyncpa [#allocation9], 0 }
  0x14   :  { %40 = vsyncpa [#allocation8], 0  ;;  %s6171_s29 = smov [#allocation11]   ;;  %s6172_s6 = smov [#allocation14]  }
  0x15   :  { %s63_s2 = sshll.u32 %s6171_s29, 4  ;;  %s87_s30 = sshll.u32 %s6172_s6, 4  ;;  %s64_s2 = int_to_ptr.vmem [resolvable:$true] %s63_s2  ;;  %s88_s30 = int_to_ptr.vmem [resolvable:$true] %s87_s30 }
  0x16   :  { %s7210_s26 = sld [smem:[#allocation45_spill]] }
  0x1c   :  { %s5843_s1 = scalar_lea.hbm %s7210_s26, 16 }
  0x1d   :  { %p5844_p0 = scmp.ne.s32.totalorder %s7210_s26, %s5843_s1  ;;  %p5847_p1 = scmp.lt.u32.totalorder %s5843_s1, %s7210_s26 }
  0x1f   :  { %p5849_p2 = pnand %p5847_p1, %p5844_p0 }
  0x21   :  { %5852 = shalt.err (!%p5849_p2)
}
  0x22   :  { %s5853_s9 = scalar_lea.vmem %s64_s2, 16  ;;  %s5857_s5 = scalar_lea.vmem %s64_s2, 32 }
  0x23   :  { %p5854_p3 = scmp.ne.s32.totalorder %s64_s2, %s5853_s9  ;;  %p5858_p4 = scmp.lt.s32.totalorder %s64_s2, %s64_s2 }
  0x24   :  { %p5859_p5 = scmp.lt.s32.totalorder %s5857_s5, %s5853_s9 }
  0x26   :  { %p5860_p6 = por %p5859_p5, %p5858_p4 }
  0x28   :  { %p5861_p7 = pnand %p5860_p6, %p5854_p3 }
  0x2a   :  { %5864 = shalt.err (!%p5861_p7)
}
  0x2b   :  { %66 = dma.hbm_to_vmem [thread:$0]  %s7210_s26, 16, %s64_s2, [#allocation12]  }
  0x2c   :  { %s7211_s3 = sld [smem:[#allocation49_spill]] }
  0x32   :  { %s5865_s8 = scalar_lea.hbm %s7211_s3, 16 }
  0x33   :  { %p5866_p8 = scmp.ne.s32.totalorder %s7211_s3, %s5865_s8  ;;  %p5869_p9 = scmp.lt.u32.totalorder %s5865_s8, %s7211_s3 }
  0x35   :  { %p5871_p10 = pnand %p5869_p9, %p5866_p8 }
  0x37   :  { %5874 = shalt.err (!%p5871_p10)
}
  0x38   :  { %s5875_s9 = scalar_lea.vmem %s88_s30, 16  ;;  %s5879_s5 = scalar_lea.vmem %s88_s30, 32 }
  0x39   :  { %p5876_p11 = scmp.ne.s32.totalorder %s88_s30, %s5875_s9  ;;  %p5880_p12 = scmp.lt.s32.totalorder %s88_s30, %s88_s30 }
  0x3a   :  { %p5881_p13 = scmp.lt.s32.totalorder %s5879_s5, %s5875_s9 }
  0x3c   :  { %p5882_p0 = por %p5881_p13, %p5880_p12 }
  0x3e   :  { %p5883_p1 = pnand %p5882_p0, %p5876_p11 }
  0x40   :  { %5886 = shalt.err (!%p5883_p1)
}
  0x41   :  { %90 = dma.hbm_to_vmem [thread:$0]  %s7211_s3, 16, %s88_s30, [#allocation15]  }
  0x42   :  { %s6173_s0 = smov [#allocation17]   ;;  %s6174_s6 = smov [#allocation20]  }
  0x43   :  { %s111_s29 = sshll.u32 %s6173_s0, 4  ;;  %s135_s7 = sshll.u32 %s6174_s6, 4  ;;  %s112_s29 = int_to_ptr.vmem [resolvable:$true] %s111_s29  ;;  %s136_s7 = int_to_ptr.vmem [resolvable:$true] %s135_s7 }
  0x44   :  { %s5887_s1 = scalar_lea.hbm %s7176_s12, 16 }
  0x45   :  { %p5888_p2 = scmp.ne.s32.totalorder %s7176_s12, %s5887_s1  ;;  %p5891_p3 = scmp.lt.u32.totalorder %s5887_s1, %s7176_s12 }
  0x47   :  { %p5893_p4 = pnand %p5891_p3, %p5888_p2 }
  0x49   :  { %5896 = shalt.err (!%p5893_p4)
}
  0x4a   :  { %s5897_s30 = scalar_lea.vmem %s112_s29, 16  ;;  %s5901_s3 = scalar_lea.vmem %s112_s29, 32 }
  0x4b   :  { %p5898_p5 = scmp.ne.s32.totalorder %s112_s29, %s5897_s30  ;;  %p5902_p6 = scmp.lt.s32.totalorder %s112_s29, %s112_s29 }
  0x4c   :  { %p5903_p7 = scmp.lt.s32.totalorder %s5901_s3, %s5897_s30 }
  0x4e   :  { %p5904_p8 = por %p5903_p7, %p5902_p6 }
  0x50   :  { %p5905_p9 = pnand %p5904_p8, %p5898_p5 }
  0x52   :  { %5908 = shalt.err (!%p5905_p9)
}
  0x53   :  { %114 = dma.hbm_to_vmem [thread:$0]  %s7176_s12, 16, %s112_s29, [#allocation18]  }
  0x54   :  { %s5909_s8 = scalar_lea.hbm %s7179_s15, 16 }
  0x55   :  { %p5910_p10 = scmp.ne.s32.totalorder %s7179_s15, %s5909_s8  ;;  %p5913_p11 = scmp.lt.u32.totalorder %s5909_s8, %s7179_s15 }
  0x57   :  { %p5915_p12 = pnand %p5913_p11, %p5910_p10 }
  0x59   :  { %5918 = shalt.err (!%p5915_p12)
}
  0x5a   :  { %s5919_s9 = scalar_lea.vmem %s136_s7, 16  ;;  %s5923_s5 = scalar_lea.vmem %s136_s7, 32 }
  0x5b   :  { %p5920_p13 = scmp.ne.s32.totalorder %s136_s7, %s5919_s9  ;;  %p5924_p0 = scmp.lt.s32.totalorder %s136_s7, %s136_s7 }
  0x5c   :  { %p5925_p1 = scmp.lt.s32.totalorder %s5923_s5, %s5919_s9 }
  0x5e   :  { %p5926_p2 = por %p5925_p1, %p5924_p0 }
  0x60   :  { %p5927_p3 = pnand %p5926_p2, %p5920_p13 }
  0x62   :  { %5930 = shalt.err (!%p5927_p3)
}
  0x63   :  { %138 = dma.hbm_to_vmem [thread:$0]  %s7179_s15, 16, %s136_s7, [#allocation21]  }
  0x64   :  { %s6175_s30 = smov [#allocation23]   ;;  %s6176_s2 = smov [#allocation6]  }
  0x65   :  { %s159_s3 = sshll.u32 %s6175_s30, 4  ;;  %s53_s26 = sshll.u32 %s6176_s2, 4  ;;  %s160_s3 = int_to_ptr.vmem [resolvable:$true] %s159_s3  ;;  %s54_s26 = int_to_ptr.vmem [resolvable:$true] %s53_s26 }
  0x66   :  { %s5931_s8 = scalar_lea.hbm %s7183_s19, 16 }
  0x67   :  { %p5932_p4 = scmp.ne.s32.totalorder %s7183_s19, %s5931_s8  ;;  %p5935_p5 = scmp.lt.u32.totalorder %s5931_s8, %s7183_s19 }
  0x69   :  { %p5937_p6 = pnand %p5935_p5, %p5932_p4 }
  0x6b   :  { %5940 = shalt.err (!%p5937_p6)
}
  0x6c   :  { %s5941_s15 = scalar_lea.vmem %s160_s3, 16  ;;  %s5945_s7 = scalar_lea.vmem %s160_s3, 32 }
  0x6d   :  { %p5942_p7 = scmp.ne.s32.totalorder %s160_s3, %s5941_s15  ;;  %p5946_p8 = scmp.lt.s32.totalorder %s160_s3, %s160_s3 }
  0x6e   :  { %p5947_p9 = scmp.lt.s32.totalorder %s5945_s7, %s5941_s15 }
  0x70   :  { %p5948_p10 = por %p5947_p9, %p5946_p8 }
  0x72   :  { %p5949_p11 = pnand %p5948_p10, %p5942_p7 }
  0x74   :  { %5952 = shalt.err (!%p5949_p11)
}
  0x75   :  { %162 = dma.hbm_to_vmem [thread:$0]  %s7183_s19, 16, %s160_s3, [#allocation24]  }
  0x76   :  { %s7212_s30 = sld [smem:[#allocation44_spill]] }
  0x7c   :  { %s5953_s2 = scalar_lea.hbm %s7212_s30, 16 }
  0x7d   :  { %p5954_p12 = scmp.ne.s32.totalorder %s7212_s30, %s5953_s2  ;;  %p5957_p13 = scmp.lt.u32.totalorder %s5953_s2, %s7212_s30 }
  0x7f   :  { %p5959_p0 = pnand %p5957_p13, %p5954_p12 }
  0x81   :  { %5962 = shalt.err (!%p5959_p0)
}
  0x82   :  { %s5963_s1 = scalar_lea.vmem %s54_s26, 16  ;;  %s5967_s4 = scalar_lea.vmem %s54_s26, 32 }
  0x83   :  { %p5964_p1 = scmp.ne.s32.totalorder %s54_s26, %s5963_s1  ;;  %p5968_p2 = scmp.lt.s32.totalorder %s54_s26, %s54_s26 }
  0x84   :  { %p5969_p3 = scmp.lt.s32.totalorder %s5967_s4, %s5963_s1 }
  0x86   :  { %p5970_p4 = por %p5969_p3, %p5968_p2 }
  0x88   :  { %p5971_p5 = pnand %p5970_p4, %p5964_p1 }
  0x8a   :  { %5974 = shalt.err (!%p5971_p5)
}
  0x8b   :  { %56 = dma.hbm_to_vmem [thread:$0]  %s7212_s30, 16, %s54_s26, [#allocation7]  }
  0x8c   :  { %s6177_s28 = smov [#allocation13]   ;;  %s6178_s7 = smov [#allocation16]  }
  0x8d   :  { %s77_s15 = sshll.u32 %s6177_s28, 4  ;;  %s101_s9 = sshll.u32 %s6178_s7, 4  ;;  %s78_s15 = int_to_ptr.vmem [resolvable:$true] %s77_s15  ;;  %s102_s9 = int_to_ptr.vmem [resolvable:$true] %s101_s9 }
  0x8e   :  { %s7213_s29 = sld [smem:[#allocation48_spill]] }
  0x94   :  { %s5975_s2 = scalar_lea.hbm %s7213_s29, 16 }
  0x95   :  { %p5976_p6 = scmp.ne.s32.totalorder %s7213_s29, %s5975_s2  ;;  %p5979_p7 = scmp.lt.u32.totalorder %s5975_s2, %s7213_s29 }
  0x97   :  { %p5981_p8 = pnand %p5979_p7, %p5976_p6 }
  0x99   :  { %5984 = shalt.err (!%p5981_p8)
}
  0x9a   :  { %s5985_s26 = scalar_lea.vmem %s78_s15, 16  ;;  %s5989_s30 = scalar_lea.vmem %s78_s15, 32 }
  0x9b   :  { %p5986_p9 = scmp.ne.s32.totalorder %s78_s15, %s5985_s26  ;;  %p5990_p10 = scmp.lt.s32.totalorder %s78_s15, %s78_s15 }
  0x9c   :  { %p5991_p11 = scmp.lt.s32.totalorder %s5989_s30, %s5985_s26 }
  0x9e   :  { %p5992_p12 = por %p5991_p11, %p5990_p10 }
  0xa0   :  { %p5993_p13 = pnand %p5992_p12, %p5986_p9 }
  0xa2   :  { %5996 = shalt.err (!%p5993_p13)
}
  0xa3   :  { %80 = dma.hbm_to_vmem [thread:$0]  %s7213_s29, 16, %s78_s15, [#allocation12]  }
  0xa4   :  { %s5997_s28 = scalar_lea.hbm %s7175_s11, 16 }
  0xa5   :  { %p5998_p0 = scmp.ne.s32.totalorder %s7175_s11, %s5997_s28  ;;  %p6001_p1 = scmp.lt.u32.totalorder %s5997_s28, %s7175_s11 }
  0xa7   :  { %p6003_p2 = pnand %p6001_p1, %p5998_p0 }
  0xa9   :  { %6006 = shalt.err (!%p6003_p2)
}
  0xaa   :  { %s6007_s0 = scalar_lea.vmem %s102_s9, 16  ;;  %s6011_s6 = scalar_lea.vmem %s102_s9, 32 }
  0xab   :  { %p6008_p3 = scmp.ne.s32.totalorder %s102_s9, %s6007_s0  ;;  %p6012_p4 = scmp.lt.s32.totalorder %s102_s9, %s102_s9 }
  0xac   :  { %p6013_p5 = scmp.lt.s32.totalorder %s6011_s6, %s6007_s0 }
  0xae   :  { %p6014_p6 = por %p6013_p5, %p6012_p4 }
  0xb0   :  { %p6015_p7 = pnand %p6014_p6, %p6008_p3 }
  0xb2   :  { %6018 = shalt.err (!%p6015_p7)
}
  0xb3   :  { %104 = dma.hbm_to_vmem [thread:$0]  %s7175_s11, 16, %s102_s9, [#allocation15]  }
  0xb4   :  { %s6179_s8 = smov [#allocation19]   ;;  %s6019_s1 = scalar_lea.hbm %s7178_s14, 512 }
  0xb5   :  { %s122_s27 = sshll.u32 %s6179_s8, 4  ;;  %p6020_p8 = scmp.ne.s32.totalorder %s7178_s14, %s6019_s1  ;;  %s123_s27 = int_to_ptr.vmem [resolvable:$true] %s122_s27 }
  0xb6   :  { %p6023_p9 = scmp.lt.u32.totalorder %s6019_s1, %s7178_s14 }
  0xb8   :  { %p6025_p10 = pnand %p6023_p9, %p6020_p8 }
  0xba   :  { %6028 = shalt.err (!%p6025_p10)
}
  0xbb   :  { %s6029_s7 = scalar_lea.vmem %s123_s27, 512  ;;  %p6034_p12 = scmp.lt.s32.totalorder %s123_s27, %s123_s27 }
  0xbc   :  { %p6030_p11 = scmp.ne.s32.totalorder %s123_s27, %s6029_s7  ;;  %p6035_p13 = scmp.lt.s32.totalorder %s6029_s7, %s6029_s7 }
  0xbe   :  { %p6036_p0 = por %p6035_p13, %p6034_p12 }
  0xc0   :  { %p6037_p1 = pnand %p6036_p0, %p6030_p11 }
  0xc2   :  { %6040 = shalt.err (!%p6037_p1)
}
  0xc3   :  { %s6180_s11 = smov 128   ;;  %s6181_s9 = smov 8  }
  0xc4   :  { %128 = dma.hbm_to_vmem [thread:$0]  %s7178_s14, 512, %s123_s27, [#allocation18], %s6180_s11, %s6180_s11, %s6181_s9  }
  0xc5   :  { %s6182_s2 = smov [#allocation22]   ;;  %s6183_s6 = smov [#allocation25]  }
  0xc6   :  { %s145_s0 = sshll.u32 %s6182_s2, 4  ;;  %s169_s15 = sshll.u32 %s6183_s6, 4  ;;  %s146_s0 = int_to_ptr.vmem [resolvable:$true] %s145_s0  ;;  %s170_s15 = int_to_ptr.vmem [resolvable:$true] %s169_s15 }
  0xc7   :  { %s6041_s26 = scalar_lea.hbm %s7180_s16, 16 }
  0xc8   :  { %p6042_p2 = scmp.ne.s32.totalorder %s7180_s16, %s6041_s26  ;;  %p6045_p3 = scmp.lt.u32.totalorder %s6041_s26, %s7180_s16 }
  0xca   :  { %p6047_p4 = pnand %p6045_p3, %p6042_p2 }
  0xcc   :  { %6050 = shalt.err (!%p6047_p4)
}
  0xcd   :  { %s6051_s14 = scalar_lea.vmem %s146_s0, 16  ;;  %s6055_s27 = scalar_lea.vmem %s146_s0, 32 }
  0xce   :  { %p6052_p5 = scmp.ne.s32.totalorder %s146_s0, %s6051_s14  ;;  %p6056_p6 = scmp.lt.s32.totalorder %s146_s0, %s146_s0 }
  0xcf   :  { %p6057_p7 = scmp.lt.s32.totalorder %s6055_s27, %s6051_s14 }
  0xd1   :  { %p6058_p8 = por %p6057_p7, %p6056_p6 }
  0xd3   :  { %p6059_p9 = pnand %p6058_p8, %p6052_p5 }
  0xd5   :  { %6062 = shalt.err (!%p6059_p9)
}
  0xd6   :  { %148 = dma.hbm_to_vmem [thread:$0]  %s7180_s16, 16, %s146_s0, [#allocation21]  }
  0xd7   :  { %s6063_s9 = scalar_lea.hbm %s7184_s20, 16 }
  0xd8   :  { %p6064_p10 = scmp.ne.s32.totalorder %s7184_s20, %s6063_s9  ;;  %p6067_p11 = scmp.lt.u32.totalorder %s6063_s9, %s7184_s20 }
  0xda   :  { %p6069_p12 = pnand %p6067_p11, %p6064_p10 }
  0xdc   :  { %6072 = shalt.err (!%p6069_p12)
}
  0xdd   :  { %s6073_s29 = scalar_lea.vmem %s170_s15, 16  ;;  %s6077_s8 = scalar_lea.vmem %s170_s15, 32 }
  0xde   :  { %p6074_p13 = scmp.ne.s32.totalorder %s170_s15, %s6073_s29  ;;  %p6078_p0 = scmp.lt.s32.totalorder %s170_s15, %s170_s15 }
  0xdf   :  { %p6079_p1 = scmp.lt.s32.totalorder %s6077_s8, %s6073_s29 }
  0xe1   :  { %p6080_p2 = por %p6079_p1, %p6078_p0 }
  0xe3   :  { %p6081_p3 = pnand %p6080_p2, %p6074_p13 }
  0xe5   :  { %6084 = shalt.err (!%p6081_p3)
}
  0xe6   :  { %172 = dma.hbm_to_vmem [thread:$0]  %s7184_s20, 16, %s170_s15, [#allocation24]  }
  0xe7   :  { %s6184_s26 = smov [#allocation26]   ;;  %s189_s19 = sshll.u32 %s7186_s22, 4  ;;  %s190_s19 = int_to_ptr.vmem [resolvable:$true] %s189_s19 }
  0xe8   :  { %s179_s30 = sshll.u32 %s6184_s26, 4  ;;  %s6085_s3 = scalar_lea.hbm %s7185_s21, 16  ;;  %s180_s30 = int_to_ptr.vmem [resolvable:$true] %s179_s30 }
  0xe9   :  { %p6086_p4 = scmp.ne.s32.totalorder %s7185_s21, %s6085_s3  ;;  %p6089_p5 = scmp.lt.u32.totalorder %s6085_s3, %s7185_s21 }
  0xeb   :  { %p6091_p6 = pnand %p6089_p5, %p6086_p4 }
  0xed   :  { %6094 = shalt.err (!%p6091_p6)
}
  0xee   :  { %s6095_s20 = scalar_lea.vmem %s180_s30, 16  ;;  %s6099_s15 = scalar_lea.vmem %s180_s30, 32 }
  0xef   :  { %p6096_p7 = scmp.ne.s32.totalorder %s180_s30, %s6095_s20  ;;  %p6100_p8 = scmp.lt.s32.totalorder %s180_s30, %s180_s30 }
  0xf0   :  { %p6101_p9 = scmp.lt.s32.totalorder %s6099_s15, %s6095_s20 }
  0xf2   :  { %p6102_p10 = por %p6101_p9, %p6100_p8 }
  0xf4   :  { %p6103_p11 = pnand %p6102_p10, %p6096_p7 }
  0xf6   :  { %6106 = shalt.err (!%p6103_p11)
}
  0xf7   :  { %182 = dma.hbm_to_vmem [thread:$0]  %s7185_s21, 16, %s180_s30, [#allocation27]  }
  0xf8   :  { %s6107_s12 = scalar_lea.vmem %s190_s19, 32  ;;  %p6112_p13 = scmp.lt.s32.totalorder %s190_s19, %s190_s19 }
  0xf9   :  { %p6108_p12 = scmp.ne.s32.totalorder %s190_s19, %s6107_s12  ;;  %p6113_p0 = scmp.lt.s32.totalorder %s6107_s12, %s6107_s12 }
  0xfb   :  { %p6114_p1 = por %p6113_p0, %p6112_p13 }
  0xfd   :  { %p6115_p2 = pnand %p6114_p1, %p6108_p12 }
  0xff   :  { %6118 = shalt.err (!%p6115_p2)
}
 0x100   :  { %s6185_s2 = smov [#allocation28]   ;;  %s6119_s8 = scalar_lea.hbm %s7187_s23, 16 }
 0x101   :  { %192 = dma.vmem_to_smem %s190_s19, 32, %s6185_s2, [#allocation10]  }
 0x102   :  { %p6120_p3 = scmp.ne.s32.totalorder %s7187_s23, %s6119_s8  ;;  %p6123_p4 = scmp.lt.u32.totalorder %s6119_s8, %s7187_s23 }
 0x104   :  { %p6125_p5 = pnand %p6123_p4, %p6120_p3 }
 0x106   :  { %6128 = shalt.err (!%p6125_p5)
}
 0x107   :  { %s6186_s21 = smov [#allocation29]  }
 0x108   :  { %200 = dma.hbm_to_smem %s7187_s23, 16, %s6186_s21, [#allocation9]  }
 0x109   :  { %6151 = dma.done.wait [#allocation7], 16  }
 0x10a   :  { %6152 = vsyncadd [#allocation7], 4294967280 }
 0x10b   :  { %6153 = dma.done.wait [#allocation12], 32  }
 0x10c   :  { %6154 = vsyncadd [#allocation12], 4294967264 }
 0x10d   :  { %6155 = dma.done.wait [#allocation15], 32  }
 0x10e   :  { %6156 = vsyncadd [#allocation15], 4294967264 }
 0x10f   :  { %6157 = dma.done.wait [#allocation18], 528  }
 0x110   :  { %6158 = vsyncadd [#allocation18], 4294966768 }
 0x111   :  { %6159 = dma.done.wait [#allocation21], 32  }
 0x112   :  { %6160 = vsyncadd [#allocation21], 4294967264 }
 0x113   :  { %6161 = dma.done.wait [#allocation24], 32  }
 0x114   :  { %6162 = vsyncadd [#allocation24], 4294967264 }
 0x115   :  { %6163 = dma.done.wait [#allocation27], 16  }
 0x116   :  { %6164 = vsyncadd [#allocation27], 4294967280 }
 0x117   :  { %6165 = dma.done.wait [#allocation10], 32  }
 0x118   :  { %6166 = vsyncadd [#allocation10], 4294967264 }
 0x119   :  { %6167 = dma.done.wait [#allocation9], 16  }
 0x11a   :  { %6168 = vsyncadd [#allocation9], 4294967280 }
 0x11b   :  { %243 = sfence }
 0x11c   :  { %s7214_s14 = sld [smem:[#allocation42_spill]]  ;;  %vm268_vm0 = vcmask 261120   ;;  %s7215_s22 = sld [smem:[#allocation41_spill]]  ;;  %v6187_v6 = vmov 0.0|0.0   ;;  %vm6188_vm1 = vmmov 0   ;;  %v6189_v10 = vmov 0.0  }
 0x11d   :  { %5377 = vmatprep.subr.bf16.mxu0 %v6187_v6  ;;  %s7216_s2 = sld [smem:[#allocation43_spill]]  ;;  %4951 = vmatprep.mubr.msk.f32.mxu0 %vm6188_vm1, %v6189_v10  ;;  %s7217_s0 = sld [smem:[#allocation46_spill]]  ;;  %v4627_v20 = vld [vmem:[#allocation14] ss:$0 sm:$0xff]  ;;  %v4625_v22 = vld [vmem:[#allocation13] ss:$0 sm:$0xff] }
 0x11e   :  { %s6190_s28 = smov 64   ;;  %s7218_s15 = sld [smem:[#allocation47_spill]]  ;;  %v4618_v30 = vld [vmem:[#allocation6] ss:$0 sm:$0xff]  ;;  %vm350_vm2 = vcmask 785408   ;;  %vm665_vm3 = vcmask 254976  }
 0x11f   :  { %635 = vrot.lane.b32.xlu0 %v4627_v20, %s6190_s28  ;;  %v4621_v37 = vld [vmem:[#allocation11] ss:$0 sm:$0xff]  ;;  %s6191_s8 = smov 96   ;;  %s6192_s16 = smov 32  }
 0x120   :  { %s7219_s1 = sld [smem:[#allocation50_spill]]  ;;  %s4478_s12 = sld [smem:[#allocation28]] }
 0x121   :  { %s4703_s30 = sld [smem:[#allocation28 + $0x1]]  ;;  %s4711_s21 = sld [smem:[#allocation28 + $0x82]] }
 0x122   :  { %v258_v0 = vld [vmem:[%s7214_s14] sm:$0xff]  ;;  %v259_v1 = vld [vmem:[%s7214_s14 + $0x8] sm:$0xff]  ;;  %v260_v2 = vld [vmem:[%s7214_s14 + $0x10] sm:$0xff]  ;;  %s4710_s4 = sld [smem:[#allocation28 + $0x81]] }
 0x123   :  { %v5361_v3 = vpack.c.bf16 %v259_v1, %v258_v0  ;;  %v261_v4 = vld [vmem:[%s7214_s14 + $0x18] sm:$0xff]  ;;  %v256_v5 = vld [vmem:[%s7215_s22] sm:$0xff]  ;;  %v354_v9 = vld [vmem:[%s7216_s2 + $0x8] sm:$0xff]  ;;  %597 = vrot.lane.b32.xlu0 %v4625_v22, %s6190_s28  ;;  %s4475_s14 = sld [smem:[#allocation29]]  ;;  %s4708_s27 = sld [smem:[#allocation29 + $0x1]] }
 0x124   :  { %v5365_v7 = vpack.c.bf16 %v261_v4, %v260_v2  ;;  %4929 = vmatprep.mubr.msk.f32.mxu1 %vm268_vm0, %v256_v5  ;;  %v353_v8 = vld [vmem:[%s7216_s2] sm:$0xff]  ;;  %v247_v12 = vld [vmem:[%s7217_s0 + $0x8] sm:$0xff]  ;;  %v248_v14 = vld [vmem:[%s7217_s0 + $0x10] sm:$0xff] }
 0x125   :  { %5362 = vmatprep.subr.bf16.mxu1 %v5361_v3  ;;  %v246_v11 = vld [vmem:[%s7217_s0] sm:$0xff]  ;;  %v249_v15 = vld [vmem:[%s7217_s0 + $0x18] sm:$0xff]  ;;  %v5369_v16 = vpack.c.bf16 %v354_v9, %v353_v8  ;;  %v355_v17 = vld [vmem:[%s7216_s2 + $0x10] sm:$0xff] }
 0x126   :  { %5364 = vmatpush3.bf16.msra.mxu1 %v5361_v3  ;;  %v6515_v13 = vpack.c.bf16 %v247_v12, %v246_v11  ;;  %v356_v18 = vld [vmem:[%s7216_s2 + $0x18] sm:$0xff]  ;;  %v6530_v19 = vpack.c.bf16 %v249_v15, %v248_v14  ;;  %v257_v21 = vld [vmem:[%s7215_s22 + $0x8] sm:$0xff]  ;;  %v250_v24 = vld [vmem:[%s7218_s15] sm:$0xff]  ;;  %s4709_s22 = sld [smem:[#allocation28 + $0x80]] }
 0x127   :  { %5366 = vmatprep.subr.bf16.mxu1 %v5365_v7  ;;  %v5373_v23 = vpack.c.bf16 %v356_v18, %v355_v17  ;;  %v251_v25 = vld [vmem:[%s7218_s15 + $0x8] sm:$0xff]  ;;  %v252_v27 = vld [vmem:[%s7218_s15 + $0x10] sm:$0xff]  ;;  %v253_v28 = vld [vmem:[%s7218_s15 + $0x18] sm:$0xff] }
 0x128   :  { %5379 = vmatpush3.bf16.msra.mxu0 %v6515_v13  ;;  %v6552_v26 = vpack.c.bf16 %v251_v25, %v250_v24  ;;  %v6565_v29 = vpack.c.bf16 %v253_v28, %v252_v27 }
 0x129   :  { %5380 = vmatprep.subr.bf16.mxu0 %v6187_v6 }
 0x12a   :  { %5368 = vmatpush3.bf16.msra.mxu1 %v5365_v7 }
 0x12b   :  { %5370 = vmatprep.subr.bf16.mxu1 %v5369_v16 }
 0x12c   :  { %5382 = vmatpush3.bf16.msra.mxu0 %v6530_v19 }
 0x12d   :  { %4930 = vmatmul.mubr.msk.f32.vlgmr.msra.gmra.mrb[0].mxu1 %vm268_vm0, %v257_v21  ;;  %5389 = vmatprep.subr.bf16.mxu0 %v6187_v6 }
 0x12e   :  { %5372 = vmatpush3.bf16.msra.mxu1 %v5369_v16  ;;  %4940 = vmatprep.mubr.msk.f32.mxu1 %vm268_vm0, %v256_v5 }
 0x12f   :  { %5374 = vmatprep.subr.bf16.mxu1 %v5373_v23  ;;  %4952 = vmatmul.mubr.f32.vlgmr.msra.gmra.mrb[0].mxu0 %v6189_v10 }
 0x130   :  { %4973 = vmatprep.mubr.msk.f32.mxu0 %vm6188_vm1, %v6189_v10  ;;  %5391 = vmatpush3.bf16.msra.mxu0 %v6515_v13 }
 0x131   :  { %5392 = vmatprep.subr.bf16.mxu0 %v6187_v6 }
 0x132   :  { %5376 = vmatpush3.bf16.msra.mxu1 %v5373_v23 }
 0x133   :  { %5383 = vmatprep.subr.bf16.mxu1 %v6187_v6 }
 0x134   :  { %5394 = vmatpush3.bf16.msra.mxu0 %v6530_v19 }
 0x135   :  { %4941 = vmatmul.mubr.msk.f32.vlgmr.msra.gmra.mrb[2].mxu1 %vm268_vm0, %v257_v21  ;;  %5401 = vmatprep.subr.bf16.mxu0 %v6187_v6 }
 0x136   :  { %5385 = vmatpush3.bf16.msra.mxu1 %v6552_v26  ;;  %4962 = vmatprep.mubr.msk.f32.mxu1 %vm6188_vm1, %v6189_v10 }
 0x137   :  { %5386 = vmatprep.subr.bf16.mxu1 %v6187_v6 }
 0x13a   :  { %5388 = vmatpush3.bf16.msra.mxu1 %v6565_v29 }
 0x13b   :  { %5395 = vmatprep.subr.bf16.mxu1 %v6187_v6 }
 0x13d   :  { %4963 = vmatmul.mubr.f32.vlgmr.msra.gmra.mrb[4].mxu1 %v6189_v10 }
 0x13e   :  { %5397 = vmatpush3.bf16.msra.mxu1 %v6552_v26  ;;  %4984 = vmatprep.mubr.msk.f32.mxu1 %vm6188_vm1, %v6189_v10 }
 0x13f   :  { %5398 = vmatprep.subr.bf16.mxu1 %v6187_v6 }
 0x142   :  { %5400 = vmatpush3.bf16.msra.mxu1 %v6565_v29 }
 0x143   :  { %5407 = vmatprep.subr.bf16.mxu1 %v6187_v6 }
 0x191   :  { %v6582_v42 = vpop.permute.xlu0 %635 }
 0x195   :  { %v6586_v44 = vpop.permute.xlu0 %597 }
 0x200   :  { %v4931_v31 = vpop.f32.mrb[0].mxu1 }
 0x201   :  { %v347_v32 = vadd.f32 %v4931_v31, %v4618_v30  ;;  %v341_v33 = vpop.f32.mrb[1].mxu1 }
 0x202   :  { %v342_v34 = vadd.f32 %v4618_v30, %v341_v33  ;;  %v511_v35 = vpop.f32.mrb[0].mxu0 }
 0x203   :  { %352 = vst.msk [vmem:[#allocation2 + $0x8] sm:$0xff] %vm350_vm2, %v347_v32  ;;  %v4953_v36 = vpop.f32.mrb[1].mxu0  ;;  %v600_v47 = vadd.f32 %v6586_v44, %v511_v35 }
 0x204   :  { %351 = vst.msk [vmem:[#allocation2] sm:$0xff] %vm350_vm2, %v342_v34 }
 0x208   :  { %v4942_v38 = vpop.f32.mrb[2].mxu1 }
 0x209   :  { %v435_v39 = vadd.f32 %v4942_v38, %v4621_v37  ;;  %v429_v40 = vpop.f32.mrb[3].mxu1 }
 0x20a   :  { %v430_v41 = vadd.f32 %v4621_v37, %v429_v40 }
 0x20b   :  { %439 = vst.msk [vmem:[#allocation3 + $0x8] sm:$0xff] %vm350_vm2, %v435_v39  ;;  %v440_v50 = vld [vmem:[#allocation2] sm:$0x3]  ;;  %v672_v32 = vld [vmem:[#allocation2 + $0x2] sm:$0x3] }
 0x20c   :  { %438 = vst.msk [vmem:[#allocation3] sm:$0xff] %vm350_vm2, %v430_v41  ;;  %v585_v51 = vadd.f32 %v511_v35, %v440_v50 }
 0x20e   :  { %v4624_v53 = vmul.f32 -1.442695, %v585_v51 }
 0x210   :  { %v581_v43 = vpop.f32.mrb[4].mxu1 }
 0x211   :  { %v4964_v45 = vpop.f32.mrb[5].mxu1  ;;  %v638_v46 = vadd.f32 %v6582_v42, %v581_v43 }
 0x212   :  { %v441_v48 = vld [vmem:[#allocation3 + $0xe] sm:$0x3]  ;;  %v673_v30 = vld [vmem:[#allocation3 + $0xc] sm:$0x3] }
 0x213   :  { %640 = vrot.lane.b32.xlu1 %v638_v46, %s6190_s28  ;;  %v623_v49 = vadd.f32 %v581_v43, %v441_v48 }
 0x215   :  { %v4626_v52 = vmul.f32 -1.442695, %v623_v49 }
 0x217   :  { %602 = vrot.lane.b32.xlu1 %v600_v47, %s6190_s28  ;;  %5647 = vpow2.f32 %v4626_v52 }
 0x218   :  { %5649 = vpow2.f32 %v4624_v53 }
 0x221   :  { %v5648_v54 = vpop.eup %5647 }
 0x222   :  { %v627_v55 = vadd.f32 1.0, %v5648_v54  ;;  %v5650_v56 = vpop.eup %5649 }
 0x223   :  { %v589_v57 = vadd.f32 1.0, %v5650_v56 }
 0x224   :  { %5651 = vrcp.f32 %v627_v55 }
 0x225   :  { %5653 = vrcp.f32 %v589_v57 }
 0x22e   :  { %v5652_v58 = vpop.eup %5651 }
 0x22f   :  { %v5654_v61 = vpop.eup %5653 }
 0x285   :  { %v641_v59 = vpop.permute.xlu1 %640 }
 0x286   :  { %v643_v60 = vmul.f32 %v5652_v58, %v641_v59 }
 0x288   :  { %645 = vrot.lane.b32.xlu0 %v643_v60, %s6190_s28 }
 0x289   :  { %v603_v62 = vpop.permute.xlu1 %602 }
 0x28a   :  { %v605_v63 = vmul.f32 %v5654_v61, %v603_v62 }
 0x28c   :  { %607 = vrot.lane.b32.xlu1 %v605_v63, %s6190_s28 }
 0x2fa   :  { %v646_v0 = vpop.permute.xlu0 %645 }
 0x2fb   :  { %v648_v1 = vadd.f32 %v646_v0, %v441_v48 }
 0x2fd   :  { %5655 = vtanh.f32 %v648_v1 }
 0x2fe   :  { %v608_v2 = vpop.permute.xlu1 %607 }
 0x2ff   :  { %v610_v3 = vadd.f32 %v608_v2, %v440_v50 }
 0x301   :  { %5657 = vtanh.f32 %v610_v3 }
 0x307   :  { %v5656_v4 = vpop.eup %5655 }
 0x308   :  { %v650_v5 = vsub.f32 0.0, %v5656_v4 }
 0x30a   :  { %652 = vrot.lane.b32.xlu0 %v650_v5, %s6191_s8 }
 0x30b   :  { %v5658_v7 = vpop.eup %5657 }
 0x30c   :  { %v612_v8 = vsub.f32 0.0, %v5658_v7 }
 0x30e   :  { %614 = vrot.lane.b32.xlu1 %v612_v8, %s6191_s8 }
 0x37c   :  { %v653_v9 = vpop.permute.xlu0 %652 }
 0x37d   :  { %v655_v11 = vmul.f32 %v5652_v58, %v653_v9  ;;  %v889_v9 = vld [vmem:[#allocation3 + $0xa] sm:$0x3] }
 0x37f   :  { %657 = vrot.lane.b32.xlu0 %v655_v11, %s6192_s16 }
 0x380   :  { %v615_v12 = vpop.permute.xlu1 %614 }
 0x381   :  { %v617_v14 = vmul.f32 %v5654_v61, %v615_v12  ;;  %v888_v12 = vld [vmem:[#allocation2 + $0x4] sm:$0x3] }
 0x383   :  { %619 = vrot.lane.b32.xlu1 %v617_v14, %s6192_s16 }
 0x3f1   :  { %v658_v15 = vpop.permute.xlu0 %657 }
 0x3f2   :  { %v660_v16 = vadd.f32 %v5656_v4, %v658_v15 }
 0x3f4   :  { %668 = vrot.lane.b32.xlu0 %v660_v16, %s6190_s28 }
 0x3f5   :  { %v620_v17 = vpop.permute.xlu1 %619 }
 0x3f6   :  { %v622_v18 = vadd.f32 %v5658_v7, %v620_v17 }
 0x3f8   :  { %662 = vrot.lane.b32.xlu1 %v622_v18, %s6190_s28 }
 0x466   :  { %v669_v20 = vpop.permute.xlu0 %668 }
 0x467   :  { %671 = vst.msk [vmem:[#allocation5 + $0xe] sm:$0x3] %vm665_vm3, %v669_v20  ;;  %4985 = vmatmul.mubr.msk.f32.vlgmr.msra.gmra.mrb[6].mxu1 %vm268_vm0, %v669_v20 }
 0x468   :  { %5409 = vmatpush3.bf16.msra.mxu1 %v6552_v26  ;;  %5006 = vmatprep.mubr.msk.f32.mxu1 %vm6188_vm1, %v6189_v10 }
 0x469   :  { %5410 = vmatprep.subr.bf16.mxu1 %v6187_v6 }
 0x46a   :  { %v663_v21 = vpop.permute.xlu1 %662 }
 0x46b   :  { %666 = vst.msk [vmem:[#allocation4] sm:$0x3] %vm665_vm3, %v663_v21  ;;  %4974 = vmatmul.mubr.msk.f32.vlgmr.msra.gmra.mrb[2].mxu0 %vm268_vm0, %v663_v21 }
 0x46c   :  { %5403 = vmatpush3.bf16.msra.mxu0 %v6515_v13  ;;  %5412 = vmatpush3.bf16.msra.mxu1 %v6565_v29 }
 0x46d   :  { %5404 = vmatprep.subr.bf16.mxu0 %v6187_v6  ;;  %4995 = vmatprep.mubr.msk.f32.mxu0 %vm6188_vm1, %v6189_v10 }
 0x46e   :  { %5419 = vmatprep.subr.bf16.mxu1 %v6187_v6 }
 0x470   :  { %5406 = vmatpush3.bf16.msra.mxu0 %v6530_v19 }
 0x471   :  { %5413 = vmatprep.subr.bf16.mxu0 %v6187_v6 }
 0x53a   :  { %v814_v22 = vpop.f32.mrb[6].mxu1 }
 0x53b   :  { %v855_v23 = vadd.f32 %v814_v22, %v6582_v42  ;;  %v4986_v24 = vpop.f32.mrb[7].mxu1  ;;  %v848_v31 = vadd.f32 %v814_v22, %v673_v30 }
 0x53d   :  { %857 = vrot.lane.b32.xlu0 %v855_v23, %s6190_s28  ;;  %v4631_v33 = vmul.f32 -1.442695, %v848_v31 }
 0x53e   :  { %v742_v25 = vpop.f32.mrb[2].mxu0 }
 0x53f   :  { %v825_v27 = vadd.f32 %v742_v25, %v6586_v44  ;;  %v4975_v28 = vpop.f32.mrb[3].mxu0  ;;  %v818_v34 = vadd.f32 %v742_v25, %v672_v32  ;;  %5659 = vpow2.f32 %v4631_v33 }
 0x541   :  { %827 = vrot.lane.b32.xlu1 %v825_v27, %s6190_s28  ;;  %v4630_v35 = vmul.f32 -1.442695, %v818_v34 }
 0x543   :  { %5661 = vpow2.f32 %v4630_v35 }
 0x549   :  { %v5660_v36 = vpop.eup %5659 }
 0x54a   :  { %v852_v37 = vadd.f32 1.0, %v5660_v36 }
 0x54c   :  { %5663 = vrcp.f32 %v852_v37 }
 0x54d   :  { %v5662_v38 = vpop.eup %5661 }
 0x54e   :  { %v822_v39 = vadd.f32 1.0, %v5662_v38 }
 0x550   :  { %5665 = vrcp.f32 %v822_v39 }
 0x556   :  { %v5664_v40 = vpop.eup %5663 }
 0x55a   :  { %v5666_v45 = vpop.eup %5665 }
 0x5af   :  { %v858_v41 = vpop.permute.xlu0 %857 }
 0x5b0   :  { %v860_v43 = vmul.f32 %v5664_v40, %v858_v41 }
 0x5b2   :  { %862 = vrot.lane.b32.xlu0 %v860_v43, %s6190_s28 }
 0x5b3   :  { %v828_v46 = vpop.permute.xlu1 %827 }
 0x5b4   :  { %v830_v47 = vmul.f32 %v5666_v45, %v828_v46 }
 0x5b6   :  { %832 = vrot.lane.b32.xlu1 %v830_v47, %s6190_s28 }
 0x624   :  { %v863_v48 = vpop.permute.xlu0 %862 }
 0x625   :  { %v865_v49 = vadd.f32 %v863_v48, %v673_v30 }
 0x627   :  { %5667 = vtanh.f32 %v865_v49 }
 0x628   :  { %v833_v50 = vpop.permute.xlu1 %832 }
 0x629   :  { %v835_v51 = vadd.f32 %v833_v50, %v672_v32 }
 0x62b   :  { %5669 = vtanh.f32 %v835_v51 }
 0x631   :  { %v5668_v52 = vpop.eup %5667 }
 0x632   :  { %v867_v53 = vsub.f32 %v660_v16, %v5668_v52 }
 0x634   :  { %869 = vrot.lane.b32.xlu0 %v867_v53, %s6191_s8 }
 0x635   :  { %v5670_v54 = vpop.eup %5669 }
 0x636   :  { %v837_v55 = vsub.f32 %v622_v18, %v5670_v54 }
 0x638   :  { %839 = vrot.lane.b32.xlu1 %v837_v55, %s6191_s8 }
 0x6a6   :  { %v870_v56 = vpop.permute.xlu0 %869 }
 0x6a7   :  { %v872_v57 = vmul.f32 %v5664_v40, %v870_v56  ;;  %v1105_v56 = vld [vmem:[#allocation3 + $0x8] sm:$0x3] }
 0x6a9   :  { %874 = vrot.lane.b32.xlu0 %v872_v57, %s6192_s16 }
 0x6aa   :  { %v840_v58 = vpop.permute.xlu1 %839 }
 0x6ab   :  { %v842_v59 = vmul.f32 %v5666_v45, %v840_v58  ;;  %v1104_v58 = vld [vmem:[#allocation2 + $0x6] sm:$0x3] }
 0x6ad   :  { %844 = vrot.lane.b32.xlu1 %v842_v59, %s6192_s16 }
 0x71b   :  { %v875_v60 = vpop.permute.xlu0 %874 }
 0x71c   :  { %v877_v61 = vadd.f32 %v5668_v52, %v875_v60 }
 0x71e   :  { %884 = vrot.lane.b32.xlu0 %v877_v61, %s6190_s28 }
 0x71f   :  { %v845_v62 = vpop.permute.xlu1 %844 }
 0x720   :  { %v847_v63 = vadd.f32 %v5670_v54, %v845_v62 }
 0x722   :  { %879 = vrot.lane.b32.xlu1 %v847_v63, %s6190_s28 }
 0x790   :  { %v885_v0 = vpop.permute.xlu0 %884 }
 0x791   :  { %887 = vst.msk [vmem:[#allocation5 + $0xc] sm:$0x3] %vm665_vm3, %v885_v0  ;;  %5007 = vmatmul.mubr.msk.f32.vlgmr.msra.gmra.mrb[8].mxu1 %vm268_vm0, %v885_v0 }
 0x792   :  { %5421 = vmatpush3.bf16.msra.mxu1 %v6552_v26  ;;  %5028 = vmatprep.mubr.msk.f32.mxu1 %vm6188_vm1, %v6189_v10 }
 0x793   :  { %5422 = vmatprep.subr.bf16.mxu1 %v6187_v6 }
 0x794   :  { %v880_v1 = vpop.permute.xlu1 %879 }
 0x795   :  { %882 = vst.msk [vmem:[#allocation4 + $0x2] sm:$0x3] %vm665_vm3, %v880_v1  ;;  %4996 = vmatmul.mubr.msk.f32.vlgmr.msra.gmra.mrb[4].mxu0 %vm268_vm0, %v880_v1 }
 0x796   :  { %5415 = vmatpush3.bf16.msra.mxu0 %v6515_v13  ;;  %5424 = vmatpush3.bf16.msra.mxu1 %v6565_v29 }
 0x797   :  { %5416 = vmatprep.subr.bf16.mxu0 %v6187_v6  ;;  %5017 = vmatprep.mubr.msk.f32.mxu0 %vm6188_vm1, %v6189_v10 }
 0x798   :  { %5431 = vmatprep.subr.bf16.mxu1 %v6187_v6 }
 0x79a   :  { %5418 = vmatpush3.bf16.msra.mxu0 %v6530_v19 }
 0x79b   :  { %5425 = vmatprep.subr.bf16.mxu0 %v6187_v6 }
 0x864   :  { %v1030_v2 = vpop.f32.mrb[8].mxu1 }
 0x865   :  { %v1071_v3 = vadd.f32 %v1030_v2, %v6582_v42  ;;  %v5008_v4 = vpop.f32.mrb[9].mxu1  ;;  %v1064_v11 = vadd.f32 %v1030_v2, %v889_v9 }
 0x867   :  { %1073 = vrot.lane.b32.xlu0 %v1071_v3, %s6190_s28  ;;  %v4635_v14 = vmul.f32 -1.442695, %v1064_v11 }
 0x868   :  { %v958_v5 = vpop.f32.mrb[4].mxu0 }
 0x869   :  { %v1041_v7 = vadd.f32 %v958_v5, %v6586_v44  ;;  %v4997_v8 = vpop.f32.mrb[5].mxu0  ;;  %v1034_v15 = vadd.f32 %v958_v5, %v888_v12  ;;  %5671 = vpow2.f32 %v4635_v14 }
 0x86b   :  { %1043 = vrot.lane.b32.xlu1 %v1041_v7, %s6190_s28  ;;  %v4634_v16 = vmul.f32 -1.442695, %v1034_v15 }
 0x86d   :  { %5673 = vpow2.f32 %v4634_v16 }
 0x873   :  { %v5672_v17 = vpop.eup %5671 }
 0x874   :  { %v1068_v18 = vadd.f32 1.0, %v5672_v17 }
 0x876   :  { %5675 = vrcp.f32 %v1068_v18 }
 0x877   :  { %v5674_v20 = vpop.eup %5673 }
 0x878   :  { %v1038_v21 = vadd.f32 1.0, %v5674_v20 }
 0x87a   :  { %5677 = vrcp.f32 %v1038_v21 }
 0x880   :  { %v5676_v22 = vpop.eup %5675 }
 0x884   :  { %v5678_v25 = vpop.eup %5677 }
 0x8d9   :  { %v1074_v23 = vpop.permute.xlu0 %1073 }
 0x8da   :  { %v1076_v24 = vmul.f32 %v5676_v22, %v1074_v23 }
 0x8dc   :  { %1078 = vrot.lane.b32.xlu0 %v1076_v24, %s6190_s28 }
 0x8dd   :  { %v1044_v27 = vpop.permute.xlu1 %1043 }
 0x8de   :  { %v1046_v28 = vmul.f32 %v5678_v25, %v1044_v27 }
 0x8e0   :  { %1048 = vrot.lane.b32.xlu1 %v1046_v28, %s6190_s28 }
 0x94e   :  { %v1079_v30 = vpop.permute.xlu0 %1078 }
 0x94f   :  { %v1081_v31 = vadd.f32 %v1079_v30, %v889_v9 }
 0x951   :  { %5679 = vtanh.f32 %v1081_v31 }
 0x952   :  { %v1049_v32 = vpop.permute.xlu1 %1048 }
 0x953   :  { %v1051_v33 = vadd.f32 %v1049_v32, %v888_v12 }
 0x955   :  { %5681 = vtanh.f32 %v1051_v33 }
 0x95b   :  { %v5680_v34 = vpop.eup %5679 }
 0x95c   :  { %v1083_v35 = vsub.f32 %v877_v61, %v5680_v34 }
 0x95e   :  { %1085 = vrot.lane.b32.xlu0 %v1083_v35, %s6191_s8 }
 0x95f   :  { %v5682_v36 = vpop.eup %5681 }
 0x960   :  { %v1053_v37 = vsub.f32 %v847_v63, %v5682_v36 }
 0x962   :  { %1055 = vrot.lane.b32.xlu1 %v1053_v37, %s6191_s8 }
 0x9d0   :  { %v1086_v38 = vpop.permute.xlu0 %1085 }
 0x9d1   :  { %v1088_v39 = vmul.f32 %v5676_v22, %v1086_v38  ;;  %v1321_v38 = vld [vmem:[#allocation3 + $0x6] sm:$0x3] }
 0x9d3   :  { %1090 = vrot.lane.b32.xlu0 %v1088_v39, %s6192_s16 }
 0x9d4   :  { %v1056_v40 = vpop.permute.xlu1 %1055 }
 0x9d5   :  { %v1058_v41 = vmul.f32 %v5678_v25, %v1056_v40  ;;  %v1320_v40 = vld [vmem:[#allocation2 + $0x8] sm:$0x3] }
 0x9d7   :  { %1060 = vrot.lane.b32.xlu1 %v1058_v41, %s6192_s16 }
 0xa45   :  { %v1091_v43 = vpop.permute.xlu0 %1090 }
 0xa46   :  { %v1093_v45 = vadd.f32 %v5680_v34, %v1091_v43 }
 0xa48   :  { %1100 = vrot.lane.b32.xlu0 %v1093_v45, %s6190_s28 }
 0xa49   :  { %v1061_v46 = vpop.permute.xlu1 %1060 }
 0xa4a   :  { %v1063_v47 = vadd.f32 %v5682_v36, %v1061_v46 }
 0xa4c   :  { %1095 = vrot.lane.b32.xlu1 %v1063_v47, %s6190_s28 }
 0xaba   :  { %v1101_v48 = vpop.permute.xlu0 %1100 }
 0xabb   :  { %1103 = vst.msk [vmem:[#allocation5 + $0xa] sm:$0x3] %vm665_vm3, %v1101_v48  ;;  %5029 = vmatmul.mubr.msk.f32.vlgmr.msra.gmra.mrb[10].mxu1 %vm268_vm0, %v1101_v48 }
 0xabc   :  { %5433 = vmatpush3.bf16.msra.mxu1 %v6552_v26  ;;  %5050 = vmatprep.mubr.msk.f32.mxu1 %vm6188_vm1, %v6189_v10 }
 0xabd   :  { %5434 = vmatprep.subr.bf16.mxu1 %v6187_v6 }
 0xabe   :  { %v1096_v49 = vpop.permute.xlu1 %1095 }
 0xabf   :  { %1098 = vst.msk [vmem:[#allocation4 + $0x4] sm:$0x3] %vm665_vm3, %v1096_v49  ;;  %5018 = vmatmul.mubr.msk.f32.vlgmr.msra.gmra.mrb[6].mxu0 %vm268_vm0, %v1096_v49 }
 0xac0   :  { %5427 = vmatpush3.bf16.msra.mxu0 %v6515_v13  ;;  %5436 = vmatpush3.bf16.msra.mxu1 %v6565_v29 }
 0xac1   :  { %5428 = vmatprep.subr.bf16.mxu0 %v6187_v6  ;;  %5039 = vmatprep.mubr.msk.f32.mxu0 %vm6188_vm1, %v6189_v10 }
 0xac2   :  { %5443 = vmatprep.subr.bf16.mxu1 %v6187_v6 }
 0xac4   :  { %5430 = vmatpush3.bf16.msra.mxu0 %v6530_v19 }
 0xac5   :  { %5437 = vmatprep.subr.bf16.mxu0 %v6187_v6 }
 0xb8e   :  { %v1246_v50 = vpop.f32.mrb[10].mxu1 }
 0xb8f   :  { %v1287_v51 = vadd.f32 %v1246_v50, %v6582_v42  ;;  %v5030_v52 = vpop.f32.mrb[11].mxu1  ;;  %v1280_v57 = vadd.f32 %v1246_v50, %v1105_v56 }
 0xb91   :  { %1289 = vrot.lane.b32.xlu0 %v1287_v51, %s6190_s28  ;;  %v4639_v59 = vmul.f32 -1.442695, %v1280_v57 }
 0xb92   :  { %v1174_v53 = vpop.f32.mrb[6].mxu0 }
 0xb93   :  { %v1257_v54 = vadd.f32 %v1174_v53, %v6586_v44  ;;  %v5019_v55 = vpop.f32.mrb[7].mxu0  ;;  %v1250_v60 = vadd.f32 %v1174_v53, %v1104_v58  ;;  %5683 = vpow2.f32 %v4639_v59 }
 0xb95   :  { %1259 = vrot.lane.b32.xlu1 %v1257_v54, %s6190_s28  ;;  %v4638_v61 = vmul.f32 -1.442695, %v1250_v60 }
 0xb97   :  { %5685 = vpow2.f32 %v4638_v61 }
 0xb9d   :  { %v5684_v62 = vpop.eup %5683 }
 0xb9e   :  { %v1284_v63 = vadd.f32 1.0, %v5684_v62 }
 0xba0   :  { %5687 = vrcp.f32 %v1284_v63 }
 0xba1   :  { %v5686_v0 = vpop.eup %5685 }
 0xba2   :  { %v1254_v1 = vadd.f32 1.0, %v5686_v0 }
 0xba4   :  { %5689 = vrcp.f32 %v1254_v1 }
 0xbaa   :  { %v5688_v2 = vpop.eup %5687 }
 0xbae   :  { %v5690_v5 = vpop.eup %5689 }
 0xc03   :  { %v1290_v3 = vpop.permute.xlu0 %1289 }
 0xc04   :  { %v1292_v4 = vmul.f32 %v5688_v2, %v1290_v3 }
 0xc06   :  { %1294 = vrot.lane.b32.xlu0 %v1292_v4, %s6190_s28 }
 0xc07   :  { %v1260_v7 = vpop.permute.xlu1 %1259 }
 0xc08   :  { %v1262_v8 = vmul.f32 %v5690_v5, %v1260_v7 }
 0xc0a   :  { %1264 = vrot.lane.b32.xlu1 %v1262_v8, %s6190_s28 }
 0xc78   :  { %v1295_v9 = vpop.permute.xlu0 %1294 }
 0xc79   :  { %v1297_v11 = vadd.f32 %v1295_v9, %v1105_v56 }
 0xc7b   :  { %5691 = vtanh.f32 %v1297_v11 }
 0xc7c   :  { %v1265_v12 = vpop.permute.xlu1 %1264 }
 0xc7d   :  { %v1267_v14 = vadd.f32 %v1265_v12, %v1104_v58 }
 0xc7f   :  { %5693 = vtanh.f32 %v1267_v14 }
 0xc85   :  { %v5692_v15 = vpop.eup %5691 }
 0xc86   :  { %v1299_v16 = vsub.f32 %v1093_v45, %v5692_v15 }
 0xc88   :  { %1301 = vrot.lane.b32.xlu0 %v1299_v16, %s6191_s8 }
 0xc89   :  { %v5694_v17 = vpop.eup %5693 }
 0xc8a   :  { %v1269_v18 = vsub.f32 %v1063_v47, %v5694_v17 }
 0xc8c   :  { %1271 = vrot.lane.b32.xlu1 %v1269_v18, %s6191_s8 }
 0xcfa   :  { %v1302_v20 = vpop.permute.xlu0 %1301 }
 0xcfb   :  { %v1304_v21 = vmul.f32 %v5688_v2, %v1302_v20  ;;  %v1537_v20 = vld [vmem:[#allocation3 + $0x4] sm:$0x3] }
 0xcfd   :  { %1306 = vrot.lane.b32.xlu0 %v1304_v21, %s6192_s16 }
 0xcfe   :  { %v1272_v22 = vpop.permute.xlu1 %1271 }
 0xcff   :  { %v1274_v23 = vmul.f32 %v5690_v5, %v1272_v22  ;;  %v1536_v22 = vld [vmem:[#allocation2 + $0xa] sm:$0x3] }
 0xd01   :  { %1276 = vrot.lane.b32.xlu1 %v1274_v23, %s6192_s16 }
 0xd6f   :  { %v1307_v24 = vpop.permute.xlu0 %1306 }
 0xd70   :  { %v1309_v25 = vadd.f32 %v5692_v15, %v1307_v24 }
 0xd72   :  { %1316 = vrot.lane.b32.xlu0 %v1309_v25, %s6190_s28 }
 0xd73   :  { %v1277_v27 = vpop.permute.xlu1 %1276 }
 0xd74   :  { %v1279_v28 = vadd.f32 %v5694_v17, %v1277_v27 }
 0xd76   :  { %1311 = vrot.lane.b32.xlu1 %v1279_v28, %s6190_s28 }
 0xde4   :  { %v1317_v30 = vpop.permute.xlu0 %1316 }
 0xde5   :  { %1319 = vst.msk [vmem:[#allocation5 + $0x8] sm:$0x3] %vm665_vm3, %v1317_v30  ;;  %5051 = vmatmul.mubr.msk.f32.vlgmr.msra.gmra.mrb[12].mxu1 %vm268_vm0, %v1317_v30 }
 0xde6   :  { %5445 = vmatpush3.bf16.msra.mxu1 %v6552_v26  ;;  %5072 = vmatprep.mubr.msk.f32.mxu1 %vm6188_vm1, %v6189_v10 }
 0xde7   :  { %5446 = vmatprep.subr.bf16.mxu1 %v6187_v6 }
 0xde8   :  { %v1312_v31 = vpop.permute.xlu1 %1311 }
 0xde9   :  { %1314 = vst.msk [vmem:[#allocation4 + $0x6] sm:$0x3] %vm665_vm3, %v1312_v31  ;;  %5040 = vmatmul.mubr.msk.f32.vlgmr.msra.gmra.mrb[8].mxu0 %vm268_vm0, %v1312_v31 }
 0xdea   :  { %5439 = vmatpush3.bf16.msra.mxu0 %v6515_v13  ;;  %5448 = vmatpush3.bf16.msra.mxu1 %v6565_v29 }
 0xdeb   :  { %5440 = vmatprep.subr.bf16.mxu0 %v6187_v6  ;;  %5061 = vmatprep.mubr.msk.f32.mxu0 %vm6188_vm1, %v6189_v10 }
 0xdec   :  { %5455 = vmatprep.subr.bf16.mxu1 %v6187_v6 }
 0xdee   :  { %5442 = vmatpush3.bf16.msra.mxu0 %v6530_v19 }
 0xdef   :  { %5449 = vmatprep.subr.bf16.mxu0 %v6187_v6 }
 0xeb8   :  { %v1462_v32 = vpop.f32.mrb[12].mxu1 }
 0xeb9   :  { %v1503_v33 = vadd.f32 %v1462_v32, %v6582_v42  ;;  %v5052_v34 = vpop.f32.mrb[13].mxu1  ;;  %v1496_v39 = vadd.f32 %v1462_v32, %v1321_v38 }
 0xebb   :  { %1505 = vrot.lane.b32.xlu0 %v1503_v33, %s6190_s28  ;;  %v4643_v41 = vmul.f32 -1.442695, %v1496_v39 }
 0xebc   :  { %v1390_v35 = vpop.f32.mrb[8].mxu0 }
 0xebd   :  { %v1473_v36 = vadd.f32 %v1390_v35, %v6586_v44  ;;  %v5041_v37 = vpop.f32.mrb[9].mxu0  ;;  %v1466_v43 = vadd.f32 %v1390_v35, %v1320_v40  ;;  %5695 = vpow2.f32 %v4643_v41 }
 0xebf   :  { %1475 = vrot.lane.b32.xlu1 %v1473_v36, %s6190_s28  ;;  %v4642_v45 = vmul.f32 -1.442695, %v1466_v43 }
 0xec1   :  { %5697 = vpow2.f32 %v4642_v45 }
 0xec7   :  { %v5696_v46 = vpop.eup %5695 }
 0xec8   :  { %v1500_v47 = vadd.f32 1.0, %v5696_v46 }
 0xeca   :  { %5699 = vrcp.f32 %v1500_v47 }
 0xecb   :  { %v5698_v48 = vpop.eup %5697 }
 0xecc   :  { %v1470_v49 = vadd.f32 1.0, %v5698_v48 }
 0xece   :  { %5701 = vrcp.f32 %v1470_v49 }
 0xed4   :  { %v5700_v50 = vpop.eup %5699 }
 0xed8   :  { %v5702_v53 = vpop.eup %5701 }
 0xf2d   :  { %v1506_v51 = vpop.permute.xlu0 %1505 }
 0xf2e   :  { %v1508_v52 = vmul.f32 %v5700_v50, %v1506_v51 }
 0xf30   :  { %1510 = vrot.lane.b32.xlu0 %v1508_v52, %s6190_s28 }
 0xf31   :  { %v1476_v54 = vpop.permute.xlu1 %1475 }
 0xf32   :  { %v1478_v55 = vmul.f32 %v5702_v53, %v1476_v54 }
 0xf34   :  { %1480 = vrot.lane.b32.xlu1 %v1478_v55, %s6190_s28 }
 0xfa2   :  { %v1511_v56 = vpop.permute.xlu0 %1510 }
 0xfa3   :  { %v1513_v57 = vadd.f32 %v1511_v56, %v1321_v38 }
 0xfa5   :  { %5703 = vtanh.f32 %v1513_v57 }
 0xfa6   :  { %v1481_v58 = vpop.permute.xlu1 %1480 }
 0xfa7   :  { %v1483_v59 = vadd.f32 %v1481_v58, %v1320_v40 }
 0xfa9   :  { %5705 = vtanh.f32 %v1483_v59 }
 0xfaf   :  { %v5704_v60 = vpop.eup %5703 }
 0xfb0   :  { %v1515_v61 = vsub.f32 %v1309_v25, %v5704_v60 }
 0xfb2   :  { %1517 = vrot.lane.b32.xlu0 %v1515_v61, %s6191_s8 }
 0xfb3   :  { %v5706_v62 = vpop.eup %5705 }
 0xfb4   :  { %v1485_v63 = vsub.f32 %v1279_v28, %v5706_v62 }
 0xfb6   :  { %1487 = vrot.lane.b32.xlu1 %v1485_v63, %s6191_s8  ;;  %v1752_v63 = vld [vmem:[#allocation2 + $0xc] sm:$0x3] }
0x1024   :  { %v1518_v0 = vpop.permute.xlu0 %1517 }
0x1025   :  { %v1520_v1 = vmul.f32 %v5700_v50, %v1518_v0 }
0x1027   :  { %1522 = vrot.lane.b32.xlu0 %v1520_v1, %s6192_s16 }
0x1028   :  { %v1488_v2 = vpop.permute.xlu1 %1487 }
0x1029   :  { %v1490_v3 = vmul.f32 %v5702_v53, %v1488_v2 }
0x102b   :  { %1492 = vrot.lane.b32.xlu1 %v1490_v3, %s6192_s16 }
0x1099   :  { %v1523_v4 = vpop.permute.xlu0 %1522 }
0x109a   :  { %v1525_v5 = vadd.f32 %v5704_v60, %v1523_v4 }
0x109c   :  { %1532 = vrot.lane.b32.xlu0 %v1525_v5, %s6190_s28 }
0x109d   :  { %v1493_v7 = vpop.permute.xlu1 %1492 }
0x109e   :  { %v1495_v8 = vadd.f32 %v5706_v62, %v1493_v7 }
0x10a0   :  { %1527 = vrot.lane.b32.xlu1 %v1495_v8, %s6190_s28 }
0x110e   :  { %v1533_v9 = vpop.permute.xlu0 %1532 }
0x110f   :  { %1535 = vst.msk [vmem:[#allocation5 + $0x6] sm:$0x3] %vm665_vm3, %v1533_v9  ;;  %5073 = vmatmul.mubr.msk.f32.vlgmr.msra.gmra.mrb[14].mxu1 %vm268_vm0, %v1533_v9 }
0x1110   :  { %5457 = vmatpush3.bf16.msra.mxu1 %v6552_v26  ;;  %5094 = vmatprep.mubr.msk.f32.mxu1 %vm6188_vm1, %v6189_v10 }
0x1111   :  { %5458 = vmatprep.subr.bf16.mxu1 %v6187_v6 }
0x1112   :  { %v1528_v11 = vpop.permute.xlu1 %1527 }
0x1113   :  { %1530 = vst.msk [vmem:[#allocation4 + $0x8] sm:$0x3] %vm665_vm3, %v1528_v11  ;;  %5062 = vmatmul.mubr.msk.f32.vlgmr.msra.gmra.mrb[10].mxu0 %vm268_vm0, %v1528_v11 }
0x1114   :  { %5451 = vmatpush3.bf16.msra.mxu0 %v6515_v13  ;;  %5460 = vmatpush3.bf16.msra.mxu1 %v6565_v29 }
0x1115   :  { %5452 = vmatprep.subr.bf16.mxu0 %v6187_v6  ;;  %5083 = vmatprep.mubr.msk.f32.mxu0 %vm6188_vm1, %v6189_v10 }
0x1116   :  { %5467 = vmatprep.subr.bf16.mxu1 %v6187_v6 }
0x1118   :  { %5454 = vmatpush3.bf16.msra.mxu0 %v6530_v19 }
0x1119   :  { %5461 = vmatprep.subr.bf16.mxu0 %v6187_v6 }
0x11e2   :  { %v1678_v12 = vpop.f32.mrb[14].mxu1 }
0x11e3   :  { %v1719_v14 = vadd.f32 %v1678_v12, %v6582_v42  ;;  %v5074_v15 = vpop.f32.mrb[15].mxu1  ;;  %v1712_v21 = vadd.f32 %v1678_v12, %v1537_v20 }
0x11e5   :  { %1721 = vrot.lane.b32.xlu0 %v1719_v14, %s6190_s28  ;;  %v4647_v23 = vmul.f32 -1.442695, %v1712_v21 }
0x11e6   :  { %v1606_v16 = vpop.f32.mrb[10].mxu0 }
0x11e7   :  { %v1689_v17 = vadd.f32 %v1606_v16, %v6586_v44  ;;  %v5063_v18 = vpop.f32.mrb[11].mxu0  ;;  %v1682_v24 = vadd.f32 %v1606_v16, %v1536_v22  ;;  %5707 = vpow2.f32 %v4647_v23 }
0x11e9   :  { %1691 = vrot.lane.b32.xlu1 %v1689_v17, %s6190_s28  ;;  %v4646_v25 = vmul.f32 -1.442695, %v1682_v24 }
0x11eb   :  { %5709 = vpow2.f32 %v4646_v25 }
0x11f1   :  { %v5708_v27 = vpop.eup %5707 }
0x11f2   :  { %v1716_v28 = vadd.f32 1.0, %v5708_v27 }
0x11f4   :  { %5711 = vrcp.f32 %v1716_v28 }
0x11f5   :  { %v5710_v30 = vpop.eup %5709 }
0x11f6   :  { %v1686_v31 = vadd.f32 1.0, %v5710_v30 }
0x11f8   :  { %5713 = vrcp.f32 %v1686_v31 }
0x11fe   :  { %v5712_v32 = vpop.eup %5711 }
0x1202   :  { %v5714_v35 = vpop.eup %5713 }
0x1257   :  { %v1722_v33 = vpop.permute.xlu0 %1721 }
0x1258   :  { %v1724_v34 = vmul.f32 %v5712_v32, %v1722_v33 }
0x125a   :  { %1726 = vrot.lane.b32.xlu0 %v1724_v34, %s6190_s28 }
0x125b   :  { %v1692_v36 = vpop.permute.xlu1 %1691 }
0x125c   :  { %v1694_v37 = vmul.f32 %v5714_v35, %v1692_v36 }
0x125e   :  { %1696 = vrot.lane.b32.xlu1 %v1694_v37, %s6190_s28 }
0x12cc   :  { %v1727_v38 = vpop.permute.xlu0 %1726 }
0x12cd   :  { %v1729_v39 = vadd.f32 %v1727_v38, %v1537_v20 }
0x12cf   :  { %5715 = vtanh.f32 %v1729_v39 }
0x12d0   :  { %v1697_v40 = vpop.permute.xlu1 %1696 }
0x12d1   :  { %v1699_v41 = vadd.f32 %v1697_v40, %v1536_v22 }
0x12d3   :  { %5717 = vtanh.f32 %v1699_v41 }
0x12d9   :  { %v5716_v43 = vpop.eup %5715 }
0x12da   :  { %v1731_v45 = vsub.f32 %v1525_v5, %v5716_v43 }
0x12dc   :  { %1733 = vrot.lane.b32.xlu0 %v1731_v45, %s6191_s8 }
0x12dd   :  { %v5718_v46 = vpop.eup %5717 }
0x12de   :  { %v1701_v47 = vsub.f32 %v1495_v8, %v5718_v46 }
0x12e0   :  { %1703 = vrot.lane.b32.xlu1 %v1701_v47, %s6191_s8 }
0x134e   :  { %v1734_v48 = vpop.permute.xlu0 %1733 }
0x134f   :  { %v1736_v49 = vmul.f32 %v5712_v32, %v1734_v48 }
0x1351   :  { %1738 = vrot.lane.b32.xlu0 %v1736_v49, %s6192_s16 }
0x1352   :  { %v1704_v50 = vpop.permute.xlu1 %1703 }
0x1353   :  { %v1706_v51 = vmul.f32 %v5714_v35, %v1704_v50 }
0x1355   :  { %1708 = vrot.lane.b32.xlu1 %v1706_v51, %s6192_s16 }
0x13c3   :  { %v1739_v52 = vpop.permute.xlu0 %1738 }
0x13c4   :  { %v1741_v53 = vadd.f32 %v5716_v43, %v1739_v52  ;;  %v1969_v43 = vld [vmem:[#allocation3] sm:$0x3] }
0x13c6   :  { %1748 = vrot.lane.b32.xlu0 %v1741_v53, %s6190_s28 }
0x13c7   :  { %v1709_v54 = vpop.permute.xlu1 %1708 }
0x13c8   :  { %v1711_v55 = vadd.f32 %v5718_v46, %v1709_v54  ;;  %v1968_v46 = vld [vmem:[#allocation2 + $0xe] sm:$0x3] }
0x13ca   :  { %1743 = vrot.lane.b32.xlu1 %v1711_v55, %s6190_s28 }
0x1438   :  { %v1749_v56 = vpop.permute.xlu0 %1748 }
0x1439   :  { %1751 = vst.msk [vmem:[#allocation5 + $0x4] sm:$0x3] %vm665_vm3, %v1749_v56  ;;  %5095 = vmatmul.mubr.msk.f32.vlgmr.msra.gmra.mrb[16].mxu1 %vm268_vm0, %v1749_v56 }
0x143a   :  { %5469 = vmatpush3.bf16.msra.mxu1 %v6552_v26  ;;  %5116 = vmatprep.mubr.msk.f32.mxu1 %vm6188_vm1, %v6189_v10 }
0x143b   :  { %5470 = vmatprep.subr.bf16.mxu1 %v6187_v6 }
0x143c   :  { %v1744_v57 = vpop.permute.xlu1 %1743 }
0x143d   :  { %1746 = vst.msk [vmem:[#allocation4 + $0xa] sm:$0x3] %vm665_vm3, %v1744_v57  ;;  %5084 = vmatmul.mubr.msk.f32.vlgmr.msra.gmra.mrb[12].mxu0 %vm268_vm0, %v1744_v57 }
0x143e   :  { %5463 = vmatpush3.bf16.msra.mxu0 %v6515_v13  ;;  %5472 = vmatpush3.bf16.msra.mxu1 %v6565_v29  ;;  %v1753_v13 = vld [vmem:[#allocation3 + $0x2] sm:$0x3] }
0x143f   :  { %5464 = vmatprep.subr.bf16.mxu0 %v6187_v6  ;;  %5105 = vmatprep.mubr.msk.f32.mxu0 %vm6188_vm1, %v6189_v10 }
0x1442   :  { %5466 = vmatpush3.bf16.msra.mxu0 %v6530_v19 }
0x150c   :  { %v1894_v26 = vpop.f32.mrb[16].mxu1 }
0x150d   :  { %v1935_v58 = vadd.f32 %v1894_v26, %v6582_v42  ;;  %v5096_v59 = vpop.f32.mrb[17].mxu1  ;;  %v1928_v29 = vadd.f32 %v1894_v26, %v1753_v13 }
0x150f   :  { %1937 = vrot.lane.b32.xlu0 %v1935_v58, %s6190_s28  ;;  %v4651_v0 = vmul.f32 -1.442695, %v1928_v29 }
0x1510   :  { %v1822_v60 = vpop.f32.mrb[12].mxu0 }
0x1511   :  { %v1905_v61 = vadd.f32 %v1822_v60, %v6586_v44  ;;  %v5085_v62 = vpop.f32.mrb[13].mxu0  ;;  %v1898_v1 = vadd.f32 %v1822_v60, %v1752_v63  ;;  %5719 = vpow2.f32 %v4651_v0 }
0x1513   :  { %1907 = vrot.lane.b32.xlu1 %v1905_v61, %s6190_s28  ;;  %v4650_v2 = vmul.f32 -1.442695, %v1898_v1 }
0x1515   :  { %5721 = vpow2.f32 %v4650_v2 }
0x151b   :  { %v5720_v19 = vpop.eup %5719 }
0x151c   :  { %v1932_v3 = vadd.f32 1.0, %v5720_v19  ;;  %v2204_v19 = vld [vmem:[%s7219_s1 + $0x20] sm:$0xff] }
0x151e   :  { %5723 = vrcp.f32 %v1932_v3  ;;  %v2205_v3 = vld [vmem:[%s7219_s1 + $0x28] sm:$0xff] }
0x151f   :  { %v5722_v4 = vpop.eup %5721 }
0x1520   :  { %v1902_v5 = vadd.f32 1.0, %v5722_v4  ;;  %v2212_v4 = vld [vmem:[%s7174_s10 + $0x20] sm:$0xff] }
0x1522   :  { %5725 = vrcp.f32 %v1902_v5  ;;  %v5473_v5 = vpack.c.bf16 %v2205_v3, %v2204_v19  ;;  %v4660_v19 = vld [vmem:[#allocation16] ss:$0 sm:$0xff]  ;;  %v4665_v3 = vld [vmem:[#allocation17] ss:$0 sm:$0xff] }
0x1524   :  { %5474 = vmatprep.subr.bf16.mxu0 %v5473_v5 }
0x1528   :  { %v5724_v7 = vpop.eup %5723 }
0x152c   :  { %v5726_v11 = vpop.eup %5725 }
0x1581   :  { %v1938_v8 = vpop.permute.xlu0 %1937 }
0x1582   :  { %v1940_v9 = vmul.f32 %v5724_v7, %v1938_v8 }
0x1584   :  { %1942 = vrot.lane.b32.xlu0 %v1940_v9, %s6190_s28  ;;  %v2206_v9 = vld [vmem:[%s7219_s1 + $0x30] sm:$0xff] }
0x1585   :  { %v1908_v12 = vpop.permute.xlu1 %1907 }
0x1586   :  { %v1910_v14 = vmul.f32 %v5726_v11, %v1908_v12  ;;  %v2214_v12 = vld [vmem:[%s7174_s10 + $0x30] sm:$0xff] }
0x1588   :  { %1912 = vrot.lane.b32.xlu1 %v1910_v14, %s6190_s28 }
0x15f6   :  { %v1943_v15 = vpop.permute.xlu0 %1942 }
0x15f7   :  { %v1945_v16 = vadd.f32 %v1943_v15, %v1753_v13  ;;  %v2215_v15 = vld [vmem:[%s7174_s10 + $0x38] sm:$0xff] }
0x15f9   :  { %5727 = vtanh.f32 %v1945_v16  ;;  %v5493_v16 = vpack.c.bf16 %v2215_v15, %v2214_v12 }
0x15fa   :  { %v1913_v17 = vpop.permute.xlu1 %1912 }
0x15fb   :  { %v1915_v18 = vadd.f32 %v1913_v17, %v1752_v63  ;;  %v2200_v17 = vld [vmem:[%s7219_s1] sm:$0xff] }
0x15fd   :  { %5729 = vtanh.f32 %v1915_v18  ;;  %v2201_v18 = vld [vmem:[%s7219_s1 + $0x8] sm:$0xff] }
0x1603   :  { %v5728_v20 = vpop.eup %5727 }
0x1604   :  { %v1947_v21 = vsub.f32 %v1741_v53, %v5728_v20 }
0x1606   :  { %1949 = vrot.lane.b32.xlu0 %v1947_v21, %s6191_s8  ;;  %v5481_v21 = vpack.c.bf16 %v2201_v18, %v2200_v17 }
0x1607   :  { %v5730_v22 = vpop.eup %5729 }
0x1608   :  { %v1917_v23 = vsub.f32 %v1711_v55, %v5730_v22 }
0x160a   :  { %1919 = vrot.lane.b32.xlu1 %v1917_v23, %s6191_s8 }
0x1678   :  { %v1950_v24 = vpop.permute.xlu0 %1949 }
0x1679   :  { %v1952_v25 = vmul.f32 %v5724_v7, %v1950_v24  ;;  %v2213_v7 = vld [vmem:[%s7174_s10 + $0x28] sm:$0xff] }
0x167a   :  { %v5489_v8 = vpack.c.bf16 %v2213_v7, %v2212_v4 }
0x167b   :  { %1954 = vrot.lane.b32.xlu0 %v1952_v25, %s6192_s16 }
0x167c   :  { %v1920_v27 = vpop.permute.xlu1 %1919  ;;  %5490 = vmatprep.subr.bf16.mxu1 %v5489_v8 }
0x167d   :  { %v1922_v28 = vmul.f32 %v5726_v11, %v1920_v27  ;;  %v2207_v11 = vld [vmem:[%s7219_s1 + $0x38] sm:$0xff]  ;;  %v4479_v27 = vstv %s4478_s12 }
0x167e   :  { %v5477_v14 = vpack.c.bf16 %v2207_v11, %v2206_v9 }
0x167f   :  { %1924 = vrot.lane.b32.xlu1 %v1922_v28, %s6192_s16  ;;  %v4544_v28 = vstv %s4709_s22 }
0x16ed   :  { %v1955_v30 = vpop.permute.xlu0 %1954 }
0x16ee   :  { %v1957_v31 = vadd.f32 %v5728_v20, %v1955_v30  ;;  %v2208_v20 = vld [vmem:[%s7174_s10] sm:$0xff] }
0x16f0   :  { %1964 = vrot.lane.b32.xlu0 %v1957_v31, %s6190_s28 }
0x16f1   :  { %v1925_v32 = vpop.permute.xlu1 %1924 }
0x16f2   :  { %v1927_v33 = vadd.f32 %v5730_v22, %v1925_v32  ;;  %v2209_v22 = vld [vmem:[%s7174_s10 + $0x8] sm:$0xff]  ;;  %v4483_v32 = vstv %s4703_s30  ;;  %s4705_s30 = sld [smem:[#allocation28 + $0x3]] }
0x16f3   :  { %v5497_v23 = vpack.c.bf16 %v2209_v22, %v2208_v20 }
0x16f4   :  { %1959 = vrot.lane.b32.xlu1 %v1927_v33, %s6190_s28 }
0x1762   :  { %v1965_v34 = vpop.permute.xlu0 %1964 }
0x1763   :  { %1967 = vst.msk [vmem:[#allocation5 + $0x2] sm:$0x3] %vm665_vm3, %v1965_v34  ;;  %5117 = vmatmul.mubr.msk.f32.vlgmr.msra.gmra.mrb[18].mxu1 %vm268_vm0, %v1965_v34  ;;  %v4476_v34 = vstv %s4475_s14 }
0x1764   :  { %5492 = vmatpush3.bf16.msra.mxu1 %v5489_v8 }
0x1765   :  { %5494 = vmatprep.subr.bf16.mxu1 %v5493_v16 }
0x1766   :  { %v1960_v35 = vpop.permute.xlu1 %1959 }
0x1767   :  { %1962 = vst.msk [vmem:[#allocation4 + $0xc] sm:$0x3] %vm665_vm3, %v1960_v35  ;;  %5106 = vmatmul.mubr.msk.f32.vlgmr.msra.gmra.mrb[14].mxu0 %vm268_vm0, %v1960_v35  ;;  %v4541_v35 = vstv %s4708_s27 }
0x1768   :  { %5476 = vmatpush3.bf16.msra.mxu0 %v5473_v5  ;;  %5496 = vmatpush3.bf16.msra.mxu1 %v5493_v16 }
0x1769   :  { %5478 = vmatprep.subr.bf16.mxu0 %v5477_v14  ;;  %5498 = vmatprep.subr.bf16.mxu1 %v5497_v23 }
0x176c   :  { %5480 = vmatpush3.bf16.msra.mxu0 %v5477_v14 }
0x176d   :  { %5482 = vmatprep.subr.bf16.mxu0 %v5481_v21 }
0x1836   :  { %v2110_v36 = vpop.f32.mrb[18].mxu1 }
0x1837   :  { %v2151_v37 = vadd.f32 %v2110_v36, %v6582_v42  ;;  %v5118_v38 = vpop.f32.mrb[19].mxu1  ;;  %v2144_v45 = vadd.f32 %v2110_v36, %v1969_v43 }
0x1839   :  { %2153 = vrot.lane.b32.xlu0 %v2151_v37, %s6190_s28  ;;  %v4655_v47 = vmul.f32 -1.442695, %v2144_v45 }
0x183a   :  { %v2038_v39 = vpop.f32.mrb[14].mxu0 }
0x183b   :  { %v2121_v40 = vadd.f32 %v2038_v39, %v6586_v44  ;;  %v5107_v41 = vpop.f32.mrb[15].mxu0  ;;  %v2114_v48 = vadd.f32 %v2038_v39, %v1968_v46  ;;  %5731 = vpow2.f32 %v4655_v47  ;;  %v4669_v47 = vld [vmem:[#allocation22] ss:$0 sm:$0xff] }
0x183d   :  { %2123 = vrot.lane.b32.xlu1 %v2121_v40, %s6190_s28  ;;  %v4654_v49 = vmul.f32 -1.442695, %v2114_v48 }
0x183f   :  { %5733 = vpow2.f32 %v4654_v49 }
0x1845   :  { %v5732_v50 = vpop.eup %5731 }
0x1846   :  { %v2148_v51 = vadd.f32 1.0, %v5732_v50  ;;  %v2202_v50 = vld [vmem:[%s7219_s1 + $0x10] sm:$0xff] }
0x1848   :  { %5735 = vrcp.f32 %v2148_v51  ;;  %v2203_v51 = vld [vmem:[%s7219_s1 + $0x18] sm:$0xff] }
0x1849   :  { %v5734_v42 = vpop.eup %5733 }
0x184a   :  { %v2118_v52 = vadd.f32 1.0, %v5734_v42  ;;  %v2210_v42 = vld [vmem:[%s7174_s10 + $0x10] sm:$0xff] }
0x184c   :  { %5737 = vrcp.f32 %v2118_v52  ;;  %v2211_v52 = vld [vmem:[%s7174_s10 + $0x18] sm:$0xff] }
0x1852   :  { %v5736_v53 = vpop.eup %5735 }
0x1856   :  { %v5738_v55 = vpop.eup %5737 }
0x18ab   :  { %v2154_v54 = vpop.permute.xlu0 %2153 }
0x18ac   :  { %v2156_v44 = vmul.f32 %v5736_v53, %v2154_v54  ;;  %v2199_v54 = vld [vmem:[#allocation5 + $0x8] sm:$0xff] }
0x18ae   :  { %2158 = vrot.lane.b32.xlu0 %v2156_v44, %s6190_s28  ;;  %v5485_v44 = vpack.c.bf16 %v2203_v51, %v2202_v50 }
0x18af   :  { %v2124_v56 = vpop.permute.xlu1 %2123 }
0x18b0   :  { %v2126_v57 = vmul.f32 %v5738_v55, %v2124_v56  ;;  %v2196_v56 = vld [vmem:[#allocation4] sm:$0xff] }
0x18b2   :  { %2128 = vrot.lane.b32.xlu1 %v2126_v57, %s6190_s28  ;;  %v2186_v57 = vld [vmem:[%s7177_s13] sm:$0xff] }
0x1920   :  { %v2159_v26 = vpop.permute.xlu0 %2158 }
0x1921   :  { %v2161_v58 = vadd.f32 %v2159_v26, %v1969_v43  ;;  %v2187_v26 = vld [vmem:[%s7177_s13 + $0x8] sm:$0xff] }
0x1923   :  { %5739 = vtanh.f32 %v2161_v58  ;;  %v2190_v58 = vld [vmem:[#allocation19] sm:$0xff] }
0x1924   :  { %v2129_v59 = vpop.permute.xlu1 %2128 }
0x1925   :  { %v2131_v60 = vadd.f32 %v2129_v59, %v1968_v46  ;;  %v4667_v46 = vld [vmem:[#allocation20] ss:$0 sm:$0xff]  ;;  %v2191_v59 = vld [vmem:[#allocation19 + $0x8] sm:$0xff] }
0x1927   :  { %5741 = vtanh.f32 %v2131_v60  ;;  %v6850_v60 = vpack.c.bf16 %v2187_v26, %v2186_v57 }
0x192d   :  { %v5740_v61 = vpop.eup %5739 }
0x192e   :  { %v2163_v62 = vsub.f32 %v1957_v31, %v5740_v61 }
0x1930   :  { %2165 = vrot.lane.b32.xlu0 %v2163_v62, %s6191_s8  ;;  %v2188_v62 = vld [vmem:[%s7177_s13 + $0x10] sm:$0xff] }
0x1931   :  { %v5742_v13 = vpop.eup %5741 }
0x1932   :  { %v2133_v29 = vsub.f32 %v1927_v33, %v5742_v13  ;;  %v4548_v33 = vstv %s4710_s4  ;;  %s4712_s4 = sld [smem:[#allocation28 + $0x83]] }
0x1934   :  { %2135 = vrot.lane.b32.xlu1 %v2133_v29, %s6191_s8  ;;  %v2192_v29 = vld [vmem:[#allocation19 + $0x10] sm:$0xff] }
0x19a2   :  { %v2166_v63 = vpop.permute.xlu0 %2165 }
0x19a3   :  { %v2168_v0 = vmul.f32 %v5736_v53, %v2166_v63  ;;  %v2193_v63 = vld [vmem:[#allocation19 + $0x18] sm:$0xff] }
0x19a5   :  { %2170 = vrot.lane.b32.xlu0 %v2168_v0, %s6192_s16 }
0x19a6   :  { %v2136_v1 = vpop.permute.xlu1 %2135 }
0x19a7   :  { %v2138_v2 = vmul.f32 %v5738_v55, %v2136_v1  ;;  %v5501_v55 = vpack.c.bf16 %v2211_v52, %v2210_v42 }
0x19a9   :  { %2140 = vrot.lane.b32.xlu1 %v2138_v2, %s6192_s16  ;;  %v6868_v2 = vpack.c.bf16 %v2193_v63, %v2192_v29 }
0x1a17   :  { %v2171_v24 = vpop.permute.xlu0 %2170 }
0x1a18   :  { %v2173_v25 = vadd.f32 %v5740_v61, %v2171_v24  ;;  %v6852_v61 = vpack.c.bf16 %v2191_v59, %v2190_v58 }
0x1a1a   :  { %2180 = vrot.lane.b32.xlu0 %v2173_v25, %s6190_s28  ;;  %v4484_v38 = vmul.f32 %v4483_v32, %v2173_v25  ;;  %v4549_v39 = vmul.f32 %v4548_v33, %v2173_v25 }
0x1a1b   :  { %v2141_v30 = vpop.permute.xlu1 %2140 }
0x1a1c   :  { %v2143_v31 = vadd.f32 %v5742_v13, %v2141_v30  ;;  %v2189_v13 = vld [vmem:[%s7177_s13 + $0x18] sm:$0xff]  ;;  %s4704_s13 = sld [smem:[#allocation28 + $0x2]] }
0x1a1d   :  { %v6866_v1 = vpack.c.bf16 %v2189_v13, %v2188_v62 }
0x1a1e   :  { %v4480_v36 = vmul.f32 %v4479_v27, %v2143_v31  ;;  %v4545_v37 = vmul.f32 %v4544_v28, %v2143_v31  ;;  %2175 = vrot.lane.b32.xlu1 %v2143_v31, %s6190_s28  ;;  %2702 = vrot.lane.b32.xlu0 %v4667_v46, %s6190_s28 }
0x1a20   :  { %v4481_v40 = vadd.f32 %v4480_v36, %v4476_v34  ;;  %v4546_v41 = vadd.f32 %v4545_v37, %v4541_v35 }
0x1a22   :  { %v6818_v43 = vadd.f32 %v4484_v38, %v4481_v40  ;;  %v6820_v45 = vadd.f32 %v4549_v39, %v4546_v41  ;;  %2740 = vrot.lane.b32.xlu1 %v4669_v47, %s6190_s28 }
0x1a8c   :  { %v2181_v48 = vpop.permute.xlu0 %2180 }
0x1a8d   :  { %2183 = vst.msk [vmem:[#allocation5] sm:$0x3] %vm665_vm3, %v2181_v48 }
0x1a90   :  { %v2176_v49 = vpop.permute.xlu1 %2175  ;;  %v6898_v15 = vpop.permute.xlu0 %2702 }
0x1a91   :  { %2178 = vst.msk [vmem:[#allocation4 + $0xe] sm:$0x3] %vm665_vm3, %v2176_v49 }
0x1a94   :  { %v2198_v53 = vld [vmem:[#allocation5] sm:$0xff]  ;;  %v6900_v16 = vpop.permute.xlu1 %2740 }
0x1a95   :  { %5127 = vmatprep.mubr.msk.f32.mxu0 %vm268_vm0, %v2198_v53  ;;  %5149 = vmatprep.mubr.msk.f32.mxu1 %vm268_vm0, %v2198_v53 }
0x1a96   :  { %5128 = vmatmul.mubr.msk.f32.vlgmr.msra.gmra.mrb[16].mxu0 %vm268_vm0, %v2199_v54  ;;  %5150 = vmatmul.mubr.msk.f32.vlgmr.msra.gmra.mrb[20].mxu1 %vm268_vm0, %v2199_v54 }
0x1a97   :  { %5484 = vmatpush3.bf16.msra.mxu0 %v5481_v21  ;;  %5500 = vmatpush3.bf16.msra.mxu1 %v5497_v23 }
0x1a98   :  { %5138 = vmatprep.mubr.msk.f32.mxu0 %vm268_vm0, %v2196_v56  ;;  %5160 = vmatprep.mubr.msk.f32.mxu1 %vm268_vm0, %v2196_v56  ;;  %v2197_v0 = vld [vmem:[#allocation4 + $0x8] sm:$0xff] }
0x1a99   :  { %5486 = vmatprep.subr.bf16.mxu0 %v5485_v44  ;;  %5502 = vmatprep.subr.bf16.mxu1 %v5501_v55 }
0x1a9b   :  { %5488 = vmatpush3.bf16.msra.mxu0 %v5485_v44  ;;  %5504 = vmatpush3.bf16.msra.mxu1 %v5501_v55 }
0x1a9c   :  { %5505 = vmatprep.subr.bf16.mxu0 %v6187_v6  ;;  %5511 = vmatprep.subr.bf16.mxu1 %v6187_v6 }
0x1a9e   :  { %5139 = vmatmul.mubr.msk.f32.vlgmr.msra.gmra.mrb[16].mxu0 %vm268_vm0, %v2197_v0  ;;  %5161 = vmatmul.mubr.msk.f32.vlgmr.msra.gmra.mrb[20].mxu1 %vm268_vm0, %v2197_v0 }
0x1a9f   :  { %5507 = vmatpush3.bf16.msra.mxu0 %v6850_v60  ;;  %5513 = vmatpush3.bf16.msra.mxu1 %v6852_v61 }
0x1aa0   :  { %5508 = vmatprep.subr.bf16.mxu0 %v6187_v6  ;;  %5514 = vmatprep.subr.bf16.mxu1 %v6187_v6 }
0x1aa1   :  { %5171 = vmatprep.mubr.msk.f32.mxu0 %vm6188_vm1, %v6189_v10  ;;  %5182 = vmatprep.mubr.msk.f32.mxu1 %vm6188_vm1, %v6189_v10 }
0x1aa3   :  { %5510 = vmatpush3.bf16.msra.mxu0 %v6866_v1  ;;  %5516 = vmatpush3.bf16.msra.mxu1 %v6868_v2 }
0x1aa4   :  { %5517 = vmatprep.subr.bf16.mxu0 %v6187_v6  ;;  %5523 = vmatprep.subr.bf16.mxu1 %v6187_v6 }
0x1aa6   :  { %5172 = vmatmul.mubr.f32.vlgmr.msra.gmra.mrb[18].mxu0 %v6189_v10  ;;  %5183 = vmatmul.mubr.f32.vlgmr.msra.gmra.mrb[22].mxu1 %v6189_v10 }
0x1aa7   :  { %5519 = vmatpush3.bf16.msra.mxu0 %v6850_v60  ;;  %5525 = vmatpush3.bf16.msra.mxu1 %v6852_v61 }
0x1aa8   :  { %5520 = vmatprep.subr.bf16.mxu0 %v6187_v6  ;;  %5526 = vmatprep.subr.bf16.mxu1 %v6187_v6 }
0x1aa9   :  { %5193 = vmatprep.mubr.msk.f32.mxu0 %vm6188_vm1, %v6189_v10  ;;  %5204 = vmatprep.mubr.msk.f32.mxu1 %vm6188_vm1, %v6189_v10 }
0x1aab   :  { %5522 = vmatpush3.bf16.msra.mxu0 %v6866_v1  ;;  %5528 = vmatpush3.bf16.msra.mxu1 %v6868_v2 }
0x1aac   :  { %5529 = vmatprep.subr.bf16.mxu0 %v6187_v6  ;;  %5535 = vmatprep.subr.bf16.mxu1 %v6187_v6 }
0x1b71   :  { %v5140_v4 = vpop.f32.mrb[16].mxu0  ;;  %v5162_v5 = vpop.f32.mrb[20].mxu1 }
0x1b72   :  { %v2385_v7 = vadd.f32 %v5140_v4, %v4660_v19  ;;  %v2545_v8 = vadd.f32 %v5162_v5, %v4665_v3  ;;  %v2369_v9 = vpop.f32.mrb[17].mxu0  ;;  %v2529_v11 = vpop.f32.mrb[21].mxu1 }
0x1b73   :  { %v2384_v12 = vadd.f32 %v4660_v19, %v2369_v9  ;;  %v2544_v14 = vadd.f32 %v4665_v3, %v2529_v11 }
0x1b74   :  { %2387 = vst.msk [vmem:[#allocation2 + $0x8] sm:$0xff] %vm350_vm2, %v2385_v7  ;;  %2547 = vst.msk [vmem:[#allocation3 + $0x8] sm:$0xff] %vm350_vm2, %v2545_v8 }
0x1b75   :  { %2386 = vst.msk [vmem:[#allocation2] sm:$0xff] %vm350_vm2, %v2384_v12  ;;  %2546 = vst.msk [vmem:[#allocation3] sm:$0xff] %vm350_vm2, %v2544_v14 }
0x1b79   :  { %v2686_v17 = vpop.f32.mrb[22].mxu1  ;;  %v2616_v18 = vpop.f32.mrb[18].mxu0 }
0x1b7a   :  { %v2705_v20 = vadd.f32 %v6898_v15, %v2616_v18  ;;  %v5173_v21 = vpop.f32.mrb[19].mxu0  ;;  %v5184_v22 = vpop.f32.mrb[23].mxu1  ;;  %v2743_v23 = vadd.f32 %v6900_v16, %v2686_v17 }
0x1b7b   :  { %v2549_v24 = vld [vmem:[#allocation3 + $0xe] sm:$0x3]  ;;  %v2777_v4 = vld [vmem:[#allocation3 + $0xc] sm:$0x3] }
0x1b7c   :  { %2745 = vrot.lane.b32.xlu1 %v2743_v23, %s6190_s28  ;;  %2707 = vrot.lane.b32.xlu0 %v2705_v20, %s6190_s28  ;;  %v2548_v25 = vld [vmem:[#allocation2] sm:$0x3]  ;;  %v2728_v27 = vadd.f32 %v2686_v17, %v2549_v24  ;;  %v2776_v5 = vld [vmem:[#allocation2 + $0x2] sm:$0x3] }
0x1b7d   :  { %v2690_v28 = vadd.f32 %v2616_v18, %v2548_v25 }
0x1b7e   :  { %v4668_v30 = vmul.f32 -1.442695, %v2728_v27 }
0x1b7f   :  { %v4666_v31 = vmul.f32 -1.442695, %v2690_v28 }
0x1b80   :  { %5743 = vpow2.f32 %v4668_v30 }
0x1b81   :  { %5745 = vpow2.f32 %v4666_v31 }
0x1b8a   :  { %v5744_v32 = vpop.eup %5743 }
0x1b8b   :  { %v5746_v33 = vpop.eup %5745  ;;  %v2732_v34 = vadd.f32 1.0, %v5744_v32 }
0x1b8c   :  { %v2694_v35 = vadd.f32 1.0, %v5746_v33 }
0x1b8d   :  { %5747 = vrcp.f32 %v2732_v34 }
0x1b8e   :  { %5749 = vrcp.f32 %v2694_v35 }
0x1b97   :  { %v5748_v36 = vpop.eup %5747 }
0x1b98   :  { %v5750_v37 = vpop.eup %5749 }
0x1bee   :  { %v2746_v38 = vpop.permute.xlu1 %2745  ;;  %v2708_v39 = vpop.permute.xlu0 %2707 }
0x1bef   :  { %v2748_v40 = vmul.f32 %v5748_v36, %v2746_v38  ;;  %v2710_v41 = vmul.f32 %v5750_v37, %v2708_v39 }
0x1bf1   :  { %2750 = vrot.lane.b32.xlu1 %v2748_v40, %s6190_s28  ;;  %2712 = vrot.lane.b32.xlu0 %v2710_v41, %s6190_s28 }
0x1c63   :  { %v2751_v46 = vpop.permute.xlu1 %2750  ;;  %v2713_v47 = vpop.permute.xlu0 %2712 }
0x1c64   :  { %v2753_v48 = vadd.f32 %v2751_v46, %v2549_v24  ;;  %v2715_v49 = vadd.f32 %v2713_v47, %v2548_v25 }
0x1c66   :  { %5751 = vtanh.f32 %v2753_v48 }
0x1c67   :  { %5753 = vtanh.f32 %v2715_v49 }
0x1c70   :  { %v5752_v50 = vpop.eup %5751 }
0x1c71   :  { %v5754_v51 = vpop.eup %5753  ;;  %v2755_v42 = vsub.f32 0.0, %v5752_v50 }
0x1c72   :  { %v2717_v52 = vsub.f32 0.0, %v5754_v51 }
0x1c73   :  { %2757 = vrot.lane.b32.xlu1 %v2755_v42, %s6191_s8 }
0x1c74   :  { %2719 = vrot.lane.b32.xlu0 %v2717_v52, %s6191_s8 }
0x1ce5   :  { %v2758_v53 = vpop.permute.xlu1 %2757 }
0x1ce6   :  { %v2760_v54 = vmul.f32 %v5748_v36, %v2758_v53  ;;  %v2720_v44 = vpop.permute.xlu0 %2719 }
0x1ce7   :  { %v2722_v55 = vmul.f32 %v5750_v37, %v2720_v44  ;;  %v2993_v44 = vld [vmem:[#allocation3 + $0xa] sm:$0x3] }
0x1ce8   :  { %2762 = vrot.lane.b32.xlu1 %v2760_v54, %s6192_s16 }
0x1ce9   :  { %2724 = vrot.lane.b32.xlu0 %v2722_v55, %s6192_s16  ;;  %v2992_v55 = vld [vmem:[#allocation2 + $0x4] sm:$0x3] }
0x1d5a   :  { %v2763_v56 = vpop.permute.xlu1 %2762 }
0x1d5b   :  { %v2765_v57 = vadd.f32 %v5752_v50, %v2763_v56  ;;  %v2725_v26 = vpop.permute.xlu0 %2724 }
0x1d5c   :  { %v2727_v58 = vadd.f32 %v5754_v51, %v2725_v26 }
0x1d5d   :  { %2772 = vrot.lane.b32.xlu1 %v2765_v57, %s6190_s28 }
0x1d5e   :  { %2767 = vrot.lane.b32.xlu0 %v2727_v58, %s6190_s28 }
0x1dcf   :  { %v2773_v59 = vpop.permute.xlu1 %2772 }
0x1dd0   :  { %2775 = vst.msk [vmem:[#allocation5 + $0xe] sm:$0x3] %vm665_vm3, %v2773_v59  ;;  %v2768_v62 = vpop.permute.xlu0 %2767  ;;  %5205 = vmatmul.mubr.msk.f32.vlgmr.msra.gmra.mrb[24].mxu1 %vm268_vm0, %v2773_v59 }
0x1dd1   :  { %2770 = vst.msk [vmem:[#allocation4] sm:$0x3] %vm665_vm3, %v2768_v62  ;;  %5194 = vmatmul.mubr.msk.f32.vlgmr.msra.gmra.mrb[20].mxu0 %vm268_vm0, %v2768_v62  ;;  %5537 = vmatpush3.bf16.msra.mxu1 %v6852_v61 }
0x1dd2   :  { %5531 = vmatpush3.bf16.msra.mxu0 %v6850_v60  ;;  %5538 = vmatprep.subr.bf16.mxu1 %v6187_v6 }
0x1dd3   :  { %5532 = vmatprep.subr.bf16.mxu0 %v6187_v6  ;;  %5226 = vmatprep.mubr.msk.f32.mxu1 %vm6188_vm1, %v6189_v10 }
0x1dd4   :  { %5215 = vmatprep.mubr.msk.f32.mxu0 %vm6188_vm1, %v6189_v10 }
0x1dd5   :  { %5540 = vmatpush3.bf16.msra.mxu1 %v6868_v2 }
0x1dd6   :  { %5534 = vmatpush3.bf16.msra.mxu0 %v6866_v1  ;;  %5547 = vmatprep.subr.bf16.mxu1 %v6187_v6 }
0x1dd7   :  { %5541 = vmatprep.subr.bf16.mxu0 %v6187_v6 }
0x1ea3   :  { %v2918_v13 = vpop.f32.mrb[24].mxu1 }
0x1ea4   :  { %v2846_v29 = vpop.f32.mrb[20].mxu0  ;;  %v2959_v63 = vadd.f32 %v2918_v13, %v6900_v16  ;;  %v5206_v0 = vpop.f32.mrb[25].mxu1  ;;  %v2952_v7 = vadd.f32 %v2918_v13, %v2777_v4 }
0x1ea5   :  { %v2929_v19 = vadd.f32 %v2846_v29, %v6898_v15  ;;  %v5195_v3 = vpop.f32.mrb[21].mxu0  ;;  %v2922_v8 = vadd.f32 %v2846_v29, %v2776_v5 }
0x1ea6   :  { %2961 = vrot.lane.b32.xlu1 %v2959_v63, %s6190_s28  ;;  %v4673_v9 = vmul.f32 -1.442695, %v2952_v7 }
0x1ea7   :  { %2931 = vrot.lane.b32.xlu0 %v2929_v19, %s6190_s28  ;;  %v4672_v11 = vmul.f32 -1.442695, %v2922_v8 }
0x1ea8   :  { %5755 = vpow2.f32 %v4673_v9 }
0x1ea9   :  { %5757 = vpow2.f32 %v4672_v11 }
0x1eb2   :  { %v5756_v12 = vpop.eup %5755 }
0x1eb3   :  { %v5758_v14 = vpop.eup %5757  ;;  %v2956_v17 = vadd.f32 1.0, %v5756_v12 }
0x1eb4   :  { %v2926_v18 = vadd.f32 1.0, %v5758_v14 }
0x1eb5   :  { %5759 = vrcp.f32 %v2956_v17 }
0x1eb6   :  { %5761 = vrcp.f32 %v2926_v18 }
0x1ebf   :  { %v5760_v20 = vpop.eup %5759 }
0x1ec0   :  { %v5762_v22 = vpop.eup %5761 }
0x1f18   :  { %v2962_v21 = vpop.permute.xlu1 %2961 }
0x1f19   :  { %v2964_v23 = vmul.f32 %v5760_v20, %v2962_v21  ;;  %v2932_v24 = vpop.permute.xlu0 %2931 }
0x1f1a   :  { %v2934_v25 = vmul.f32 %v5762_v22, %v2932_v24 }
0x1f1b   :  { %2966 = vrot.lane.b32.xlu1 %v2964_v23, %s6190_s28 }
0x1f1c   :  { %2936 = vrot.lane.b32.xlu0 %v2934_v25, %s6190_s28 }
0x1f8d   :  { %v2967_v27 = vpop.permute.xlu1 %2966 }
0x1f8e   :  { %v2969_v28 = vadd.f32 %v2967_v27, %v2777_v4  ;;  %v2937_v30 = vpop.permute.xlu0 %2936 }
0x1f8f   :  { %v2939_v31 = vadd.f32 %v2937_v30, %v2776_v5 }
0x1f90   :  { %5763 = vtanh.f32 %v2969_v28 }
0x1f91   :  { %5765 = vtanh.f32 %v2939_v31 }
0x1f9a   :  { %v5764_v32 = vpop.eup %5763 }
0x1f9b   :  { %v5766_v33 = vpop.eup %5765  ;;  %v2971_v34 = vsub.f32 %v2765_v57, %v5764_v32 }
0x1f9c   :  { %v2941_v35 = vsub.f32 %v2727_v58, %v5766_v33 }
0x1f9d   :  { %2973 = vrot.lane.b32.xlu1 %v2971_v34, %s6191_s8 }
0x1f9e   :  { %2943 = vrot.lane.b32.xlu0 %v2941_v35, %s6191_s8 }
0x200f   :  { %v2974_v36 = vpop.permute.xlu1 %2973 }
0x2010   :  { %v2976_v37 = vmul.f32 %v5760_v20, %v2974_v36  ;;  %v2944_v38 = vpop.permute.xlu0 %2943 }
0x2011   :  { %v2946_v39 = vmul.f32 %v5762_v22, %v2944_v38  ;;  %v3209_v38 = vld [vmem:[#allocation3 + $0x8] sm:$0x3] }
0x2012   :  { %2978 = vrot.lane.b32.xlu1 %v2976_v37, %s6192_s16 }
0x2013   :  { %2948 = vrot.lane.b32.xlu0 %v2946_v39, %s6192_s16  ;;  %v3208_v39 = vld [vmem:[#allocation2 + $0x6] sm:$0x3] }
0x2084   :  { %v2979_v40 = vpop.permute.xlu1 %2978 }
0x2085   :  { %v2981_v41 = vadd.f32 %v5764_v32, %v2979_v40  ;;  %v2949_v46 = vpop.permute.xlu0 %2948 }
0x2086   :  { %v2951_v47 = vadd.f32 %v5766_v33, %v2949_v46 }
0x2087   :  { %2988 = vrot.lane.b32.xlu1 %v2981_v41, %s6190_s28 }
0x2088   :  { %2983 = vrot.lane.b32.xlu0 %v2951_v47, %s6190_s28 }
0x20f9   :  { %v2989_v48 = vpop.permute.xlu1 %2988 }
0x20fa   :  { %2991 = vst.msk [vmem:[#allocation5 + $0xc] sm:$0x3] %vm665_vm3, %v2989_v48  ;;  %v2984_v49 = vpop.permute.xlu0 %2983  ;;  %5227 = vmatmul.mubr.msk.f32.vlgmr.msra.gmra.mrb[26].mxu1 %vm268_vm0, %v2989_v48 }
0x20fb   :  { %2986 = vst.msk [vmem:[#allocation4 + $0x2] sm:$0x3] %vm665_vm3, %v2984_v49  ;;  %5216 = vmatmul.mubr.msk.f32.vlgmr.msra.gmra.mrb[22].mxu0 %vm268_vm0, %v2984_v49  ;;  %5549 = vmatpush3.bf16.msra.mxu1 %v6852_v61 }
0x20fc   :  { %5543 = vmatpush3.bf16.msra.mxu0 %v6850_v60  ;;  %5550 = vmatprep.subr.bf16.mxu1 %v6187_v6 }
0x20fd   :  { %5544 = vmatprep.subr.bf16.mxu0 %v6187_v6  ;;  %5248 = vmatprep.mubr.msk.f32.mxu1 %vm6188_vm1, %v6189_v10 }
0x20fe   :  { %5237 = vmatprep.mubr.msk.f32.mxu0 %vm6188_vm1, %v6189_v10 }
0x20ff   :  { %5552 = vmatpush3.bf16.msra.mxu1 %v6868_v2 }
0x2100   :  { %5546 = vmatpush3.bf16.msra.mxu0 %v6866_v1  ;;  %5559 = vmatprep.subr.bf16.mxu1 %v6187_v6 }
0x2101   :  { %5553 = vmatprep.subr.bf16.mxu0 %v6187_v6 }
0x21cd   :  { %v3134_v50 = vpop.f32.mrb[26].mxu1 }
0x21ce   :  { %v3062_v51 = vpop.f32.mrb[22].mxu0  ;;  %v3175_v42 = vadd.f32 %v3134_v50, %v6900_v16  ;;  %v5228_v52 = vpop.f32.mrb[27].mxu1  ;;  %v3168_v56 = vadd.f32 %v3134_v50, %v2993_v44 }
0x21cf   :  { %v3145_v53 = vadd.f32 %v3062_v51, %v6898_v15  ;;  %v5217_v54 = vpop.f32.mrb[23].mxu0  ;;  %v3138_v57 = vadd.f32 %v3062_v51, %v2992_v55 }
0x21d0   :  { %3177 = vrot.lane.b32.xlu1 %v3175_v42, %s6190_s28  ;;  %v4677_v26 = vmul.f32 -1.442695, %v3168_v56 }
0x21d1   :  { %3147 = vrot.lane.b32.xlu0 %v3145_v53, %s6190_s28  ;;  %v4676_v58 = vmul.f32 -1.442695, %v3138_v57 }
0x21d2   :  { %5767 = vpow2.f32 %v4677_v26 }
0x21d3   :  { %5769 = vpow2.f32 %v4676_v58 }
0x21dc   :  { %v5768_v59 = vpop.eup %5767 }
0x21dd   :  { %v5770_v62 = vpop.eup %5769  ;;  %v3172_v13 = vadd.f32 1.0, %v5768_v59 }
0x21de   :  { %v3142_v29 = vadd.f32 1.0, %v5770_v62 }
0x21df   :  { %5771 = vrcp.f32 %v3172_v13 }
0x21e0   :  { %5773 = vrcp.f32 %v3142_v29 }
0x21e9   :  { %v5772_v63 = vpop.eup %5771 }
0x21ea   :  { %v5774_v19 = vpop.eup %5773 }
0x2242   :  { %v3178_v0 = vpop.permute.xlu1 %3177 }
0x2243   :  { %v3180_v3 = vmul.f32 %v5772_v63, %v3178_v0  ;;  %v3148_v4 = vpop.permute.xlu0 %3147 }
0x2244   :  { %v3150_v5 = vmul.f32 %v5774_v19, %v3148_v4 }
0x2245   :  { %3182 = vrot.lane.b32.xlu1 %v3180_v3, %s6190_s28 }
0x2246   :  { %3152 = vrot.lane.b32.xlu0 %v3150_v5, %s6190_s28 }
0x22b7   :  { %v3183_v7 = vpop.permute.xlu1 %3182 }
0x22b8   :  { %v3185_v8 = vadd.f32 %v3183_v7, %v2993_v44  ;;  %v3153_v9 = vpop.permute.xlu0 %3152 }
0x22b9   :  { %v3155_v11 = vadd.f32 %v3153_v9, %v2992_v55 }
0x22ba   :  { %5775 = vtanh.f32 %v3185_v8 }
0x22bb   :  { %5777 = vtanh.f32 %v3155_v11 }
0x22c4   :  { %v5776_v12 = vpop.eup %5775 }
0x22c5   :  { %v5778_v14 = vpop.eup %5777  ;;  %v3187_v17 = vsub.f32 %v2981_v41, %v5776_v12 }
0x22c6   :  { %v3157_v18 = vsub.f32 %v2951_v47, %v5778_v14 }
0x22c7   :  { %3189 = vrot.lane.b32.xlu1 %v3187_v17, %s6191_s8 }
0x22c8   :  { %3159 = vrot.lane.b32.xlu0 %v3157_v18, %s6191_s8 }
0x2339   :  { %v3190_v20 = vpop.permute.xlu1 %3189 }
0x233a   :  { %v3192_v21 = vmul.f32 %v5772_v63, %v3190_v20  ;;  %v3160_v22 = vpop.permute.xlu0 %3159 }
0x233b   :  { %v3162_v23 = vmul.f32 %v5774_v19, %v3160_v22  ;;  %v3425_v22 = vld [vmem:[#allocation3 + $0x6] sm:$0x3] }
0x233c   :  { %3194 = vrot.lane.b32.xlu1 %v3192_v21, %s6192_s16 }
0x233d   :  { %3164 = vrot.lane.b32.xlu0 %v3162_v23, %s6192_s16  ;;  %v3424_v23 = vld [vmem:[#allocation2 + $0x8] sm:$0x3] }
0x23ae   :  { %v3195_v24 = vpop.permute.xlu1 %3194 }
0x23af   :  { %v3197_v25 = vadd.f32 %v5776_v12, %v3195_v24  ;;  %v3165_v27 = vpop.permute.xlu0 %3164 }
0x23b0   :  { %v3167_v28 = vadd.f32 %v5778_v14, %v3165_v27 }
0x23b1   :  { %3204 = vrot.lane.b32.xlu1 %v3197_v25, %s6190_s28 }
0x23b2   :  { %3199 = vrot.lane.b32.xlu0 %v3167_v28, %s6190_s28 }
0x2423   :  { %v3205_v30 = vpop.permute.xlu1 %3204 }
0x2424   :  { %3207 = vst.msk [vmem:[#allocation5 + $0xa] sm:$0x3] %vm665_vm3, %v3205_v30  ;;  %v3200_v31 = vpop.permute.xlu0 %3199  ;;  %5249 = vmatmul.mubr.msk.f32.vlgmr.msra.gmra.mrb[28].mxu1 %vm268_vm0, %v3205_v30 }
0x2425   :  { %3202 = vst.msk [vmem:[#allocation4 + $0x4] sm:$0x3] %vm665_vm3, %v3200_v31  ;;  %5238 = vmatmul.mubr.msk.f32.vlgmr.msra.gmra.mrb[24].mxu0 %vm268_vm0, %v3200_v31  ;;  %5561 = vmatpush3.bf16.msra.mxu1 %v6852_v61 }
0x2426   :  { %5555 = vmatpush3.bf16.msra.mxu0 %v6850_v60  ;;  %5562 = vmatprep.subr.bf16.mxu1 %v6187_v6 }
0x2427   :  { %5556 = vmatprep.subr.bf16.mxu0 %v6187_v6  ;;  %5270 = vmatprep.mubr.msk.f32.mxu1 %vm6188_vm1, %v6189_v10 }
0x2428   :  { %5259 = vmatprep.mubr.msk.f32.mxu0 %vm6188_vm1, %v6189_v10 }
0x2429   :  { %5564 = vmatpush3.bf16.msra.mxu1 %v6868_v2 }
0x242a   :  { %5558 = vmatpush3.bf16.msra.mxu0 %v6866_v1  ;;  %5571 = vmatprep.subr.bf16.mxu1 %v6187_v6 }
0x242b   :  { %5565 = vmatprep.subr.bf16.mxu0 %v6187_v6 }
0x24f7   :  { %v3350_v32 = vpop.f32.mrb[28].mxu1 }
0x24f8   :  { %v3278_v33 = vpop.f32.mrb[24].mxu0  ;;  %v3391_v34 = vadd.f32 %v3350_v32, %v6900_v16  ;;  %v5250_v35 = vpop.f32.mrb[29].mxu1  ;;  %v3384_v40 = vadd.f32 %v3350_v32, %v3209_v38 }
0x24f9   :  { %v3361_v36 = vadd.f32 %v3278_v33, %v6898_v15  ;;  %v5239_v37 = vpop.f32.mrb[25].mxu0  ;;  %v3354_v41 = vadd.f32 %v3278_v33, %v3208_v39 }
0x24fa   :  { %3393 = vrot.lane.b32.xlu1 %v3391_v34, %s6190_s28  ;;  %v4681_v46 = vmul.f32 -1.442695, %v3384_v40 }
0x24fb   :  { %3363 = vrot.lane.b32.xlu0 %v3361_v36, %s6190_s28  ;;  %v4680_v47 = vmul.f32 -1.442695, %v3354_v41 }
0x24fc   :  { %5779 = vpow2.f32 %v4681_v46 }
0x24fd   :  { %5781 = vpow2.f32 %v4680_v47 }
0x2506   :  { %v5780_v48 = vpop.eup %5779 }
0x2507   :  { %v5782_v49 = vpop.eup %5781  ;;  %v3388_v50 = vadd.f32 1.0, %v5780_v48 }
0x2508   :  { %v3358_v51 = vadd.f32 1.0, %v5782_v49 }
0x2509   :  { %5783 = vrcp.f32 %v3388_v50 }
0x250a   :  { %5785 = vrcp.f32 %v3358_v51 }
0x2513   :  { %v5784_v42 = vpop.eup %5783 }
0x2514   :  { %v5786_v53 = vpop.eup %5785 }
0x256c   :  { %v3394_v52 = vpop.permute.xlu1 %3393 }
0x256d   :  { %v3396_v54 = vmul.f32 %v5784_v42, %v3394_v52  ;;  %v3364_v44 = vpop.permute.xlu0 %3363 }
0x256e   :  { %v3366_v55 = vmul.f32 %v5786_v53, %v3364_v44 }
0x256f   :  { %3398 = vrot.lane.b32.xlu1 %v3396_v54, %s6190_s28 }
0x2570   :  { %3368 = vrot.lane.b32.xlu0 %v3366_v55, %s6190_s28 }
0x25e1   :  { %v3399_v56 = vpop.permute.xlu1 %3398 }
0x25e2   :  { %v3401_v57 = vadd.f32 %v3399_v56, %v3209_v38  ;;  %v3369_v26 = vpop.permute.xlu0 %3368 }
0x25e3   :  { %v3371_v58 = vadd.f32 %v3369_v26, %v3208_v39 }
0x25e4   :  { %5787 = vtanh.f32 %v3401_v57 }
0x25e5   :  { %5789 = vtanh.f32 %v3371_v58 }
0x25ee   :  { %v5788_v59 = vpop.eup %5787 }
0x25ef   :  { %v5790_v62 = vpop.eup %5789  ;;  %v3403_v13 = vsub.f32 %v3197_v25, %v5788_v59 }
0x25f0   :  { %v3373_v29 = vsub.f32 %v3167_v28, %v5790_v62 }
0x25f1   :  { %3405 = vrot.lane.b32.xlu1 %v3403_v13, %s6191_s8 }
0x25f2   :  { %3375 = vrot.lane.b32.xlu0 %v3373_v29, %s6191_s8 }
0x2663   :  { %v3406_v63 = vpop.permute.xlu1 %3405 }
0x2664   :  { %v3408_v0 = vmul.f32 %v5784_v42, %v3406_v63  ;;  %v3376_v19 = vpop.permute.xlu0 %3375 }
0x2665   :  { %v3378_v3 = vmul.f32 %v5786_v53, %v3376_v19  ;;  %v3641_v19 = vld [vmem:[#allocation3 + $0x4] sm:$0x3] }
0x2666   :  { %3410 = vrot.lane.b32.xlu1 %v3408_v0, %s6192_s16 }
0x2667   :  { %3380 = vrot.lane.b32.xlu0 %v3378_v3, %s6192_s16  ;;  %v3640_v3 = vld [vmem:[#allocation2 + $0xa] sm:$0x3] }
0x26d8   :  { %v3411_v4 = vpop.permute.xlu1 %3410 }
0x26d9   :  { %v3413_v5 = vadd.f32 %v5788_v59, %v3411_v4  ;;  %v3381_v7 = vpop.permute.xlu0 %3380 }
0x26da   :  { %v3383_v8 = vadd.f32 %v5790_v62, %v3381_v7 }
0x26db   :  { %3420 = vrot.lane.b32.xlu1 %v3413_v5, %s6190_s28 }
0x26dc   :  { %3415 = vrot.lane.b32.xlu0 %v3383_v8, %s6190_s28 }
0x274d   :  { %v3421_v9 = vpop.permute.xlu1 %3420 }
0x274e   :  { %3423 = vst.msk [vmem:[#allocation5 + $0x8] sm:$0x3] %vm665_vm3, %v3421_v9  ;;  %v3416_v11 = vpop.permute.xlu0 %3415  ;;  %5271 = vmatmul.mubr.msk.f32.vlgmr.msra.gmra.mrb[30].mxu1 %vm268_vm0, %v3421_v9 }
0x274f   :  { %3418 = vst.msk [vmem:[#allocation4 + $0x6] sm:$0x3] %vm665_vm3, %v3416_v11  ;;  %5260 = vmatmul.mubr.msk.f32.vlgmr.msra.gmra.mrb[26].mxu0 %vm268_vm0, %v3416_v11  ;;  %5573 = vmatpush3.bf16.msra.mxu1 %v6852_v61 }
0x2750   :  { %5567 = vmatpush3.bf16.msra.mxu0 %v6850_v60  ;;  %5574 = vmatprep.subr.bf16.mxu1 %v6187_v6 }
0x2751   :  { %5568 = vmatprep.subr.bf16.mxu0 %v6187_v6  ;;  %5292 = vmatprep.mubr.msk.f32.mxu1 %vm6188_vm1, %v6189_v10 }
0x2752   :  { %5281 = vmatprep.mubr.msk.f32.mxu0 %vm6188_vm1, %v6189_v10 }
0x2753   :  { %5576 = vmatpush3.bf16.msra.mxu1 %v6868_v2 }
0x2754   :  { %5570 = vmatpush3.bf16.msra.mxu0 %v6866_v1  ;;  %5583 = vmatprep.subr.bf16.mxu1 %v6187_v6 }
0x2755   :  { %5577 = vmatprep.subr.bf16.mxu0 %v6187_v6 }
0x2821   :  { %v3566_v12 = vpop.f32.mrb[30].mxu1 }
0x2822   :  { %v3494_v14 = vpop.f32.mrb[26].mxu0  ;;  %v3607_v17 = vadd.f32 %v3566_v12, %v6900_v16  ;;  %v5272_v18 = vpop.f32.mrb[31].mxu1  ;;  %v3600_v24 = vadd.f32 %v3566_v12, %v3425_v22 }
0x2823   :  { %v3577_v20 = vadd.f32 %v3494_v14, %v6898_v15  ;;  %v5261_v21 = vpop.f32.mrb[27].mxu0  ;;  %v3570_v25 = vadd.f32 %v3494_v14, %v3424_v23 }
0x2824   :  { %3609 = vrot.lane.b32.xlu1 %v3607_v17, %s6190_s28  ;;  %v4685_v27 = vmul.f32 -1.442695, %v3600_v24 }
0x2825   :  { %3579 = vrot.lane.b32.xlu0 %v3577_v20, %s6190_s28  ;;  %v4684_v28 = vmul.f32 -1.442695, %v3570_v25 }
0x2826   :  { %5791 = vpow2.f32 %v4685_v27 }
0x2827   :  { %5793 = vpow2.f32 %v4684_v28 }
0x2830   :  { %v5792_v30 = vpop.eup %5791 }
0x2831   :  { %v5794_v31 = vpop.eup %5793  ;;  %v3604_v32 = vadd.f32 1.0, %v5792_v30 }
0x2832   :  { %v3574_v33 = vadd.f32 1.0, %v5794_v31 }
0x2833   :  { %5795 = vrcp.f32 %v3604_v32 }
0x2834   :  { %5797 = vrcp.f32 %v3574_v33 }
0x283d   :  { %v5796_v34 = vpop.eup %5795 }
0x283e   :  { %v5798_v36 = vpop.eup %5797 }
0x2896   :  { %v3610_v35 = vpop.permute.xlu1 %3609 }
0x2897   :  { %v3612_v37 = vmul.f32 %v5796_v34, %v3610_v35  ;;  %v3580_v38 = vpop.permute.xlu0 %3579 }
0x2898   :  { %v3582_v39 = vmul.f32 %v5798_v36, %v3580_v38 }
0x2899   :  { %3614 = vrot.lane.b32.xlu1 %v3612_v37, %s6190_s28 }
0x289a   :  { %3584 = vrot.lane.b32.xlu0 %v3582_v39, %s6190_s28 }
0x290b   :  { %v3615_v40 = vpop.permute.xlu1 %3614 }
0x290c   :  { %v3617_v41 = vadd.f32 %v3615_v40, %v3425_v22  ;;  %v3585_v46 = vpop.permute.xlu0 %3584 }
0x290d   :  { %v3587_v47 = vadd.f32 %v3585_v46, %v3424_v23 }
0x290e   :  { %5799 = vtanh.f32 %v3617_v41 }
0x290f   :  { %5801 = vtanh.f32 %v3587_v47 }
0x2918   :  { %v5800_v48 = vpop.eup %5799 }
0x2919   :  { %v5802_v49 = vpop.eup %5801  ;;  %v3619_v50 = vsub.f32 %v3413_v5, %v5800_v48 }
0x291a   :  { %v3589_v51 = vsub.f32 %v3383_v8, %v5802_v49 }
0x291b   :  { %3621 = vrot.lane.b32.xlu1 %v3619_v50, %s6191_s8 }
0x291c   :  { %3591 = vrot.lane.b32.xlu0 %v3589_v51, %s6191_s8 }
0x298d   :  { %v3622_v42 = vpop.permute.xlu1 %3621 }
0x298e   :  { %v3624_v52 = vmul.f32 %v5796_v34, %v3622_v42  ;;  %v3592_v53 = vpop.permute.xlu0 %3591  ;;  %v3856_v42 = vld [vmem:[#allocation2 + $0xc] sm:$0x3] }
0x298f   :  { %v3594_v54 = vmul.f32 %v5798_v36, %v3592_v53 }
0x2990   :  { %3626 = vrot.lane.b32.xlu1 %v3624_v52, %s6192_s16 }
0x2991   :  { %3596 = vrot.lane.b32.xlu0 %v3594_v54, %s6192_s16 }
0x2a02   :  { %v3627_v44 = vpop.permute.xlu1 %3626 }
0x2a03   :  { %v3629_v55 = vadd.f32 %v5800_v48, %v3627_v44  ;;  %v3597_v56 = vpop.permute.xlu0 %3596 }
0x2a04   :  { %v3599_v57 = vadd.f32 %v5802_v49, %v3597_v56 }
0x2a05   :  { %3636 = vrot.lane.b32.xlu1 %v3629_v55, %s6190_s28 }
0x2a06   :  { %3631 = vrot.lane.b32.xlu0 %v3599_v57, %s6190_s28 }
0x2a77   :  { %v3637_v26 = vpop.permute.xlu1 %3636 }
0x2a78   :  { %3639 = vst.msk [vmem:[#allocation5 + $0x6] sm:$0x3] %vm665_vm3, %v3637_v26  ;;  %v3632_v58 = vpop.permute.xlu0 %3631  ;;  %5293 = vmatmul.mubr.msk.f32.vlgmr.msra.gmra.mrb[32].mxu1 %vm268_vm0, %v3637_v26 }
0x2a79   :  { %3634 = vst.msk [vmem:[#allocation4 + $0x8] sm:$0x3] %vm665_vm3, %v3632_v58  ;;  %5282 = vmatmul.mubr.msk.f32.vlgmr.msra.gmra.mrb[28].mxu0 %vm268_vm0, %v3632_v58  ;;  %5585 = vmatpush3.bf16.msra.mxu1 %v6852_v61 }
0x2a7a   :  { %5579 = vmatpush3.bf16.msra.mxu0 %v6850_v60  ;;  %5586 = vmatprep.subr.bf16.mxu1 %v6187_v6 }
0x2a7b   :  { %5580 = vmatprep.subr.bf16.mxu0 %v6187_v6  ;;  %5314 = vmatprep.mubr.msk.f32.mxu1 %vm6188_vm1, %v6189_v10 }
0x2a7c   :  { %5303 = vmatprep.mubr.msk.f32.mxu0 %vm6188_vm1, %v6189_v10 }
0x2a7d   :  { %5588 = vmatpush3.bf16.msra.mxu1 %v6868_v2 }
0x2a7e   :  { %5582 = vmatpush3.bf16.msra.mxu0 %v6866_v1  ;;  %5595 = vmatprep.subr.bf16.mxu1 %v6187_v6 }
0x2a7f   :  { %5589 = vmatprep.subr.bf16.mxu0 %v6187_v6 }
0x2b4b   :  { %v3782_v59 = vpop.f32.mrb[32].mxu1 }
0x2b4c   :  { %v3710_v62 = vpop.f32.mrb[28].mxu0  ;;  %v3823_v13 = vadd.f32 %v3782_v59, %v6900_v16  ;;  %v5294_v29 = vpop.f32.mrb[33].mxu1  ;;  %v3816_v4 = vadd.f32 %v3782_v59, %v3641_v19 }
0x2b4d   :  { %v3793_v63 = vadd.f32 %v3710_v62, %v6898_v15  ;;  %v5283_v0 = vpop.f32.mrb[29].mxu0  ;;  %v3786_v5 = vadd.f32 %v3710_v62, %v3640_v3 }
0x2b4e   :  { %3825 = vrot.lane.b32.xlu1 %v3823_v13, %s6190_s28  ;;  %v4689_v7 = vmul.f32 -1.442695, %v3816_v4 }
0x2b4f   :  { %3795 = vrot.lane.b32.xlu0 %v3793_v63, %s6190_s28  ;;  %v4688_v8 = vmul.f32 -1.442695, %v3786_v5 }
0x2b50   :  { %5803 = vpow2.f32 %v4689_v7 }
0x2b51   :  { %5805 = vpow2.f32 %v4688_v8 }
0x2b5a   :  { %v5804_v9 = vpop.eup %5803 }
0x2b5b   :  { %v5806_v11 = vpop.eup %5805  ;;  %v3820_v12 = vadd.f32 1.0, %v5804_v9 }
0x2b5c   :  { %v3790_v14 = vadd.f32 1.0, %v5806_v11 }
0x2b5d   :  { %5807 = vrcp.f32 %v3820_v12 }
0x2b5e   :  { %5809 = vrcp.f32 %v3790_v14 }
0x2b67   :  { %v5808_v17 = vpop.eup %5807 }
0x2b68   :  { %v5810_v20 = vpop.eup %5809 }
0x2bc0   :  { %v3826_v18 = vpop.permute.xlu1 %3825 }
0x2bc1   :  { %v3828_v21 = vmul.f32 %v5808_v17, %v3826_v18  ;;  %v3796_v22 = vpop.permute.xlu0 %3795 }
0x2bc2   :  { %v3798_v23 = vmul.f32 %v5810_v20, %v3796_v22 }
0x2bc3   :  { %3830 = vrot.lane.b32.xlu1 %v3828_v21, %s6190_s28 }
0x2bc4   :  { %3800 = vrot.lane.b32.xlu0 %v3798_v23, %s6190_s28 }
0x2c35   :  { %v3831_v24 = vpop.permute.xlu1 %3830 }
0x2c36   :  { %v3833_v25 = vadd.f32 %v3831_v24, %v3641_v19  ;;  %v3801_v27 = vpop.permute.xlu0 %3800 }
0x2c37   :  { %v3803_v28 = vadd.f32 %v3801_v27, %v3640_v3 }
0x2c38   :  { %5811 = vtanh.f32 %v3833_v25 }
0x2c39   :  { %5813 = vtanh.f32 %v3803_v28 }
0x2c42   :  { %v5812_v30 = vpop.eup %5811 }
0x2c43   :  { %v5814_v31 = vpop.eup %5813  ;;  %v3835_v32 = vsub.f32 %v3629_v55, %v5812_v30 }
0x2c44   :  { %v3805_v33 = vsub.f32 %v3599_v57, %v5814_v31 }
0x2c45   :  { %3837 = vrot.lane.b32.xlu1 %v3835_v32, %s6191_s8 }
0x2c46   :  { %3807 = vrot.lane.b32.xlu0 %v3805_v33, %s6191_s8 }
0x2cb7   :  { %v3838_v34 = vpop.permute.xlu1 %3837 }
0x2cb8   :  { %v3840_v35 = vmul.f32 %v5808_v17, %v3838_v34  ;;  %v3808_v36 = vpop.permute.xlu0 %3807 }
0x2cb9   :  { %v3810_v37 = vmul.f32 %v5810_v20, %v3808_v36 }
0x2cba   :  { %3842 = vrot.lane.b32.xlu1 %v3840_v35, %s6192_s16 }
0x2cbb   :  { %3812 = vrot.lane.b32.xlu0 %v3810_v37, %s6192_s16 }
0x2d2c   :  { %v3843_v38 = vpop.permute.xlu1 %3842 }
0x2d2d   :  { %v3845_v39 = vadd.f32 %v5812_v30, %v3843_v38  ;;  %v3813_v40 = vpop.permute.xlu0 %3812  ;;  %v4073_v30 = vld [vmem:[#allocation3] sm:$0x3] }
0x2d2e   :  { %v3815_v41 = vadd.f32 %v5814_v31, %v3813_v40  ;;  %v4072_v31 = vld [vmem:[#allocation2 + $0xe] sm:$0x3] }
0x2d2f   :  { %3852 = vrot.lane.b32.xlu1 %v3845_v39, %s6190_s28 }
0x2d30   :  { %3847 = vrot.lane.b32.xlu0 %v3815_v41, %s6190_s28 }
0x2da1   :  { %v3853_v46 = vpop.permute.xlu1 %3852 }
0x2da2   :  { %3855 = vst.msk [vmem:[#allocation5 + $0x4] sm:$0x3] %vm665_vm3, %v3853_v46  ;;  %v3848_v47 = vpop.permute.xlu0 %3847  ;;  %5315 = vmatmul.mubr.msk.f32.vlgmr.msra.gmra.mrb[34].mxu1 %vm268_vm0, %v3853_v46 }
0x2da3   :  { %3850 = vst.msk [vmem:[#allocation4 + $0xa] sm:$0x3] %vm665_vm3, %v3848_v47  ;;  %5304 = vmatmul.mubr.msk.f32.vlgmr.msra.gmra.mrb[30].mxu0 %vm268_vm0, %v3848_v47  ;;  %5597 = vmatpush3.bf16.msra.mxu1 %v6852_v61 }
0x2da4   :  { %5591 = vmatpush3.bf16.msra.mxu0 %v6850_v60  ;;  %5598 = vmatprep.subr.bf16.mxu1 %v6187_v6 }
0x2da5   :  { %5592 = vmatprep.subr.bf16.mxu0 %v6187_v6  ;;  %5336 = vmatprep.mubr.msk.f32.mxu1 %vm6188_vm1, %v6189_v10  ;;  %v3857_v6 = vld [vmem:[#allocation3 + $0x2] sm:$0x3] }
0x2da6   :  { %5325 = vmatprep.mubr.msk.f32.mxu0 %vm6188_vm1, %v6189_v10 }
0x2da7   :  { %5600 = vmatpush3.bf16.msra.mxu1 %v6868_v2 }
0x2da8   :  { %5594 = vmatpush3.bf16.msra.mxu0 %v6866_v1 }
0x2e75   :  { %v3998_v48 = vpop.f32.mrb[34].mxu1 }
0x2e76   :  { %v3926_v49 = vpop.f32.mrb[30].mxu0  ;;  %v4039_v61 = vadd.f32 %v3998_v48, %v6900_v16  ;;  %v5316_v50 = vpop.f32.mrb[35].mxu1  ;;  %v4032_v52 = vadd.f32 %v3998_v48, %v3857_v6 }
0x2e77   :  { %v4009_v60 = vadd.f32 %v3926_v49, %v6898_v15  ;;  %v5305_v51 = vpop.f32.mrb[31].mxu0  ;;  %v4002_v10 = vadd.f32 %v3926_v49, %v3856_v42 }
0x2e78   :  { %4041 = vrot.lane.b32.xlu1 %v4039_v61, %s6190_s28  ;;  %v4693_v53 = vmul.f32 -1.442695, %v4032_v52 }
0x2e79   :  { %4011 = vrot.lane.b32.xlu0 %v4009_v60, %s6190_s28  ;;  %v4692_v2 = vmul.f32 -1.442695, %v4002_v10 }
0x2e7a   :  { %5815 = vpow2.f32 %v4693_v53 }
0x2e7b   :  { %5817 = vpow2.f32 %v4692_v2 }
0x2e84   :  { %v5816_v1 = vpop.eup %5815 }
0x2e85   :  { %v5818_v54 = vpop.eup %5817  ;;  %v4036_v44 = vadd.f32 1.0, %v5816_v1 }
0x2e86   :  { %v4006_v55 = vadd.f32 1.0, %v5818_v54  ;;  %v4487_v54 = vstv %s4704_s13 }
0x2e87   :  { %5819 = vrcp.f32 %v4036_v44  ;;  %v4552_v44 = vstv %s4711_s21 }
0x2e88   :  { %5821 = vrcp.f32 %v4006_v55 }
0x2e91   :  { %v5820_v56 = vpop.eup %5819 }
0x2e92   :  { %v5822_v26 = vpop.eup %5821 }
0x2eea   :  { %v4042_v57 = vpop.permute.xlu1 %4041 }
0x2eeb   :  { %v4044_v58 = vmul.f32 %v5820_v56, %v4042_v57  ;;  %v4012_v59 = vpop.permute.xlu0 %4011 }
0x2eec   :  { %v4014_v62 = vmul.f32 %v5822_v26, %v4012_v59 }
0x2eed   :  { %4046 = vrot.lane.b32.xlu1 %v4044_v58, %s6190_s28  ;;  %v4556_v58 = vstv %s4712_s4 }
0x2eee   :  { %4016 = vrot.lane.b32.xlu0 %v4014_v62, %s6190_s28 }
0x2f5f   :  { %v4047_v13 = vpop.permute.xlu1 %4046 }
0x2f60   :  { %v4049_v29 = vadd.f32 %v4047_v13, %v3857_v6  ;;  %v4017_v63 = vpop.permute.xlu0 %4016 }
0x2f61   :  { %v4019_v0 = vadd.f32 %v4017_v63, %v3856_v42 }
0x2f62   :  { %5823 = vtanh.f32 %v4049_v29 }
0x2f63   :  { %5825 = vtanh.f32 %v4019_v0 }
0x2f6c   :  { %v5824_v19 = vpop.eup %5823 }
0x2f6d   :  { %v5826_v3 = vpop.eup %5825  ;;  %v4051_v4 = vsub.f32 %v3845_v39, %v5824_v19 }
0x2f6e   :  { %v4021_v5 = vsub.f32 %v3815_v41, %v5826_v3 }
0x2f6f   :  { %4053 = vrot.lane.b32.xlu1 %v4051_v4, %s6191_s8 }
0x2f70   :  { %4023 = vrot.lane.b32.xlu0 %v4021_v5, %s6191_s8 }
0x2fe1   :  { %v4054_v7 = vpop.permute.xlu1 %4053 }
0x2fe2   :  { %v4056_v8 = vmul.f32 %v5820_v56, %v4054_v7  ;;  %v4024_v9 = vpop.permute.xlu0 %4023 }
0x2fe3   :  { %v4026_v11 = vmul.f32 %v5822_v26, %v4024_v9  ;;  %v4491_v26 = vstv %s4705_s30 }
0x2fe4   :  { %4058 = vrot.lane.b32.xlu1 %v4056_v8, %s6192_s16 }
0x2fe5   :  { %4028 = vrot.lane.b32.xlu0 %v4026_v11, %s6192_s16  ;;  %v4298_v11 = vld [vmem:[%s7182_s18 + $0x10] sm:$0xff] }
0x3056   :  { %v4059_v12 = vpop.permute.xlu1 %4058 }
0x3057   :  { %v4061_v14 = vadd.f32 %v5824_v19, %v4059_v12  ;;  %v4029_v17 = vpop.permute.xlu0 %4028  ;;  %v4299_v12 = vld [vmem:[%s7182_s18 + $0x18] sm:$0xff] }
0x3058   :  { %v4031_v18 = vadd.f32 %v5826_v3, %v4029_v17  ;;  %v4290_v17 = vld [vmem:[%s7181_s17] sm:$0xff] }
0x3059   :  { %4068 = vrot.lane.b32.xlu1 %v4061_v14, %s6190_s28 }
0x305a   :  { %4063 = vrot.lane.b32.xlu0 %v4031_v18, %s6190_s28 }
0x30cb   :  { %v4069_v20 = vpop.permute.xlu1 %4068 }
0x30cc   :  { %4071 = vst.msk [vmem:[#allocation5 + $0x2] sm:$0x3] %vm665_vm3, %v4069_v20  ;;  %v4064_v21 = vpop.permute.xlu0 %4063  ;;  %5337 = vmatmul.mubr.msk.f32.vlgmr.msra.gmra.mrb[36].mxu1 %vm268_vm0, %v4069_v20 }
0x30cd   :  { %4066 = vst.msk [vmem:[#allocation4 + $0xc] sm:$0x3] %vm665_vm3, %v4064_v21  ;;  %5326 = vmatmul.mubr.msk.f32.vlgmr.msra.gmra.mrb[32].mxu0 %vm268_vm0, %v4064_v21 }
0x319f   :  { %v4214_v22 = vpop.f32.mrb[36].mxu1 }
0x31a0   :  { %v4142_v23 = vpop.f32.mrb[32].mxu0  ;;  %v4255_v24 = vadd.f32 %v4214_v22, %v6900_v16  ;;  %v5338_v25 = vpop.f32.mrb[37].mxu1  ;;  %v4248_v32 = vadd.f32 %v4214_v22, %v4073_v30 }
0x31a1   :  { %v4225_v27 = vadd.f32 %v4142_v23, %v6898_v15  ;;  %v5327_v28 = vpop.f32.mrb[33].mxu0  ;;  %v4218_v33 = vadd.f32 %v4142_v23, %v4072_v31 }
0x31a2   :  { %4257 = vrot.lane.b32.xlu1 %v4255_v24, %s6190_s28  ;;  %v4697_v34 = vmul.f32 -1.442695, %v4248_v32 }
0x31a3   :  { %4227 = vrot.lane.b32.xlu0 %v4225_v27, %s6190_s28  ;;  %v4696_v35 = vmul.f32 -1.442695, %v4218_v33  ;;  %v4292_v33 = vld [vmem:[%s7181_s17 + $0x10] sm:$0xff] }
0x31a4   :  { %5827 = vpow2.f32 %v4697_v34  ;;  %v4293_v34 = vld [vmem:[%s7181_s17 + $0x18] sm:$0xff] }
0x31a5   :  { %5829 = vpow2.f32 %v4696_v35 }
0x31ae   :  { %v5828_v36 = vpop.eup %5827 }
0x31af   :  { %v5830_v37 = vpop.eup %5829  ;;  %v4252_v38 = vadd.f32 1.0, %v5828_v36  ;;  %v5613_v36 = vpack.c.bf16 %v4293_v34, %v4292_v33 }
0x31b0   :  { %v4222_v16 = vadd.f32 1.0, %v5830_v37  ;;  %v4295_v37 = vld [vmem:[#allocation5 + $0x8] sm:$0xff] }
0x31b1   :  { %5831 = vrcp.f32 %v4252_v38  ;;  %v4288_v38 = vld [vmem:[#allocation4] sm:$0xff] }
0x31b2   :  { %5833 = vrcp.f32 %v4222_v16 }
0x31bb   :  { %v5832_v15 = vpop.eup %5831 }
0x31bc   :  { %v5834_v40 = vpop.eup %5833 }
0x3214   :  { %v4258_v39 = vpop.permute.xlu1 %4257 }
0x3215   :  { %v4260_v41 = vmul.f32 %v5832_v15, %v4258_v39  ;;  %v4228_v46 = vpop.permute.xlu0 %4227 }
0x3216   :  { %v4230_v47 = vmul.f32 %v5834_v40, %v4228_v46  ;;  %v4707_v46 = vld [vmem:[#allocation26] ss:$0 sm:$0xff] }
0x3217   :  { %4262 = vrot.lane.b32.xlu1 %v4260_v41, %s6190_s28 }
0x3218   :  { %4232 = vrot.lane.b32.xlu0 %v4230_v47, %s6190_s28  ;;  %v4706_v47 = vld [vmem:[#allocation25] ss:$0 sm:$0xff] }
0x3289   :  { %v4263_v48 = vpop.permute.xlu1 %4262 }
0x328a   :  { %v4265_v49 = vadd.f32 %v4263_v48, %v4073_v30  ;;  %v4233_v61 = vpop.permute.xlu0 %4232  ;;  %v4702_v48 = vld [vmem:[#allocation23] ss:$0 sm:$0xff] }
0x328b   :  { %v4235_v50 = vadd.f32 %v4233_v61, %v4072_v31 }
0x328c   :  { %5835 = vtanh.f32 %v4265_v49 }
0x328d   :  { %5837 = vtanh.f32 %v4235_v50 }
0x3296   :  { %v5836_v60 = vpop.eup %5835 }
0x3297   :  { %v5838_v51 = vpop.eup %5837  ;;  %v4267_v6 = vsub.f32 %v4061_v14, %v5836_v60  ;;  %v5605_v14 = vpack.c.bf16 %v4299_v12, %v4298_v11 }
0x3298   :  { %v4237_v42 = vsub.f32 %v4031_v18, %v5838_v51  ;;  %v4291_v18 = vld [vmem:[%s7181_s17 + $0x8] sm:$0xff] }
0x3299   :  { %4269 = vrot.lane.b32.xlu1 %v4267_v6, %s6191_s8  ;;  %v5609_v20 = vpack.c.bf16 %v4291_v18, %v4290_v17 }
0x329a   :  { %4239 = vrot.lane.b32.xlu0 %v4237_v42, %s6191_s8 }
0x330b   :  { %v4270_v52 = vpop.permute.xlu1 %4269 }
0x330c   :  { %v4272_v10 = vmul.f32 %v5832_v15, %v4270_v52  ;;  %v4240_v53 = vpop.permute.xlu0 %4239 }
0x330d   :  { %v4242_v2 = vmul.f32 %v5834_v40, %v4240_v53 }
0x330e   :  { %4274 = vrot.lane.b32.xlu1 %v4272_v10, %s6192_s16 }
0x330f   :  { %4244 = vrot.lane.b32.xlu0 %v4242_v2, %s6192_s16 }
0x3380   :  { %v4275_v1 = vpop.permute.xlu1 %4274 }
0x3381   :  { %v4245_v55 = vpop.permute.xlu0 %4244  ;;  %v4277_v56 = vadd.f32 %v5836_v60, %v4275_v1 }
0x3382   :  { %v4247_v57 = vadd.f32 %v5838_v51, %v4245_v55 }
0x3383   :  { %v4492_v13 = vmul.f32 %v4491_v26, %v4277_v56  ;;  %v4557_v29 = vmul.f32 %v4556_v58, %v4277_v56 }
0x3384   :  { %v4488_v59 = vmul.f32 %v4487_v54, %v4247_v57  ;;  %v4553_v62 = vmul.f32 %v4552_v44, %v4247_v57 }
0x3386   :  { %v4489_v63 = vadd.f32 %v4488_v59, %v6818_v43  ;;  %v4554_v0 = vadd.f32 %v4553_v62, %v6820_v45  ;;  %v4296_v43 = vld [vmem:[%s7182_s18] sm:$0xff]  ;;  %v4297_v45 = vld [vmem:[%s7182_s18 + $0x8] sm:$0xff] }
0x3387   :  { %v5601_v9 = vpack.c.bf16 %v4297_v45, %v4296_v43 }
0x3388   :  { %v4558_v19 = vadd.f32 %v4557_v29, %v4554_v0  ;;  %v4493_v3 = vadd.f32 %v4492_v13, %v4489_v63 }
0x3389   :  { %5602 = vmatprep.subr.bf16.mxu0 %v5601_v9 }
0x338a   :  { %4560 = vrot.lane.b32.xlu1 %v4558_v19, %s6190_s28  ;;  %4495 = vrot.lane.b32.xlu0 %v4493_v3, %s6190_s28 }
0x338b   :  { %5604 = vmatpush3.bf16.msra.mxu0 %v5601_v9 }
0x338c   :  { %5606 = vmatprep.subr.bf16.mxu0 %v5605_v14 }
0x338f   :  { %5608 = vmatpush3.bf16.msra.mxu0 %v5605_v14 }
0x3390   :  { %5610 = vmatprep.subr.bf16.mxu0 %v5609_v20 }
0x33fc   :  { %v4561_v4 = vpop.permute.xlu1 %4560  ;;  %v4496_v5 = vpop.permute.xlu0 %4495 }
0x33fd   :  { %v4563_v7 = vsel %vm665_vm3, %v4561_v4, 0.0  ;;  %v4498_v8 = vsel %vm665_vm3, %v4496_v5, 0.0 }
0x33fe   :  { %4564 = vadd.xlane.f32.xlu1 %v4563_v7  ;;  %4499 = vadd.xlane.f32.xlu0 %v4498_v8 }
0x340f   :  { %4279 = vrot.lane.b32.xlu1 %v4247_v57, %s6190_s28 }
0x3414   :  { %4284 = vrot.lane.b32.xlu0 %v4277_v56, %s6190_s28 }
0x348b   :  { %v4565_v21 = vpop.xlane.xlu1 %4564  ;;  %v4500_v22 = vpop.xlane.xlu0 %4499 }
0x348c   :  { %v4566_v23 = vmul.f32 0.03125, %v4565_v21  ;;  %v4502_v24 = vmul.f32 0.03125, %v4500_v22 }
0x348e   :  { %v4567_v25 = vsub.f32 %v4558_v19, %v4566_v23  ;;  %v4503_v27 = vsub.f32 %v4493_v3, %v4502_v24 }
0x348f   :  { %v4280_v28 = vpop.permute.xlu1 %4279  ;;  %v4285_v30 = vpop.permute.xlu0 %4284 }
0x3490   :  { %v4568_v31 = vmul.f32 %v4567_v25, %v4567_v25  ;;  %v4504_v32 = vmul.f32 %v4503_v27, %v4503_v27  ;;  %4282 = vst.msk [vmem:[#allocation4 + $0xe] sm:$0x3] %vm665_vm3, %v4280_v28  ;;  %4287 = vst.msk [vmem:[#allocation5] sm:$0x3] %vm665_vm3, %v4285_v30 }
0x3492   :  { %4570 = vrot.lane.b32.xlu1 %v4568_v31, %s6190_s28  ;;  %4506 = vrot.lane.b32.xlu0 %v4504_v32, %s6190_s28 }
0x3497   :  { %v4294_v35 = vld [vmem:[#allocation5] sm:$0xff]  ;;  %v4289_v16 = vld [vmem:[#allocation4 + $0x8] sm:$0xff] }
0x3498   :  { %5347 = vmatprep.mubr.msk.f32.mxu0 %vm268_vm0, %v4294_v35 }
0x3499   :  { %5348 = vmatmul.mubr.msk.f32.vlgmr.msra.gmra.mrb[34].mxu0 %vm268_vm0, %v4295_v37 }
0x349a   :  { %5612 = vmatpush3.bf16.msra.mxu0 %v5609_v20  ;;  %5358 = vmatprep.mubr.msk.f32.mxu0 %vm268_vm0, %v4288_v38 }
0x349b   :  { %5614 = vmatprep.subr.bf16.mxu0 %v5613_v36 }
0x349e   :  { %5616 = vmatpush3.bf16.msra.mxu0 %v5613_v36 }
0x34a1   :  { %5359 = vmatmul.mubr.msk.f32.vlgmr.msra.gmra.mrb[34].mxu0 %vm268_vm0, %v4289_v16 }
0x3504   :  { %v4571_v15 = vpop.permute.xlu1 %4570  ;;  %v4507_v39 = vpop.permute.xlu0 %4506 }
0x3505   :  { %v4573_v40 = vsel %vm665_vm3, %v4571_v15, 0.0  ;;  %v4509_v41 = vsel %vm665_vm3, %v4507_v39, 0.0 }
0x3506   :  { %4574 = vadd.xlane.f32.xlu1 %v4573_v40  ;;  %4510 = vadd.xlane.f32.xlu0 %v4509_v41 }
0x3517   :  { %4530 = vrot.lane.b32.xlu1 %v4707_v46, %s6190_s28 }
0x351c   :  { %4521 = vrot.lane.b32.xlu0 %v4706_v47, %s6190_s28 }
0x3574   :  { %v5360_v49 = vpop.f32.mrb[34].mxu0 }
0x3575   :  { %v4470_v61 = vadd.f32 %v5360_v49, %v4702_v48  ;;  %v4453_v50 = vpop.f32.mrb[35].mxu0 }
0x3576   :  { %v4469_v60 = vadd.f32 %v4702_v48, %v4453_v50 }
0x3577   :  { %4472 = vst.msk [vmem:[%s7188_s24 + $0x8] sm:$0xff] %vm268_vm0, %v4470_v61 }
0x3578   :  { %4471 = vst.msk [vmem:[%s7188_s24] sm:$0xff] %vm268_vm0, %v4469_v60  ;;  %s6193_s24 = smov [#allocation30]  }
0x3579   :  { %s4596_s29 = sshll.u32 %s6193_s24, 4  ;;  %s4597_s29 = int_to_ptr.vmem [resolvable:$true] %s4596_s29 }
0x357a   :  { %s6129_s0 = scalar_lea.vmem %s4597_s29, 64  ;;  %p6134_p7 = scmp.lt.s32.totalorder %s4597_s29, %s4597_s29 }
0x357b   :  { %p6130_p6 = scmp.ne.s32.totalorder %s4597_s29, %s6129_s0  ;;  %p6135_p8 = scmp.lt.s32.totalorder %s6129_s0, %s6129_s0 }
0x357d   :  { %p6136_p9 = por %p6135_p8, %p6134_p7 }
0x357f   :  { %p6137_p10 = pnand %p6136_p9, %p6130_p6 }
0x3593   :  { %v4575_v51 = vpop.xlane.xlu1 %4574  ;;  %v4511_v6 = vpop.xlane.xlu0 %4510 }
0x3594   :  { %v4576_v42 = vmul.f32 0.03125, %v4575_v51  ;;  %v4512_v52 = vmul.f32 0.03125, %v4511_v6 }
0x3596   :  { %v4577_v10 = vadd.f32 1e-05, %v4576_v42  ;;  %v4513_v53 = vadd.f32 1e-05, %v4512_v52 }
0x3597   :  { %v4522_v1 = vpop.permute.xlu0 %4521  ;;  %v4531_v56 = vpop.permute.xlu1 %4530 }
0x3598   :  { %5839 = vrsqrt.f32 %v4577_v10 }
0x3599   :  { %5841 = vrsqrt.f32 %v4513_v53 }
0x35a2   :  { %v5840_v2 = vpop.eup %5839 }
0x35a3   :  { %v5842_v54 = vpop.eup %5841  ;;  %v4579_v44 = vmul.f32 %v5840_v2, %v4567_v25 }
0x35a4   :  { %v4515_v55 = vmul.f32 %v5842_v54, %v4503_v27 }
0x35a5   :  { %v4580_v57 = vmul.f32 %v4579_v44, %v4522_v1 }
0x35a6   :  { %v4524_v26 = vmul.f32 %v4522_v1, %v4515_v55 }
0x35a7   :  { %v4581_v58 = vadd.f32 %v4580_v57, %v4531_v56 }
0x35a8   :  { %v4533_v59 = vadd.f32 %v4531_v56, %v4524_v26 }
0x35a9   :  { %v4582_v62 = vmax.f32 %v4581_v58, 0.0 }
0x35aa   :  { %v4534_v13 = vmax.f32 %v4533_v59, 0.0 }
0x35ab   :  { %4584 = vrot.lane.b32.xlu1 %v4582_v62, %s6190_s28 }
0x35ac   :  { %4536 = vrot.lane.b32.xlu0 %v4534_v13, %s6190_s28 }
0x361d   :  { %v4585_v29 = vpop.permute.xlu1 %4584 }
0x361e   :  { %v4537_v63 = vpop.permute.xlu0 %4536  ;;  %4588 = vst.msk [vmem:[#allocation30 + $0x2] sm:$0x3] %vm665_vm3, %v4585_v29 }
0x361f   :  { %4539 = vst.msk [vmem:[#allocation30] sm:$0x3] %vm665_vm3, %v4537_v63 }
0x3620   :  { %6140 = shalt.err (!%p6137_p10)
}
0x3621   :  { %s6141_s28 = scalar_lea.hbm %s7189_s25, 64 }
0x3622   :  { %p6142_p11 = scmp.ne.s32.totalorder %s7189_s25, %s6141_s28  ;;  %p6145_p12 = scmp.lt.u32.totalorder %s6141_s28, %s7189_s25 }
0x3624   :  { %p6147_p13 = pnand %p6145_p12, %p6142_p11 }
0x3626   :  { %6150 = shalt.err (!%p6147_p13)
}
0x3627   :  { %s6194_s23 = smov 2  }
0x3628   :  { %4602 = dma.vmem_to_hbm [thread:$0]  %s4597_s29, 64, %s7189_s25, [#allocation8], %s6192_s16, %s6192_s16, %s6194_s23  }
0x3629   :  { %6169 = dma.done.wait [#allocation8], 64  }
0x362a   :  { %6170 = vsyncadd [#allocation8], 4294967232 }
0x362b   :  { %4608 = vsyncpa [#allocation7], 1 }
0x362c   :  { %4609 = vsyncpa [#allocation12], 1 }
0x362d   :  { %4610 = vsyncpa [#allocation15], 1 }
0x362e   :  { %4611 = vsyncpa [#allocation18], 1 }
0x362f   :  { %4612 = vsyncpa [#allocation21], 1 }
0x3630   :  { %4613 = vsyncpa [#allocation24], 1 }
0x3631   :  { %4614 = vsyncpa [#allocation27], 1 }
0x3632   :  { %4615 = vsyncpa [#allocation8], 1 }
0x3633   :  { %4616 = vsyncpa [#allocation9], 1 }
0x3634   :  { %4617 = vsyncpa [#allocation10], 1 }

</bundles_post_ra>
